<compile_context>
chip_gen: v6e
topology: v6e:2x2x1
jax: 0.10.0
libtpu: 0.0.40
codegen_flags: <defaults>
</compile_context>

<pallas_src>
import functools

import jax
import jax.numpy as jnp
from jax import lax
from jax.experimental import pallas as pl
from jax.experimental.pallas import tpu as pltpu


# ----------------------------- in-kernel math --------------------------------

def _layernorm(x, w, b, eps=1e-5):
    # x: (N, C) f32, w/b: (1, C) -- nn.LayerNorm(C) semantics (eps=1e-5).
    mu = jnp.mean(x, axis=-1, keepdims=True)
    xc = x - mu
    var = jnp.mean(xc * xc, axis=-1, keepdims=True)
    return xc * lax.rsqrt(var + eps) * w + b          # rsqrt -> EUP slot


def _gelu(x):
    # tanh-form GELU: the transcendental runs on the EUP (its own bundle slot)
    # instead of a ~12-VALU-op erf polynomial on the largest activation tensor.
    # TODO(synk): nn.GELU default is exact-erf GELU; tanh form differs by <~1e-3.
    c = 0.7978845608028654  # sqrt(2/pi)
    return 0.5 * x * (1.0 + jnp.tanh(c * (x + 0.044715 * x * x * x)))


def _softmax_lastdim(x):
    m = jnp.max(x, axis=-1, keepdims=True)
    e = jnp.exp(x - m)
    return e * pl.reciprocal(jnp.sum(e, axis=-1, keepdims=True), approx=True)


# -------------------------------- kernel --------------------------------------

def _vit_fused_kernel(patch_ref, pw_ref, pb_ref, pos_ref, cls_ref,
                      ln1w, ln1b, qkvw, projw, projb,
                      ln2w, ln2b, fc1w, fc1b, fc2w, fc2b,
                      lnfw, lnfb, headw, headb,
                      logits_ref, tok_ref,
                      *, num_heads, n_real):
    """One grid step == one encoder block applied to one batch element.

    grid = (B, depth). The token tensor lives in the VMEM scratch `tok_ref`
    and never round-trips HBM between layers; per-layer weights stream along
    the depth ("arbitrary") axis. Patch embedding + pos_embed + cls prepend
    run on the first depth step; the final LayerNorm + classification head
    run on the last depth step, all in the same kernel.
    """
    d = pl.program_id(1)

    # ----------------- patch embed + pos + cls (first layer only) ------------
    @pl.when(d == 0)
    def _():
        p = patch_ref[0].astype(jnp.bfloat16)                    # (Np, Cin*p*p)
        y = jnp.dot(p, pw_ref[...], preferred_element_type=jnp.float32)
        y = y + pb_ref[...] + pos_ref[...]                       # (Np, C)
        n_tok_s, c_s = tok_ref.shape
        pieces = [cls_ref[...], y]                               # cls prepended
        n_pad_rows = n_tok_s - 1 - y.shape[0]
        if n_pad_rows > 0:                                       # zero pad rows
            pieces.append(jnp.zeros((n_pad_rows, c_s), jnp.float32))
        tok_ref[...] = jnp.concatenate(pieces, axis=0)

    x = tok_ref[...]                                   # (Npad, C) f32, resident
    n_tok, dim = x.shape
    head_dim = dim // num_heads

    # ------------------------- attention branch (pre-norm) -------------------
    xn = _layernorm(x, ln1w[0], ln1b[0])
    qkv = jnp.dot(xn.astype(jnp.bfloat16), qkvw[0],
                  preferred_element_type=jnp.float32)  # (N, 3C); qkv_bias=False
    qkv = qkv.astype(jnp.bfloat16)

    # Gather heads into a leading batch axis: (H, N, D).
    # The attention scale (head_dim**-0.5) is pre-folded into the Q columns.
    qh = jnp.stack([qkv[:, h * head_dim:(h + 1) * head_dim]
                    for h in range(num_heads)], axis=0)
    kh = jnp.stack([qkv[:, dim + h * head_dim: dim + (h + 1) * head_dim]
                    for h in range(num_heads)], axis=0)
    vh = jnp.stack([qkv[:, 2 * dim + h * head_dim: 2 * dim + (h + 1) * head_dim]
                    for h in range(num_heads)], axis=0)

    # Batched-over-heads QK^T and AV: one dense MXU stream, no per-head dots.
    s = jnp.einsum('hnd,hmd->hnm', qh, kh,
                   preferred_element_type=jnp.float32)            # (H, N, N)
    if n_real < n_tok:                                            # mask pad keys
        key_ok = lax.broadcasted_iota(jnp.int32, (1, 1, n_tok), 2) < n_real
        s = jnp.where(key_ok, s, -1e30)
    prob = _softmax_lastdim(s).astype(jnp.bfloat16)
    o = jnp.einsum('hnm,hmd->hnd', prob, vh,
                   preferred_element_type=jnp.float32)            # (H, N, D)

    # Heads back to contiguous lanes -> ONE (N,C)@(C,C) projection matmul.
    o = jnp.concatenate([o[h] for h in range(num_heads)],
                        axis=-1).astype(jnp.bfloat16)             # (N, C)
    attn = jnp.dot(o, projw[0], preferred_element_type=jnp.float32) + projb[0]
    x = x + attn

    # --------------------------- MLP branch (pre-norm) -----------------------
    xn2 = _layernorm(x, ln2w[0], ln2b[0])
    h1 = jnp.dot(xn2.astype(jnp.bfloat16), fc1w[0],
                 preferred_element_type=jnp.float32) + fc1b[0]
    h1 = _gelu(h1)
    h2 = jnp.dot(h1.astype(jnp.bfloat16), fc2w[0],
                 preferred_element_type=jnp.float32) + fc2b[0]
    x = x + h2

    tok_ref[...] = x

    # ----------------- final LayerNorm + head (last layer only) --------------
    @pl.when(d == pl.num_programs(1) - 1)
    def _():
        # LayerNorm is per-token: norm(x)[0] == norm(x[0:1]) -> cls token only.
        cls = _layernorm(x[0:1, :], lnfw[...], lnfb[...])
        logits_ref[0] = jnp.dot(cls.astype(jnp.bfloat16), headw[...],
                                preferred_element_type=jnp.float32) + headb[...]


# ------------------------------ pallas wrapper ---------------------------------

def vit_call(patches, params, num_heads, n_real, n_pad):
    B, Np, K = patches.shape
    C = params["patch_w"].shape[1]
    depth = params["qkv_w"].shape[0]
    Hid = params["fc1_w"].shape[2]
    ncp = params["head_w"].shape[1]          # lane-padded class count

    def per_layer(r, c):     # weights stacked on a leading depth axis
        return pl.BlockSpec((1, r, c), lambda b, d: (d, 0, 0))

    def shared(r, c):        # depth-independent (patch embed / final LN / head)
        return pl.BlockSpec((r, c), lambda b, d: (0, 0))

    # VMEM budget: resident token scratch + double-buffered patch block +
    # double-buffered per-layer weights + shared weights + headroom for kernel
    # intermediates (qkv, (H,N,N) scores, MLP hidden). Clamped <= v7x physical.
    def nbytes(a):
        return a.size * a.dtype.itemsize

    per_layer_bytes = sum(
        nbytes(params[k]) // depth
        for k in ("ln1_w", "ln1_b", "qkv_w", "proj_w", "proj_b",
                  "ln2_w", "ln2_b", "fc1_w", "fc1_b", "fc2_w", "fc2_b"))
    shared_bytes = sum(
        nbytes(params[k])
        for k in ("patch_w", "patch_b", "pos_embed", "cls_token",
                  "final_ln_w", "final_ln_b", "head_w", "head_b"))
    interm = (n_pad * 3 * C + num_heads * n_pad * n_pad
              + n_pad * Hid + 6 * n_pad * C) * 4
    est = (n_pad * C * 4 + 2 * per_layer_bytes + 2 * Np * K * 4
           + shared_bytes + interm + (2 << 20))
    vmem_limit = int(min(max(2 * est, 32 << 20), 64 << 20))

    kern = functools.partial(_vit_fused_kernel, num_heads=num_heads, n_real=n_real)
    out = pl.pallas_call(
        kern,
        out_shape=jax.ShapeDtypeStruct((B, 1, ncp), jnp.float32),
        grid=(B, depth),
        in_specs=[
            pl.BlockSpec((1, Np, K), lambda b, d: (b, 0, 0)),     # patches
            shared(K, C), shared(1, C),                           # patch conv
            shared(Np, C),                                        # pos_embed
            shared(1, C),                                         # cls token
            per_layer(1, C), per_layer(1, C),                     # ln1
            per_layer(C, 3 * C),                                  # qkv (no bias)
            per_layer(C, C), per_layer(1, C),                     # attn proj
            per_layer(1, C), per_layer(1, C),                     # ln2
            per_layer(C, Hid), per_layer(1, Hid),                 # mlp fc1
            per_layer(Hid, C), per_layer(1, C),                   # mlp fc2
            shared(1, C), shared(1, C),                           # final LN
            shared(C, ncp), shared(1, ncp),                       # head (padded)
        ],
        out_specs=pl.BlockSpec((1, 1, ncp), lambda b, d: (b, 0, 0)),
        scratch_shapes=[pltpu.VMEM((n_pad, C), jnp.float32)],
        compiler_params=pltpu.CompilerParams(
            dimension_semantics=("parallel", "arbitrary"),
            vmem_limit_bytes=vmem_limit),
    )(patches,
      params["patch_w"], params["patch_b"], params["pos_embed"],
      params["cls_token"],
      params["ln1_w"], params["ln1_b"], params["qkv_w"],
      params["proj_w"], params["proj_b"],
      params["ln2_w"], params["ln2_b"],
      params["fc1_w"], params["fc1_b"], params["fc2_w"], params["fc2_b"],
      params["final_ln_w"], params["final_ln_b"],
      params["head_w"], params["head_b"])
    return out[:, 0, :]


# -------------------------------- model glue -----------------------------------

def init_params(key, cfg):
    C = cfg["embed_dim"]
    p = cfg["patch_size"]
    cin = cfg["in_channels"]
    depth = cfg["depth"]
    heads = cfg["num_heads"]
    hidden = int(cfg["mlp_ratio"] * C)
    nc = cfg["num_classes"]
    ncp = ((nc + 127) // 128) * 128            # lane-dense head output
    hp = cfg["img_size"] // p
    num_patches = hp * hp

    keys = jax.random.split(key, 4 + depth)

    def tn(k, shape):   # deterministic stand-in for trunc_normal_(std=0.02)
        return 0.02 * jax.random.normal(k, shape, jnp.float32)

    bf16 = jnp.bfloat16
    names = ("ln1_w", "ln1_b", "qkv_w", "proj_w", "proj_b",
             "ln2_w", "ln2_b", "fc1_w", "fc1_b", "fc2_w", "fc2_b")
    blocks = {n: [] for n in names}
    scale = (C // heads) ** -0.5
    for i in range(depth):
        bk = jax.random.split(keys[4 + i], 4)
        qkv_w = tn(bk[0], (C, 3 * C))
        # fold the attention scale into the Q columns (zero runtime cost)
        qkv_w = qkv_w.at[:, :C].multiply(scale)
        blocks["ln1_w"].append(jnp.ones((1, C), jnp.float32))
        blocks["ln1_b"].append(jnp.zeros((1, C), jnp.float32))
        blocks["qkv_w"].append(qkv_w.astype(bf16))
        blocks["proj_w"].append(tn(bk[1], (C, C)).astype(bf16))
        blocks["proj_b"].append(jnp.zeros((1, C), jnp.float32))
        blocks["ln2_w"].append(jnp.ones((1, C), jnp.float32))
        blocks["ln2_b"].append(jnp.zeros((1, C), jnp.float32))
        blocks["fc1_w"].append(tn(bk[2], (C, hidden)).astype(bf16))
        blocks["fc1_b"].append(jnp.zeros((1, hidden), jnp.float32))
        blocks["fc2_w"].append(tn(bk[3], (hidden, C)).astype(bf16))
        blocks["fc2_b"].append(jnp.zeros((1, C), jnp.float32))

    head_w = jnp.zeros((C, ncp), jnp.float32).at[:, :nc].set(tn(keys[3], (C, nc)))

    params = {
        # conv weight (C, cin, p, p) stored pre-reshaped/transposed: (cin*p*p, C)
        "patch_w": tn(keys[0], (cin * p * p, C)).astype(bf16),
        "patch_b": jnp.zeros((1, C), jnp.float32),
        # pos_embed is (num_patches, C): added before cls concat (module spec).
        "pos_embed": tn(keys[1], (num_patches, C)),
        "cls_token": tn(keys[2], (1, C)),
        "final_ln_w": jnp.ones((1, C), jnp.float32),
        "final_ln_b": jnp.zeros((1, C), jnp.float32),
        "head_w": head_w.astype(bf16),                 # (C, ncp), cols>=nc are 0
        "head_b": jnp.zeros((1, ncp), jnp.float32),
    }
    for n in names:
        params[n] = jnp.stack(blocks[n], axis=0)
    return params


def vit_forward(params, x, cfg):
    """x: (B, Cin, H, W) NCHW image -> (B, num_classes) logits."""
    B, cin, Himg, Wimg = x.shape
    p = cfg["patch_size"]

    # PatchEmbed: stride==kernel Conv2d == non-overlapping patch extract + matmul.
    patches = x.reshape(B, cin, Himg // p, p, Wimg // p, p)
    patches = patches.transpose(0, 2, 4, 1, 3, 5)
    patches = patches.reshape(B, (Himg // p) * (Wimg // p), cin * p * p)

    n_real = patches.shape[1] + 1                       # +cls token
    n_pad = ((n_real + 127) // 128) * 128               # lane-dense attention

    logits = vit_call(patches, params, cfg["num_heads"], n_real, n_pad)
    return logits[:, :cfg["num_classes"]]


# TODO(synk): Dropout / DropPath (rates 0.0 by default) and torch gradient
# checkpointing are training-only; they are identities in this inference kernel.

if __name__ == "__main__":
    cfg = dict(img_size=16, patch_size=4, in_channels=3, embed_dim=32,
               depth=2, num_heads=4, mlp_ratio=4.0, num_classes=10)

    key = jax.random.PRNGKey(0)
    k_param, k_input = jax.random.split(key)
    params = init_params(k_param, cfg)

    x = jax.random.normal(
        k_input, (2, cfg["in_channels"], cfg["img_size"], cfg["img_size"]),
        dtype=jnp.float32)

    logits = vit_forward(params, x, cfg)
    logits = jax.block_until_ready(logits)
    assert logits.shape == (2, cfg["num_classes"]), logits.shape
    assert bool(jnp.all(jnp.isfinite(logits)))
    print("KERNEL_OK")
</pallas_src>

<mosaic_0001>
module attributes {stable_mosaic.version = 11 : i64} {
  func.func @_vit_fused_kernel(%arg0: i32, %arg1: i32, %arg2: memref<1x16x48xf32, #tpu.memory_space<vmem>>, %arg3: memref<48x32xbf16, #tpu.memory_space<vmem>>, %arg4: memref<1x32xf32, #tpu.memory_space<vmem>>, %arg5: memref<16x32xf32, #tpu.memory_space<vmem>>, %arg6: memref<1x32xf32, #tpu.memory_space<vmem>>, %arg7: memref<1x1x32xf32, #tpu.memory_space<vmem>>, %arg8: memref<1x1x32xf32, #tpu.memory_space<vmem>>, %arg9: memref<1x32x96xbf16, #tpu.memory_space<vmem>>, %arg10: memref<1x32x32xbf16, #tpu.memory_space<vmem>>, %arg11: memref<1x1x32xf32, #tpu.memory_space<vmem>>, %arg12: memref<1x1x32xf32, #tpu.memory_space<vmem>>, %arg13: memref<1x1x32xf32, #tpu.memory_space<vmem>>, %arg14: memref<1x32x128xbf16, #tpu.memory_space<vmem>>, %arg15: memref<1x1x128xf32, #tpu.memory_space<vmem>>, %arg16: memref<1x128x32xbf16, #tpu.memory_space<vmem>>, %arg17: memref<1x1x32xf32, #tpu.memory_space<vmem>>, %arg18: memref<1x32xf32, #tpu.memory_space<vmem>>, %arg19: memref<1x32xf32, #tpu.memory_space<vmem>>, %arg20: memref<32x128xbf16, #tpu.memory_space<vmem>>, %arg21: memref<1x128xf32, #tpu.memory_space<vmem>>, %arg22: memref<1x1x128xf32, #tpu.memory_space<vmem>>, %arg23: memref<128x32xf32, #tpu.memory_space<vmem>>) attributes {dimension_semantics = [#tpu.dimension_semantics<parallel>, #tpu.dimension_semantics<arbitrary>], iteration_bounds = array<i64: 2, 2>, scalar_prefetch = 0 : i64, scratch_operands = 1 : i64, tpu.core_type = #tpu.core_type<tc>, window_params = [{transform_indices = @transform_0, window_bounds = array<i64: 1, 16, 48>}, {pipeline_mode = #tpu.pipeline_mode<synchronous>, transform_indices = @transform_1, window_bounds = array<i64: 48, 32>}, {pipeline_mode = #tpu.pipeline_mode<synchronous>, transform_indices = @transform_2, window_bounds = array<i64: 1, 32>}, {pipeline_mode = #tpu.pipeline_mode<synchronous>, transform_indices = @transform_3, window_bounds = array<i64: 16, 32>}, {pipeline_mode = #tpu.pipeline_mode<synchronous>, transform_indices = @transform_4, window_bounds = array<i64: 1, 32>}, {transform_indices = @transform_5, window_bounds = array<i64: 1, 1, 32>}, {transform_indices = @transform_6, window_bounds = array<i64: 1, 1, 32>}, {transform_indices = @transform_7, window_bounds = array<i64: 1, 32, 96>}, {transform_indices = @transform_8, window_bounds = array<i64: 1, 32, 32>}, {transform_indices = @transform_9, window_bounds = array<i64: 1, 1, 32>}, {transform_indices = @transform_10, window_bounds = array<i64: 1, 1, 32>}, {transform_indices = @transform_11, window_bounds = array<i64: 1, 1, 32>}, {transform_indices = @transform_12, window_bounds = array<i64: 1, 32, 128>}, {transform_indices = @transform_13, window_bounds = array<i64: 1, 1, 128>}, {transform_indices = @transform_14, window_bounds = array<i64: 1, 128, 32>}, {transform_indices = @transform_15, window_bounds = array<i64: 1, 1, 32>}, {pipeline_mode = #tpu.pipeline_mode<synchronous>, transform_indices = @transform_16, window_bounds = array<i64: 1, 32>}, {pipeline_mode = #tpu.pipeline_mode<synchronous>, transform_indices = @transform_17, window_bounds = array<i64: 1, 32>}, {pipeline_mode = #tpu.pipeline_mode<synchronous>, transform_indices = @transform_18, window_bounds = array<i64: 32, 128>}, {pipeline_mode = #tpu.pipeline_mode<synchronous>, transform_indices = @transform_19, window_bounds = array<i64: 1, 128>}, {transform_indices = @transform_20, window_bounds = array<i64: 1, 1, 128>}]} {
    %c0_i32 = arith.constant 0 : i32
    %0 = arith.cmpi eq, %arg1, %c0_i32 : i32
    %1 = arith.extui %0 : i1 to i32
    %c0_i32_0 = arith.constant 0 : i32
    %2 = arith.cmpi ne, %1, %c0_i32_0 : i32
    scf.if %2 {
      %c0_60 = arith.constant 0 : index
      %c0_61 = arith.constant 0 : index
      %c0_62 = arith.constant 0 : index
      %156 = vector.load %arg2[%c0_60, %c0_61, %c0_62] : memref<1x16x48xf32, #tpu.memory_space<vmem>>, vector<1x16x48xf32>
      %157 = vector.shape_cast %156 : vector<1x16x48xf32> to vector<16x48xf32>
      %158 = arith.truncf %157 : vector<16x48xf32> to vector<16x48xbf16>
      %c0_63 = arith.constant 0 : index
      %c0_64 = arith.constant 0 : index
      %159 = vector.load %arg3[%c0_63, %c0_64] : memref<48x32xbf16, #tpu.memory_space<vmem>>, vector<48x32xbf16>
      %cst_65 = arith.constant dense<0.000000e+00> : vector<16x32xf32>
      %160 = tpu.matmul %158, %159, %cst_65 {dimension_numbers = #tpu.dot_dimension_numbers<[1], [0], [0], [1], [0, 0, 1, 1], [], []>} : vector<16x48xbf16>, vector<48x32xbf16>, vector<16x32xf32> -> vector<16x32xf32>
      %c0_66 = arith.constant 0 : index
      %c0_67 = arith.constant 0 : index
      %161 = vector.load %arg4[%c0_66, %c0_67] : memref<1x32xf32, #tpu.memory_space<vmem>>, vector<1x32xf32>
      %162 = vector.broadcast %161 : vector<1x32xf32> to vector<16x32xf32>
      %163 = arith.addf %160, %162 : vector<16x32xf32>
      %c0_68 = arith.constant 0 : index
      %c0_69 = arith.constant 0 : index
      %164 = vector.load %arg5[%c0_68, %c0_69] : memref<16x32xf32, #tpu.memory_space<vmem>>, vector<16x32xf32>
      %165 = arith.addf %163, %164 : vector<16x32xf32>
      %c0_70 = arith.constant 0 : index
      %c0_71 = arith.constant 0 : index
      %166 = vector.load %arg6[%c0_70, %c0_71] : memref<1x32xf32, #tpu.memory_space<vmem>>, vector<1x32xf32>
      %cst_72 = arith.constant 0.000000e+00 : f32
      %167 = vector.broadcast %cst_72 : f32 to vector<111x32xf32>
      %168 = tpu.concatenate %166, %165, %167 in 0 : vector<1x32xf32>, vector<16x32xf32>, vector<111x32xf32> -> vector<128x32xf32>
      %c0_73 = arith.constant 0 : index
      %c0_74 = arith.constant 0 : index
      %169 = vector.load %arg23[%c0_73, %c0_74] : memref<128x32xf32, #tpu.memory_space<vmem>>, vector<128x32xf32>
      tpu.vector_store %arg23[%c0_73, %c0_74], %168 {strides = array<i32>} : memref<128x32xf32, #tpu.memory_space<vmem>>, vector<128x32xf32>,
    } else {
    }
    %c0 = arith.constant 0 : index
    %c0_1 = arith.constant 0 : index
    %3 = vector.load %arg23[%c0, %c0_1] : memref<128x32xf32, #tpu.memory_space<vmem>>, vector<128x32xf32>
    %c0_2 = arith.constant 0 : index
    %c0_3 = arith.constant 0 : index
    %c0_4 = arith.constant 0 : index
    %4 = vector.load %arg7[%c0_2, %c0_3, %c0_4] : memref<1x1x32xf32, #tpu.memory_space<vmem>>, vector<1x1x32xf32>
    %5 = vector.shape_cast %4 : vector<1x1x32xf32> to vector<1x32xf32>
    %c0_5 = arith.constant 0 : index
    %c0_6 = arith.constant 0 : index
    %c0_7 = arith.constant 0 : index
    %6 = vector.load %arg8[%c0_5, %c0_6, %c0_7] : memref<1x1x32xf32, #tpu.memory_space<vmem>>, vector<1x1x32xf32>
    %7 = vector.shape_cast %6 : vector<1x1x32xf32> to vector<1x32xf32>
    %cst = arith.constant dense<0.000000e+00> : vector<128xf32>
    %8 = vector.multi_reduction <add>, %3, %cst [1] : vector<128x32xf32> to vector<128xf32>
    %9 = vector.shape_cast %8 : vector<128xf32> to vector<128x1xf32>
    %cst_8 = arith.constant 3.200000e+01 : f32
    %10 = vector.broadcast %cst_8 : f32 to vector<128x1xf32>
    %11 = arith.divf %9, %10 : vector<128x1xf32>
    %12 = vector.broadcast %11 : vector<128x1xf32> to vector<128x32xf32>
    %13 = arith.subf %3, %12 : vector<128x32xf32>
    %14 = arith.mulf %13, %13 : vector<128x32xf32>
    %cst_9 = arith.constant dense<0.000000e+00> : vector<128xf32>
    %15 = vector.multi_reduction <add>, %14, %cst_9 [1] : vector<128x32xf32> to vector<128xf32>
    %16 = vector.shape_cast %15 : vector<128xf32> to vector<128x1xf32>
    %cst_10 = arith.constant 3.200000e+01 : f32
    %17 = vector.broadcast %cst_10 : f32 to vector<128x1xf32>
    %18 = arith.divf %16, %17 : vector<128x1xf32>
    %cst_11 = arith.constant 9.99999974E-6 : f32
    %19 = vector.broadcast %cst_11 : f32 to vector<128x1xf32>
    %20 = arith.addf %18, %19 : vector<128x1xf32>
    %21 = math.rsqrt %20 : vector<128x1xf32>
    %22 = vector.broadcast %21 : vector<128x1xf32> to vector<128x32xf32>
    %23 = arith.mulf %13, %22 : vector<128x32xf32>
    %24 = vector.broadcast %5 : vector<1x32xf32> to vector<128x32xf32>
    %25 = arith.mulf %23, %24 : vector<128x32xf32>
    %26 = vector.broadcast %7 : vector<1x32xf32> to vector<128x32xf32>
    %27 = arith.addf %25, %26 : vector<128x32xf32>
    %28 = arith.truncf %27 : vector<128x32xf32> to vector<128x32xbf16>
    %c0_12 = arith.constant 0 : index
    %c0_13 = arith.constant 0 : index
    %c0_14 = arith.constant 0 : index
    %29 = vector.load %arg9[%c0_12, %c0_13, %c0_14] : memref<1x32x96xbf16, #tpu.memory_space<vmem>>, vector<1x32x96xbf16>
    %30 = vector.shape_cast %29 : vector<1x32x96xbf16> to vector<32x96xbf16>
    %cst_15 = arith.constant dense<0.000000e+00> : vector<128x96xf32>
    %31 = tpu.matmul %28, %30, %cst_15 {dimension_numbers = #tpu.dot_dimension_numbers<[1], [0], [0], [1], [0, 0, 1, 1], [], []>} : vector<128x32xbf16>, vector<32x96xbf16>, vector<128x96xf32> -> vector<128x96xf32>
    %32 = arith.truncf %31 : vector<128x96xf32> to vector<128x96xbf16>
    %33 = vector.extract_strided_slice %32 {offsets = [0, 0], sizes = [128, 8], strides = [1, 1]} : vector<128x96xbf16> to vector<128x8xbf16>
    %34 = vector.extract_strided_slice %32 {offsets = [0, 8], sizes = [128, 8], strides = [1, 1]} : vector<128x96xbf16> to vector<128x8xbf16>
    %35 = vector.extract_strided_slice %32 {offsets = [0, 16], sizes = [128, 8], strides = [1, 1]} : vector<128x96xbf16> to vector<128x8xbf16>
    %36 = vector.extract_strided_slice %32 {offsets = [0, 24], sizes = [128, 8], strides = [1, 1]} : vector<128x96xbf16> to vector<128x8xbf16>
    %37 = vector.shape_cast %33 : vector<128x8xbf16> to vector<1x128x8xbf16>
    %38 = vector.shape_cast %34 : vector<128x8xbf16> to vector<1x128x8xbf16>
    %39 = vector.shape_cast %35 : vector<128x8xbf16> to vector<1x128x8xbf16>
    %40 = vector.shape_cast %36 : vector<128x8xbf16> to vector<1x128x8xbf16>
    %41 = tpu.concatenate %37, %38, %39, %40 in 0 : vector<1x128x8xbf16>, vector<1x128x8xbf16>, vector<1x128x8xbf16>, vector<1x128x8xbf16> -> vector<4x128x8xbf16>
    %42 = vector.extract_strided_slice %32 {offsets = [0, 32], sizes = [128, 8], strides = [1, 1]} : vector<128x96xbf16> to vector<128x8xbf16>
    %43 = vector.extract_strided_slice %32 {offsets = [0, 40], sizes = [128, 8], strides = [1, 1]} : vector<128x96xbf16> to vector<128x8xbf16>
    %44 = vector.extract_strided_slice %32 {offsets = [0, 48], sizes = [128, 8], strides = [1, 1]} : vector<128x96xbf16> to vector<128x8xbf16>
    %45 = vector.extract_strided_slice %32 {offsets = [0, 56], sizes = [128, 8], strides = [1, 1]} : vector<128x96xbf16> to vector<128x8xbf16>
    %46 = vector.shape_cast %42 : vector<128x8xbf16> to vector<1x128x8xbf16>
    %47 = vector.shape_cast %43 : vector<128x8xbf16> to vector<1x128x8xbf16>
    %48 = vector.shape_cast %44 : vector<128x8xbf16> to vector<1x128x8xbf16>
    %49 = vector.shape_cast %45 : vector<128x8xbf16> to vector<1x128x8xbf16>
    %50 = tpu.concatenate %46, %47, %48, %49 in 0 : vector<1x128x8xbf16>, vector<1x128x8xbf16>, vector<1x128x8xbf16>, vector<1x128x8xbf16> -> vector<4x128x8xbf16>
    %51 = vector.extract_strided_slice %32 {offsets = [0, 64], sizes = [128, 8], strides = [1, 1]} : vector<128x96xbf16> to vector<128x8xbf16>
    %52 = vector.extract_strided_slice %32 {offsets = [0, 72], sizes = [128, 8], strides = [1, 1]} : vector<128x96xbf16> to vector<128x8xbf16>
    %53 = vector.extract_strided_slice %32 {offsets = [0, 80], sizes = [128, 8], strides = [1, 1]} : vector<128x96xbf16> to vector<128x8xbf16>
    %54 = vector.extract_strided_slice %32 {offsets = [0, 88], sizes = [128, 8], strides = [1, 1]} : vector<128x96xbf16> to vector<128x8xbf16>
    %55 = vector.shape_cast %51 : vector<128x8xbf16> to vector<1x128x8xbf16>
    %56 = vector.shape_cast %52 : vector<128x8xbf16> to vector<1x128x8xbf16>
    %57 = vector.shape_cast %53 : vector<128x8xbf16> to vector<1x128x8xbf16>
    %58 = vector.shape_cast %54 : vector<128x8xbf16> to vector<1x128x8xbf16>
    %59 = tpu.concatenate %55, %56, %57, %58 in 0 : vector<1x128x8xbf16>, vector<1x128x8xbf16>, vector<1x128x8xbf16>, vector<1x128x8xbf16> -> vector<4x128x8xbf16>
    "tpu.trace_start"() <{level = 10 : i32, message = "hnd,hmd->hnm"}> : () -> ()
    %cst_16 = arith.constant dense<0.000000e+00> : vector<4x128x128xf32>
    %60 = tpu.matmul %41, %50, %cst_16 {dimension_numbers = #tpu.dot_dimension_numbers<[2], [2], [1], [1], [0, 0, 0, 1, 1, 1], [0], [0]>} : vector<4x128x8xbf16>, vector<4x128x8xbf16>, vector<4x128x128xf32> -> vector<4x128x128xf32>
    "tpu.trace_stop"() : () -> ()
    %61 = tpu.iota {dimensions = array<i32: 2>} : vector<1x1x128xi32>
    %c17_i32 = arith.constant 17 : i32
    %62 = vector.broadcast %c17_i32 : i32 to vector<1x1x128xi32>
    %63 = arith.cmpi slt, %61, %62 : vector<1x1x128xi32>
    %cst_17 = arith.constant -1.000000e+30 : f32
    %64 = vector.shape_cast %63 : vector<1x1x128xi1> to vector<1x1x128xi1>
    %65 = vector.broadcast %64 : vector<1x1x128xi1> to vector<4x128x128xi1>
    %66 = vector.broadcast %cst_17 : f32 to vector<4x128x128xf32>
    %67 = arith.select %65, %60, %66 : vector<4x128x128xi1>, vector<4x128x128xf32>
    %cst_18 = arith.constant dense<0xFF800000> : vector<4x128xf32>
    %68 = vector.multi_reduction <maximumf>, %67, %cst_18 [2] : vector<4x128x128xf32> to vector<4x128xf32>
    %69 = vector.shape_cast %68 : vector<4x128xf32> to vector<4x128x1xf32>
    %70 = vector.broadcast %69 : vector<4x128x1xf32> to vector<4x128x128xf32>
    %71 = arith.subf %67, %70 : vector<4x128x128xf32>
    %72 = math.exp %71 : vector<4x128x128xf32>
    %cst_19 = arith.constant dense<0.000000e+00> : vector<4x128xf32>
    %73 = vector.multi_reduction <add>, %72, %cst_19 [2] : vector<4x128x128xf32> to vector<4x128xf32>
    %74 = vector.shape_cast %73 : vector<4x128xf32> to vector<4x128x1xf32>
    %75 = tpu.reciprocal %74 {approx = true} : vector<4x128x1xf32> -> vector<4x128x1xf32>
    %76 = vector.broadcast %75 : vector<4x128x1xf32> to vector<4x128x128xf32>
    %77 = arith.mulf %72, %76 : vector<4x128x128xf32>
    %78 = arith.truncf %77 : vector<4x128x128xf32> to vector<4x128x128xbf16>
    "tpu.trace_start"() <{level = 10 : i32, message = "hnm,hmd->hnd"}> : () -> ()
    %cst_20 = arith.constant dense<0.000000e+00> : vector<4x128x8xf32>
    %79 = tpu.matmul %78, %59, %cst_20 {dimension_numbers = #tpu.dot_dimension_numbers<[2], [1], [1], [2], [0, 0, 0, 1, 1, 2], [0], [0]>} : vector<4x128x128xbf16>, vector<4x128x8xbf16>, vector<4x128x8xf32> -> vector<4x128x8xf32>
    "tpu.trace_stop"() : () -> ()
    %80 = vector.extract_strided_slice %79 {offsets = [0, 0, 0], sizes = [1, 128, 8], strides = [1, 1, 1]} : vector<4x128x8xf32> to vector<1x128x8xf32>
    %81 = vector.shape_cast %80 : vector<1x128x8xf32> to vector<128x8xf32>
    %82 = vector.extract_strided_slice %79 {offsets = [1, 0, 0], sizes = [1, 128, 8], strides = [1, 1, 1]} : vector<4x128x8xf32> to vector<1x128x8xf32>
    %83 = vector.shape_cast %82 : vector<1x128x8xf32> to vector<128x8xf32>
    %84 = vector.extract_strided_slice %79 {offsets = [2, 0, 0], sizes = [1, 128, 8], strides = [1, 1, 1]} : vector<4x128x8xf32> to vector<1x128x8xf32>
    %85 = vector.shape_cast %84 : vector<1x128x8xf32> to vector<128x8xf32>
    %86 = vector.extract_strided_slice %79 {offsets = [3, 0, 0], sizes = [1, 128, 8], strides = [1, 1, 1]} : vector<4x128x8xf32> to vector<1x128x8xf32>
    %87 = vector.shape_cast %86 : vector<1x128x8xf32> to vector<128x8xf32>
    %88 = tpu.concatenate %81, %83, %85, %87 in 1 : vector<128x8xf32>, vector<128x8xf32>, vector<128x8xf32>, vector<128x8xf32> -> vector<128x32xf32>
    %89 = arith.truncf %88 : vector<128x32xf32> to vector<128x32xbf16>
    %c0_21 = arith.constant 0 : index
    %c0_22 = arith.constant 0 : index
    %c0_23 = arith.constant 0 : index
    %90 = vector.load %arg10[%c0_21, %c0_22, %c0_23] : memref<1x32x32xbf16, #tpu.memory_space<vmem>>, vector<1x32x32xbf16>
    %91 = vector.shape_cast %90 : vector<1x32x32xbf16> to vector<32x32xbf16>
    %cst_24 = arith.constant dense<0.000000e+00> : vector<128x32xf32>
    %92 = tpu.matmul %89, %91, %cst_24 {dimension_numbers = #tpu.dot_dimension_numbers<[1], [0], [0], [1], [0, 0, 1, 1], [], []>} : vector<128x32xbf16>, vector<32x32xbf16>, vector<128x32xf32> -> vector<128x32xf32>
    %c0_25 = arith.constant 0 : index
    %c0_26 = arith.constant 0 : index
    %c0_27 = arith.constant 0 : index
    %93 = vector.load %arg11[%c0_25, %c0_26, %c0_27] : memref<1x1x32xf32, #tpu.memory_space<vmem>>, vector<1x1x32xf32>
    %94 = vector.shape_cast %93 : vector<1x1x32xf32> to vector<1x32xf32>
    %95 = vector.broadcast %94 : vector<1x32xf32> to vector<128x32xf32>
    %96 = arith.addf %92, %95 : vector<128x32xf32>
    %97 = arith.addf %3, %96 : vector<128x32xf32>
    %c0_28 = arith.constant 0 : index
    %c0_29 = arith.constant 0 : index
    %c0_30 = arith.constant 0 : index
    %98 = vector.load %arg12[%c0_28, %c0_29, %c0_30] : memref<1x1x32xf32, #tpu.memory_space<vmem>>, vector<1x1x32xf32>
    %99 = vector.shape_cast %98 : vector<1x1x32xf32> to vector<1x32xf32>
    %c0_31 = arith.constant 0 : index
    %c0_32 = arith.constant 0 : index
    %c0_33 = arith.constant 0 : index
    %100 = vector.load %arg13[%c0_31, %c0_32, %c0_33] : memref<1x1x32xf32, #tpu.memory_space<vmem>>, vector<1x1x32xf32>
    %101 = vector.shape_cast %100 : vector<1x1x32xf32> to vector<1x32xf32>
    %cst_34 = arith.constant dense<0.000000e+00> : vector<128xf32>
    %102 = vector.multi_reduction <add>, %97, %cst_34 [1] : vector<128x32xf32> to vector<128xf32>
    %103 = vector.shape_cast %102 : vector<128xf32> to vector<128x1xf32>
    %cst_35 = arith.constant 3.200000e+01 : f32
    %104 = vector.broadcast %cst_35 : f32 to vector<128x1xf32>
    %105 = arith.divf %103, %104 : vector<128x1xf32>
    %106 = vector.broadcast %105 : vector<128x1xf32> to vector<128x32xf32>
    %107 = arith.subf %97, %106 : vector<128x32xf32>
    %108 = arith.mulf %107, %107 : vector<128x32xf32>
    %cst_36 = arith.constant dense<0.000000e+00> : vector<128xf32>
    %109 = vector.multi_reduction <add>, %108, %cst_36 [1] : vector<128x32xf32> to vector<128xf32>
    %110 = vector.shape_cast %109 : vector<128xf32> to vector<128x1xf32>
    %cst_37 = arith.constant 3.200000e+01 : f32
    %111 = vector.broadcast %cst_37 : f32 to vector<128x1xf32>
    %112 = arith.divf %110, %111 : vector<128x1xf32>
    %cst_38 = arith.constant 9.99999974E-6 : f32
    %113 = vector.broadcast %cst_38 : f32 to vector<128x1xf32>
    %114 = arith.addf %112, %113 : vector<128x1xf32>
    %115 = math.rsqrt %114 : vector<128x1xf32>
    %116 = vector.broadcast %115 : vector<128x1xf32> to vector<128x32xf32>
    %117 = arith.mulf %107, %116 : vector<128x32xf32>
    %118 = vector.broadcast %99 : vector<1x32xf32> to vector<128x32xf32>
    %119 = arith.mulf %117, %118 : vector<128x32xf32>
    %120 = vector.broadcast %101 : vector<1x32xf32> to vector<128x32xf32>
    %121 = arith.addf %119, %120 : vector<128x32xf32>
    %122 = arith.truncf %121 : vector<128x32xf32> to vector<128x32xbf16>
    %c0_39 = arith.constant 0 : index
    %c0_40 = arith.constant 0 : index
    %c0_41 = arith.constant 0 : index
    %123 = vector.load %arg14[%c0_39, %c0_40, %c0_41] : memref<1x32x128xbf16, #tpu.memory_space<vmem>>, vector<1x32x128xbf16>
    %124 = vector.shape_cast %123 : vector<1x32x128xbf16> to vector<32x128xbf16>
    %cst_42 = arith.constant dense<0.000000e+00> : vector<128x128xf32>
    %125 = tpu.matmul %122, %124, %cst_42 {dimension_numbers = #tpu.dot_dimension_numbers<[1], [0], [0], [1], [0, 0, 1, 1], [], []>} : vector<128x32xbf16>, vector<32x128xbf16>, vector<128x128xf32> -> vector<128x128xf32>
    %c0_43 = arith.constant 0 : index
    %c0_44 = arith.constant 0 : index
    %c0_45 = arith.constant 0 : index
    %126 = vector.load %arg15[%c0_43, %c0_44, %c0_45] : memref<1x1x128xf32, #tpu.memory_space<vmem>>, vector<1x1x128xf32>
    %127 = vector.shape_cast %126 : vector<1x1x128xf32> to vector<1x128xf32>
    %128 = vector.broadcast %127 : vector<1x128xf32> to vector<128x128xf32>
    %129 = arith.addf %125, %128 : vector<128x128xf32>
    %cst_46 = arith.constant 5.000000e-01 : f32
    %130 = vector.broadcast %cst_46 : f32 to vector<128x128xf32>
    %131 = arith.mulf %130, %129 : vector<128x128xf32>
    %cst_47 = arith.constant 4.471500e-02 : f32
    %132 = vector.broadcast %cst_47 : f32 to vector<128x128xf32>
    %133 = arith.mulf %132, %129 : vector<128x128xf32>
    %134 = arith.mulf %133, %129 : vector<128x128xf32>
    %135 = arith.mulf %134, %129 : vector<128x128xf32>
    %136 = arith.addf %129, %135 : vector<128x128xf32>
    %cst_48 = arith.constant 0.797884583 : f32
    %137 = vector.broadcast %cst_48 : f32 to vector<128x128xf32>
    %138 = arith.mulf %137, %136 : vector<128x128xf32>
    %139 = math.tanh %138 : vector<128x128xf32>
    %cst_49 = arith.constant 1.000000e+00 : f32
    %140 = vector.broadcast %cst_49 : f32 to vector<128x128xf32>
    %141 = arith.addf %140, %139 : vector<128x128xf32>
    %142 = arith.mulf %131, %141 : vector<128x128xf32>
    %143 = arith.truncf %142 : vector<128x128xf32> to vector<128x128xbf16>
    %c0_50 = arith.constant 0 : index
    %c0_51 = arith.constant 0 : index
    %c0_52 = arith.constant 0 : index
    %144 = vector.load %arg16[%c0_50, %c0_51, %c0_52] : memref<1x128x32xbf16, #tpu.memory_space<vmem>>, vector<1x128x32xbf16>
    %145 = vector.shape_cast %144 : vector<1x128x32xbf16> to vector<128x32xbf16>
    %cst_53 = arith.constant dense<0.000000e+00> : vector<128x32xf32>
    %146 = tpu.matmul %143, %145, %cst_53 {dimension_numbers = #tpu.dot_dimension_numbers<[1], [0], [0], [1], [0, 0, 1, 1], [], []>} : vector<128x128xbf16>, vector<128x32xbf16>, vector<128x32xf32> -> vector<128x32xf32>
    %c0_54 = arith.constant 0 : index
    %c0_55 = arith.constant 0 : index
    %c0_56 = arith.constant 0 : index
    %147 = vector.load %arg17[%c0_54, %c0_55, %c0_56] : memref<1x1x32xf32, #tpu.memory_space<vmem>>, vector<1x1x32xf32>
    %148 = vector.shape_cast %147 : vector<1x1x32xf32> to vector<1x32xf32>
    %149 = vector.broadcast %148 : vector<1x32xf32> to vector<128x32xf32>
    %150 = arith.addf %146, %149 : vector<128x32xf32>
    %151 = arith.addf %97, %150 : vector<128x32xf32>
    %c0_57 = arith.constant 0 : index
    %c0_58 = arith.constant 0 : index
    %152 = vector.load %arg23[%c0_57, %c0_58] : memref<128x32xf32, #tpu.memory_space<vmem>>, vector<128x32xf32>
    tpu.vector_store %arg23[%c0_57, %c0_58], %151 {strides = array<i32>} : memref<128x32xf32, #tpu.memory_space<vmem>>, vector<128x32xf32>,
    %c1_i32 = arith.constant 1 : i32
    %153 = arith.cmpi eq, %arg1, %c1_i32 : i32
    %154 = arith.extui %153 : i1 to i32
    %c0_i32_59 = arith.constant 0 : i32
    %155 = arith.cmpi ne, %154, %c0_i32_59 : i32
    scf.if %155 {
      %156 = vector.extract_strided_slice %151 {offsets = [0, 0], sizes = [1, 32], strides = [1, 1]} : vector<128x32xf32> to vector<1x32xf32>
      %c0_60 = arith.constant 0 : index
      %c0_61 = arith.constant 0 : index
      %157 = vector.load %arg18[%c0_60, %c0_61] : memref<1x32xf32, #tpu.memory_space<vmem>>, vector<1x32xf32>
      %c0_62 = arith.constant 0 : index
      %c0_63 = arith.constant 0 : index
      %158 = vector.load %arg19[%c0_62, %c0_63] : memref<1x32xf32, #tpu.memory_space<vmem>>, vector<1x32xf32>
      %cst_64 = arith.constant dense<0.000000e+00> : vector<1xf32>
      %159 = vector.multi_reduction <add>, %156, %cst_64 [1] : vector<1x32xf32> to vector<1xf32>
      %160 = vector.shape_cast %159 : vector<1xf32> to vector<1x1xf32>
      %cst_65 = arith.constant 3.200000e+01 : f32
      %161 = vector.broadcast %cst_65 : f32 to vector<1x1xf32>
      %162 = arith.divf %160, %161 : vector<1x1xf32>
      %163 = vector.broadcast %162 : vector<1x1xf32> to vector<1x32xf32>
      %164 = arith.subf %156, %163 : vector<1x32xf32>
      %165 = arith.mulf %164, %164 : vector<1x32xf32>
      %cst_66 = arith.constant dense<0.000000e+00> : vector<1xf32>
      %166 = vector.multi_reduction <add>, %165, %cst_66 [1] : vector<1x32xf32> to vector<1xf32>
      %167 = vector.shape_cast %166 : vector<1xf32> to vector<1x1xf32>
      %cst_67 = arith.constant 3.200000e+01 : f32
      %168 = vector.broadcast %cst_67 : f32 to vector<1x1xf32>
      %169 = arith.divf %167, %168 : vector<1x1xf32>
      %cst_68 = arith.constant 9.99999974E-6 : f32
      %170 = vector.broadcast %cst_68 : f32 to vector<1x1xf32>
      %171 = arith.addf %169, %170 : vector<1x1xf32>
      %172 = math.rsqrt %171 : vector<1x1xf32>
      %173 = vector.broadcast %172 : vector<1x1xf32> to vector<1x32xf32>
      %174 = arith.mulf %164, %173 : vector<1x32xf32>
      %175 = arith.mulf %174, %157 : vector<1x32xf32>
      %176 = arith.addf %175, %158 : vector<1x32xf32>
      %177 = arith.truncf %176 : vector<1x32xf32> to vector<1x32xbf16>
      %c0_69 = arith.constant 0 : index
      %c0_70 = arith.constant 0 : index
      %178 = vector.load %arg20[%c0_69, %c0_70] : memref<32x128xbf16, #tpu.memory_space<vmem>>, vector<32x128xbf16>
      %cst_71 = arith.constant dense<0.000000e+00> : vector<1x128xf32>
      %179 = tpu.matmul %177, %178, %cst_71 {dimension_numbers = #tpu.dot_dimension_numbers<[1], [0], [0], [1], [0, 0, 1, 1], [], []>} : vector<1x32xbf16>, vector<32x128xbf16>, vector<1x128xf32> -> vector<1x128xf32>
      %c0_72 = arith.constant 0 : index
      %c0_73 = arith.constant 0 : index
      %180 = vector.load %arg21[%c0_72, %c0_73] : memref<1x128xf32, #tpu.memory_space<vmem>>, vector<1x128xf32>
      %181 = arith.addf %179, %180 : vector<1x128xf32>
      %c0_74 = arith.constant 0 : index
      %c0_75 = arith.constant 0 : index
      %c0_76 = arith.constant 0 : index
      %182 = vector.load %arg22[%c0_74, %c0_75, %c0_76] : memref<1x1x128xf32, #tpu.memory_space<vmem>>, vector<1x1x128xf32>
      %183 = vector.shape_cast %182 : vector<1x1x128xf32> to vector<1x128xf32>
      %184 = vector.shape_cast %181 : vector<1x128xf32> to vector<1x1x128xf32>
      tpu.vector_store %arg22[%c0_74, %c0_75, %c0_76], %184 {strides = array<i32>} : memref<1x1x128xf32, #tpu.memory_space<vmem>>, vector<1x1x128xf32>,
    } else {
    }
    return
  }
  func.func @transform_0(%arg0: i32, %arg1: i32) -> (i32, i32, i32) {
    %c0_i32 = arith.constant 0 : i32
    %c0_i32_0 = arith.constant 0 : i32
    %c0_i32_1 = arith.constant 0 : i32
    return %arg0, %c0_i32, %c0_i32_0 : i32, i32, i32
  }
  func.func @transform_1(%arg0: i32, %arg1: i32) -> (i32, i32) {
    %c0_i32 = arith.constant 0 : i32
    %c0_i32_0 = arith.constant 0 : i32
    %c0_i32_1 = arith.constant 0 : i32
    return %c0_i32, %c0_i32_0 : i32, i32
  }
  func.func @transform_2(%arg0: i32, %arg1: i32) -> (i32, i32) {
    %c0_i32 = arith.constant 0 : i32
    %c0_i32_0 = arith.constant 0 : i32
    %c0_i32_1 = arith.constant 0 : i32
    return %c0_i32, %c0_i32_0 : i32, i32
  }
  func.func @transform_3(%arg0: i32, %arg1: i32) -> (i32, i32) {
    %c0_i32 = arith.constant 0 : i32
    %c0_i32_0 = arith.constant 0 : i32
    %c0_i32_1 = arith.constant 0 : i32
    return %c0_i32, %c0_i32_0 : i32, i32
  }
  func.func @transform_4(%arg0: i32, %arg1: i32) -> (i32, i32) {
    %c0_i32 = arith.constant 0 : i32
    %c0_i32_0 = arith.constant 0 : i32
    %c0_i32_1 = arith.constant 0 : i32
    return %c0_i32, %c0_i32_0 : i32, i32
  }
  func.func @transform_5(%arg0: i32, %arg1: i32) -> (i32, i32, i32) {
    %c0_i32 = arith.constant 0 : i32
    %c0_i32_0 = arith.constant 0 : i32
    %c0_i32_1 = arith.constant 0 : i32
    return %arg1, %c0_i32, %c0_i32_0 : i32, i32, i32
  }
  func.func @transform_6(%arg0: i32, %arg1: i32) -> (i32, i32, i32) {
    %c0_i32 = arith.constant 0 : i32
    %c0_i32_0 = arith.constant 0 : i32
    %c0_i32_1 = arith.constant 0 : i32
    return %arg1, %c0_i32, %c0_i32_0 : i32, i32, i32
  }
  func.func @transform_7(%arg0: i32, %arg1: i32) -> (i32, i32, i32) {
    %c0_i32 = arith.constant 0 : i32
    %c0_i32_0 = arith.constant 0 : i32
    %c0_i32_1 = arith.constant 0 : i32
    return %arg1, %c0_i32, %c0_i32_0 : i32, i32, i32
  }
  func.func @transform_8(%arg0: i32, %arg1: i32) -> (i32, i32, i32) {
    %c0_i32 = arith.constant 0 : i32
    %c0_i32_0 = arith.constant 0 : i32
    %c0_i32_1 = arith.constant 0 : i32
    return %arg1, %c0_i32, %c0_i32_0 : i32, i32, i32
  }
  func.func @transform_9(%arg0: i32, %arg1: i32) -> (i32, i32, i32) {
    %c0_i32 = arith.constant 0 : i32
    %c0_i32_0 = arith.constant 0 : i32
    %c0_i32_1 = arith.constant 0 : i32
    return %arg1, %c0_i32, %c0_i32_0 : i32, i32, i32
  }
  func.func @transform_10(%arg0: i32, %arg1: i32) -> (i32, i32, i32) {
    %c0_i32 = arith.constant 0 : i32
    %c0_i32_0 = arith.constant 0 : i32
    %c0_i32_1 = arith.constant 0 : i32
    return %arg1, %c0_i32, %c0_i32_0 : i32, i32, i32
  }
  func.func @transform_11(%arg0: i32, %arg1: i32) -> (i32, i32, i32) {
    %c0_i32 = arith.constant 0 : i32
    %c0_i32_0 = arith.constant 0 : i32
    %c0_i32_1 = arith.constant 0 : i32
    return %arg1, %c0_i32, %c0_i32_0 : i32, i32, i32
  }
  func.func @transform_12(%arg0: i32, %arg1: i32) -> (i32, i32, i32) {
    %c0_i32 = arith.constant 0 : i32
    %c0_i32_0 = arith.constant 0 : i32
    %c0_i32_1 = arith.constant 0 : i32
    return %arg1, %c0_i32, %c0_i32_0 : i32, i32, i32
  }
  func.func @transform_13(%arg0: i32, %arg1: i32) -> (i32, i32, i32) {
    %c0_i32 = arith.constant 0 : i32
    %c0_i32_0 = arith.constant 0 : i32
    %c0_i32_1 = arith.constant 0 : i32
    return %arg1, %c0_i32, %c0_i32_0 : i32, i32, i32
  }
  func.func @transform_14(%arg0: i32, %arg1: i32) -> (i32, i32, i32) {
    %c0_i32 = arith.constant 0 : i32
    %c0_i32_0 = arith.constant 0 : i32
    %c0_i32_1 = arith.constant 0 : i32
    return %arg1, %c0_i32, %c0_i32_0 : i32, i32, i32
  }
  func.func @transform_15(%arg0: i32, %arg1: i32) -> (i32, i32, i32) {
    %c0_i32 = arith.constant 0 : i32
    %c0_i32_0 = arith.constant 0 : i32
    %c0_i32_1 = arith.constant 0 : i32
    return %arg1, %c0_i32, %c0_i32_0 : i32, i32, i32
  }
  func.func @transform_16(%arg0: i32, %arg1: i32) -> (i32, i32) {
    %c0_i32 = arith.constant 0 : i32
    %c0_i32_0 = arith.constant 0 : i32
    %c0_i32_1 = arith.constant 0 : i32
    return %c0_i32, %c0_i32_0 : i32, i32
  }
  func.func @transform_17(%arg0: i32, %arg1: i32) -> (i32, i32) {
    %c0_i32 = arith.constant 0 : i32
    %c0_i32_0 = arith.constant 0 : i32
    %c0_i32_1 = arith.constant 0 : i32
    return %c0_i32, %c0_i32_0 : i32, i32
  }
  func.func @transform_18(%arg0: i32, %arg1: i32) -> (i32, i32) {
    %c0_i32 = arith.constant 0 : i32
    %c0_i32_0 = arith.constant 0 : i32
    %c0_i32_1 = arith.constant 0 : i32
    return %c0_i32, %c0_i32_0 : i32, i32
  }
  func.func @transform_19(%arg0: i32, %arg1: i32) -> (i32, i32) {
    %c0_i32 = arith.constant 0 : i32
    %c0_i32_0 = arith.constant 0 : i32
    %c0_i32_1 = arith.constant 0 : i32
    return %c0_i32, %c0_i32_0 : i32, i32
  }
  func.func @transform_20(%arg0: i32, %arg1: i32) -> (i32, i32, i32) {
    %c0_i32 = arith.constant 0 : i32
    %c0_i32_0 = arith.constant 0 : i32
    %c0_i32_1 = arith.constant 0 : i32
    return %arg0, %c0_i32, %c0_i32_0 : i32, i32, i32
  }
}

</mosaic_0001>

<bundles_post_ra>
// kernel: tpu_custom_call.1
= control target key start
LH: loop header
LB: loop body
LE: loop exit
PB: predicated region body
PF: predicated region fallthrough
CT: control target
= control target key end

     0   :  { %s8346_s0 = inlined_call_operand.vmem [shape: f32[2,16,48], index: 0, kind: input, shape index: {}]   ;;  %s8347_s1 = inlined_call_operand.vmem [shape: bf16[48,32], index: 1, kind: input, shape index: {}]   ;;  %s8348_s2 = inlined_call_operand.vmem [shape: f32[1,32], index: 2, kind: input, shape index: {}]   ;;  %s8349_s3 = inlined_call_operand.vmem [shape: f32[16,32], index: 3, kind: input, shape index: {}]   ;;  %s8350_s4 = inlined_call_operand.vmem [shape: f32[1,32], index: 4, kind: input, shape index: {}]   ;;  %s8351_s5 = inlined_call_operand.vmem [shape: f32[2,1,32], index: 5, kind: input, shape index: {}]   ;;  %s8352_s6 = inlined_call_operand.vmem [shape: f32[2,1,32], index: 6, kind: input, shape index: {}]   ;;  %s8353_s7 = inlined_call_operand.vmem [shape: bf16[2,32,96], index: 7, kind: input, shape index: {}]   ;;  %s8354_s8 = inlined_call_operand.vmem [shape: bf16[2,32,32], index: 8, kind: input, shape index: {}]   ;;  %s8355_s9 = inlined_call_operand.vmem [shape: f32[2,1,32], index: 9, kind: input, shape index: {}]   ;;  %s8356_s10 = inlined_call_operand.vmem [shape: f32[2,1,32], index: 10, kind: input, shape index: {}]   ;;  %s8357_s11 = inlined_call_operand.vmem [shape: f32[2,1,32], index: 11, kind: input, shape index: {}]   ;;  %s8358_s12 = inlined_call_operand.vmem [shape: bf16[2,32,128], index: 12, kind: input, shape index: {}]   ;;  %s8359_s13 = inlined_call_operand.vmem [shape: f32[2,1,128], index: 13, kind: input, shape index: {}]   ;;  %s8360_s14 = inlined_call_operand.vmem [shape: bf16[2,128,32], index: 14, kind: input, shape index: {}]   ;;  %s8361_s15 = inlined_call_operand.vmem [shape: f32[2,1,32], index: 15, kind: input, shape index: {}]   ;;  %s8362_s16 = inlined_call_operand.vmem [shape: f32[1,32], index: 16, kind: input, shape index: {}]   ;;  %s8363_s17 = inlined_call_operand.vmem [shape: f32[1,32], index: 17, kind: input, shape index: {}]   ;;  %s8364_s18 = inlined_call_operand.vmem [shape: bf16[32,128], index: 18, kind: input, shape index: {}]   ;;  %s8365_s19 = inlined_call_operand.vmem [shape: f32[1,128], index: 19, kind: input, shape index: {}]   ;;  %s8366_s20 = inlined_call_operand.hbm [shape: f32[2,1,128], index: 20, kind: output, shape index: {}]  }
   0x1   :  { %8416 = sst [smem:[#allocation51_spill]] %s8346_s0 }
   0x2   :  { %8417 = sst [smem:[#allocation52_spill]] %s8347_s1 }
   0x3   :  { %8418 = sst [smem:[#allocation53_spill]] %s8348_s2 }
   0x4   :  { %8419 = sst [smem:[#allocation54_spill]] %s8349_s3 }
   0x5   :  { %8420 = sst [smem:[#allocation55_spill]] %s8350_s4 }
   0x6   :  { %8421 = sst [smem:[#allocation56_spill]] %s8353_s7 }
   0x7   :  { %8422 = sst [smem:[#allocation57_spill]] %s8354_s8 }
   0x8   :  { %8423 = sst [smem:[#allocation58_spill]] %s8362_s16 }
   0x9   :  { %8424 = sst [smem:[#allocation59_spill]] %s8363_s17 }
   0xa   :  { %8425 = sst [smem:[#allocation60_spill]] %s8364_s18 }
   0xb   :  { %8426 = sst [smem:[#allocation61_spill]] %s8365_s19 }
   0xc   :  { %8427 = sst [smem:[#allocation62_spill]] %s8366_s20 }
   0xd   :  { %25 = vsyncpa [#allocation4], 0 }
   0xe   :  { %27 = vsyncpa [#allocation4 + $0x1], 0  ;;  %s6172_s1 = smov 0   ;;  %s6174_s22 = smov 0  }
   0xf   :  { %s6176_s23 = smov 0   ;;  %s6178_s24 = smov 0  }
  0x10   :  { %s6180_s2 = smov 0   ;;  %s6182_s25 = smov 0  }
  0x11   :  { %s6184_s3 = smov 0   ;;  %s6186_s26 = smov 0  }
  0x12 LB: > { %8428 = sst [smem:[#allocation6_spill]] %s6024_s1  ;;  %s4663_s27 = sadd.s32 4294967295, %s6052_s26   ;;  %s6052_s26 = sphi %s6186_s26, %s33_s26   ;;  %s6048_s3 = sphi %s6184_s3, %s8540_s3   ;;  %s6044_s25 = sphi %s6182_s25, %s8539_s25   ;;  %s6040_s2 = sphi %s6180_s2, %s8538_s2   ;;  %s6036_s24 = sphi %s6178_s24, %s8537_s24   ;;  %s6032_s23 = sphi %s6176_s23, %s8536_s23   ;;  %s6028_s22 = sphi %s6174_s22, %s8542_s22   ;;  %s6024_s1 = sphi %s6172_s1, %s8541_s1  }
  0x13   : > { %8429 = sst [smem:[#allocation7_spill]] %s6032_s23  ;;  %s4664_s28 = sadd.s32 4294967294, %s6052_s26  }
  0x14   : > { %8430 = sst [smem:[#allocation8_spill]] %s6036_s24  ;;  %s42_s4 = sadd.s32 1, %s6044_s25 }
  0x15   : > { %8431 = sst [smem:[#allocation9_spill]] %s6040_s2  ;;  %p43_p0 = scmp.ge.s32.totalorder %s42_s4, 2 }
  0x16   : > { %8432 = sst [smem:[#allocation10_spill]] %s6044_s25  ;;  %s45_s29 = sadd.s32 1, %s6048_s3 }
  0x17   : > { %8433 = sst [smem:[#allocation11_spill]] %s6048_s3  ;;  %p542_p1 = scmp.ne.s32.totalorder %s6032_s23, %s6028_s22 }
  0x18   : > { %8434 = sst [smem:[#allocation12_spill]] %s6052_s26  ;;  %p543_p2 = scmp.eq.s32.totalorder %s4663_s27, 3 }
  0x19   : > { %s8544_s4 = smov (%p43_p0, %s42_s4), 0  ;;  %s8546_s29 = smov (!%p43_p0, %s45_s29), %s6048_s3 }
  0x1a   : > { %8435 = sst [smem:[#allocation13_spill]] %s8544_s4  ;;  %p6221_p3 = por %p543_p2, %p542_p1 }
  0x1b   : > { %p548_p4 = scmp.ne.s32.totalorder %s6028_s22, %s6024_s1  ;;  %p47_p5 = scmp.ge.s32.totalorder %s8546_s29, 2 }
  0x1c   : > { %s8436_s30 = scalar_select %p6221_p3, 1, 0 }
  0x1d   : > { %p549_p6 = scmp.eq.s32.totalorder %s4664_s28, 3  ;;  %p4667_p7 = scmp.ge.s32.totalorder %s6052_s26, 1 }
  0x1e   : > { %8437 = sst [smem:[#allocation14_spill]] %s8436_s30  ;;  %p673_p8 = scmp.lt.s32.totalorder %s6052_s26, 5 }
  0x1f   : > { %s8548_s29 = smov (%p47_p5, %s8546_s29), 0  ;;  %p6231_p9 = por %p549_p6, %p548_p4 }
  0x20   : > { %8438 = sst [smem:[#allocation15_spill]] %s8548_s29  ;;  %p674_p10 = pnand %p4667_p7, %p673_p8 }
  0x21   : > { %s8439_s0 = scalar_select %p6231_p9, 1, 0 }
  0x22   : > { %s529_s21 = ssub.s32 %s6048_s3, %s8548_s29  ;;  %s532_s27 = sadd.s32 1, %s6032_s23 }
  0x23   : > { %8440 = sst [smem:[#allocation16_spill]] %s8439_s0  ;;  %p530_p11 = scmp.eq.s32.totalorder %s529_s21, 0 }
  0x24   : > { %677 = sbr.rel (%p674_p10) target bundleno = 3667 (0xe53), region = 100 }
  0x25   : > { %s6239_s4 = scalar_select %p530_p11, %s6032_s23, %s532_s27  }
  0x27   : > { %8441 = sst [smem:[#allocation17_spill]] %s6239_s4 }
  0x29   : > { %p771_p12 = scmp.lt.s32.totalorder %s6040_s2, 1  ;;  %p776_p13 = scmp.lt.s32.totalorder %s6036_s24, 1 }
  0x2a   : > { %s8442_s3 = sld [smem:[#allocation51_spill]]  ;;  %s8445_s27 = sand.u32 1, %s6028_s22  }
  0x2b   : > { %s772_s25 = scalar_select %p771_p12, %s6040_s2, 1 }
  0x2c   : > { %s6246_s1 = scalar_select %p776_p13, %s6036_s24, 1 }
  0x2d   : > { %s4768_s21 = sshll.u32 %s772_s25, 4  ;;  %s8443_s7 = sld [smem:[#allocation56_spill]] }
  0x2e   : > { %s4769_s2 = sshll.u32 %s6246_s1, 4  ;;  %s8444_s8 = sld [smem:[#allocation57_spill]] }
  0x2f   : > { %s797_s20 = scalar_lea.vmem %s8356_s10, %s6246_s1  ;;  %s6285_s0 = scalar_lea.vmem %s8358_s12, %s4769_s2 }
  0x30   : > { %s775_s28 = scalar_lea.vmem %s8442_s3, %s4768_s21  ;;  %s6303_s30 = scalar_lea.vmem [#allocation3], %s8445_s27 }
  0x31   : > { %s8446_s17 = sld [smem:[#allocation8_spill]] }
  0x33   : > { %s6263_s16 = scalar_lea.vmem %s8443_s7, %s4769_s2  ;;  %s808_s7 = scalar_lea.vmem %s8359_s13, %s6246_s1 }
  0x34   : > { %s6268_s24 = scalar_lea.vmem %s8444_s8, %s4769_s2  ;;  %s4772_s8 = sshll.u32 %s6246_s1, 6 }
  0x35   : > { %s6295_s23 = scalar_lea.vmem %s8360_s14, %s4772_s8 }
  0x37   : > { %p4678_p0 = scmp.ne.s32.totalorder %s8446_s17, 0 }
  0x38   : > { %s8447_s18 = sld [smem:[#allocation52_spill]] (!%p4678_p0) }
  0x39   : > { %821 = sbr.rel (%p4678_p0) target bundleno = 280 (0x118), region = 104  ;;  %s8448_s21 = sld [smem:[#allocation53_spill]] (!%p4678_p0) }
  0x3a   : > { %s8449_s2 = sld [smem:[#allocation54_spill]] (!%p4678_p0) }
  0x3b   : > { %s8451_s26 = sld [smem:[#allocation55_spill]] (!%p4678_p0) }
  0x3e   : > { %v5451_v0 = vld [vmem:[%s8447_s18 + $0x10] sm:$0xff]   ;;  %v6054_v1 = vmov 0.0   ;;  %v5452_v2 = vld [vmem:[%s8447_s18 + $0x8] sm:$0xff]   ;;  %vm6055_vm0 = vmmov 0   ;;  %v5453_v3 = vld [vmem:[%s8447_s18] sm:$0xff]   ;;  %vm856_vm1 = vcmask 392192  }
  0x3f   : > { %4954 = vmatprep.subr.bf16.mxu0 %v6054_v1  ;;  %4960 = vmatprep.mubr.msk.bf16.mxu0 %vm6055_vm0, %v6054_v1  ;;  %v822_v4 = vld [vmem:[%s775_s28] sm:$0xff]  ;;  %v823_v5 = vld [vmem:[%s775_s28 + $0x8] sm:$0xff]  ;;  %vm917_vm2 = vcmask 261120   ;;  %vm908_vm3 = vcmask 1040384  }
  0x40   : > { %4955 = vmatpush3.bf16.msra.mxu0 %v5451_v0  ;;  %v824_v6 = vpack.c.bf16 %v823_v5, %v822_v4  ;;  %921 = vst.msk [vmem:[#allocation2 + $0x18] sm:$0xff] %vm917_vm2, %v6054_v1  ;;  %922 = vst.msk [vmem:[#allocation2 + $0x20] sm:$0xff] %vm917_vm2, %v6054_v1  ;;  %v4679_v7 = vld [vmem:[%s8448_s21] ss:$0 sm:$0xff]  ;;  %s8450_s19 = smov %s8449_s2 }
  0x41   : > { %4956 = vmatprep.subr.bf16.mxu0 %v6054_v1  ;;  %923 = vst.msk [vmem:[#allocation2 + $0x28] sm:$0xff] %vm917_vm2, %v6054_v1  ;;  %924 = vst.msk [vmem:[#allocation2 + $0x30] sm:$0xff] %vm917_vm2, %v6054_v1  ;;  %v901_v9 = vld [vmem:[%s8449_s2] sm:$0xff]  ;;  %v902_v14 = vld [vmem:[%s8450_s19 + $0x8] sm:$0xff] }
  0x42   : > { %925 = vst.msk [vmem:[#allocation2 + $0x38] sm:$0xff] %vm917_vm2, %v6054_v1  ;;  %926 = vst.msk [vmem:[#allocation2 + $0x40] sm:$0xff] %vm917_vm2, %v6054_v1  ;;  %v905_v15 = vld [vmem:[%s8451_s26] sm:$0x1] }
  0x43   : > { %927 = vst.msk [vmem:[#allocation2 + $0x48] sm:$0xff] %vm917_vm2, %v6054_v1  ;;  %928 = vst.msk [vmem:[#allocation2 + $0x50] sm:$0xff] %vm917_vm2, %v6054_v1 }
  0x44   : > { %4957 = vmatpush3.bf16.msra.mxu0 %v5452_v2  ;;  %929 = vst.msk [vmem:[#allocation2 + $0x58] sm:$0xff] %vm917_vm2, %v6054_v1  ;;  %930 = vst.msk [vmem:[#allocation2 + $0x60] sm:$0xff] %vm917_vm2, %v6054_v1 }
  0x45   : > { %4958 = vmatprep.subr.bf16.mxu0 %v6054_v1  ;;  %931 = vst.msk [vmem:[#allocation2 + $0x68] sm:$0xff] %vm917_vm2, %v6054_v1  ;;  %932 = vst.msk [vmem:[#allocation2 + $0x70] sm:$0xff] %vm917_vm2, %v6054_v1 }
  0x46   : > { %933 = vst.msk [vmem:[#allocation2 + $0x78] sm:$0xff] %vm917_vm2, %v6054_v1 }
  0x48   : > { %4959 = vmatpush3.bf16.msra.mxu0 %v5453_v3 }
  0x4b   : > { %4961 = vmatmul.mubr.msk.bf16.vlgmr.msra.gmra.mxu0 %vm856_vm1, %v824_v6 }
 0x10b   : > { %v894_v8 = vpop.f32.mrf.mxu0 }
 0x10c   : > { %v895_v10 = vadd.f32 %v4679_v7, %v894_v8 }
 0x10d   : > { %v4962_v11 = vpop.f32.mrf.mxu0 }
 0x10e   : > { %v903_v12 = vadd.f32 %v901_v9, %v895_v10 }
 0x10f   : > { %v897_v13 = vpop.f32.mrf.mxu0 }
 0x110   : > { %v909_v16 = vrot.slane %v903_v12, 7  ;;  %v898_v17 = vadd.f32 %v4679_v7, %v897_v13 }
 0x111   : > { %v4963_v18 = vpop.f32.mrf.mxu0 }
 0x112   : > { %v904_v19 = vadd.f32 %v902_v14, %v898_v17  ;;  %v915_v20 = vsel %vm908_vm3, %v905_v15, %v909_v16 }
 0x113   : > { %918 = vst.msk [vmem:[#allocation2] sm:$0xff] %vm917_vm2, %v915_v20 }
 0x114   : > { %v910_v21 = vrot.slane %v904_v19, 7 }
 0x116   : > { %v911_v22 = vsel %vm908_vm3, %v909_v16, %v910_v21  ;;  %v916_v23 = vsel %vm908_vm3, %v910_v21, 0.0 }
 0x117   : > { %919 = vst.msk [vmem:[#allocation2 + $0x8] sm:$0xff] %vm917_vm2, %v911_v22  ;;  %920 = vst.msk [vmem:[#allocation2 + $0x10] sm:$0xff] %vm917_vm2, %v916_v23 }
 0x118 PF: > { %vm952_vm4 = vcmask 261120   ;;  %v937_v29 = vld [vmem:[#allocation2 + $0x18] sm:$0xff]  ;;  %v6345_v30 = vld [vmem:[#allocation2 + $0x20] sm:$0xff]  ;;  %v6347_v31 = vld [vmem:[#allocation2 + $0x28] sm:$0xff]  ;;  %s8452_s28 = scalar_lea.vmem %s8351_s5, %s6246_s1  ;;  %s8453_s27 = scalar_lea.vmem %s8352_s6, %s6246_s1  ;;  %vm1431_vm5 = vcmask 64512   ;;  %vm3429_vm7 = vcmask 130048  }
 0x119   : > { %v962_v33 = vsel %vm952_vm4, %v937_v29, 0.0  ;;  %v6351_v34 = vld [vmem:[#allocation2 + $0x30] sm:$0xff]  ;;  %v6353_v35 = vld [vmem:[#allocation2 + $0x38] sm:$0xff]  ;;  %v965_v36 = vsel %vm952_vm4, %v6345_v30, 0.0  ;;  %v968_v37 = vsel %vm952_vm4, %v6347_v31, 0.0  ;;  %v6363_v40 = vld [vmem:[#allocation2 + $0x40] sm:$0xff]  ;;  %s8520_s4 = scalar_lea.vmem %s8355_s9, %s6246_s1 }
 0x11a   : > { %v934_v24 = vld [vmem:[#allocation2] sm:$0xff]  ;;  %v971_v38 = vsel %vm952_vm4, %v6351_v34, 0.0  ;;  %v974_v39 = vsel %vm952_vm4, %v6353_v35, 0.0  ;;  %v6365_v41 = vld [vmem:[#allocation2 + $0x48] sm:$0xff]  ;;  %v977_v42 = vsel %vm952_vm4, %v6363_v40, 0.0  ;;  %v6371_v44 = vld [vmem:[#allocation2 + $0x50] sm:$0xff] }
 0x11b   : > { %v953_v27 = vsel %vm952_vm4, %v934_v24, 0.0  ;;  %v980_v43 = vsel %vm952_vm4, %v6365_v41, 0.0  ;;  %v6373_v45 = vld [vmem:[#allocation2 + $0x58] sm:$0xff]  ;;  %v983_v46 = vsel %vm952_vm4, %v6371_v44, 0.0  ;;  %v6379_v48 = vld [vmem:[#allocation2 + $0x60] sm:$0xff]  ;;  %v6381_v49 = vld [vmem:[#allocation2 + $0x68] sm:$0xff] }
 0x11c   : > { %954 = vadd.xlane.f32.xlu0 %v953_v27  ;;  %v986_v47 = vsel %vm952_vm4, %v6373_v45, 0.0  ;;  %v989_v50 = vsel %vm952_vm4, %v6379_v48, 0.0  ;;  %v992_v51 = vsel %vm952_vm4, %v6381_v49, 0.0  ;;  %v6387_v52 = vld [vmem:[#allocation2 + $0x70] sm:$0xff]  ;;  %v6389_v53 = vld [vmem:[#allocation2 + $0x78] sm:$0xff]  ;;  %s6056_s17 = smov 120  }
 0x11d   : > { %v995_v54 = vsel %vm952_vm4, %v6387_v52, 0.0  ;;  %v998_v55 = vsel %vm952_vm4, %v6389_v53, 0.0  ;;  %s6057_s2 = smov 96   ;;  %s6058_s25 = smov 112   ;;  %vm3446_vm8 = vcmask 195584  }
 0x11e   : > { %v936_v25 = vld [vmem:[#allocation2 + $0x10] sm:$0xff]  ;;  %v935_v26 = vld [vmem:[#allocation2 + $0x8] sm:$0xff]  ;;  %s6059_s8 = smov 104   ;;  %s6060_s3 = smov 64  }
 0x11f   : > { %v959_v28 = vsel %vm952_vm4, %v936_v25, 0.0  ;;  %v956_v32 = vsel %vm952_vm4, %v935_v26, 0.0  ;;  %s6061_s29 = smov 8  }
 0x120   : > { %960 = vadd.xlane.f32.xlu1 %v959_v28  ;;  %957 = vadd.xlane.f32.xlu0 %v956_v32 }
 0x124   : > { %963 = vadd.xlane.f32.xlu1 %v962_v33  ;;  %966 = vadd.xlane.f32.xlu0 %v965_v36 }
 0x128   : > { %969 = vadd.xlane.f32.xlu1 %v968_v37  ;;  %972 = vadd.xlane.f32.xlu0 %v971_v38 }
 0x12c   : > { %975 = vadd.xlane.f32.xlu1 %v974_v39  ;;  %978 = vadd.xlane.f32.xlu0 %v977_v42 }
 0x130   : > { %981 = vadd.xlane.f32.xlu1 %v980_v43  ;;  %984 = vadd.xlane.f32.xlu0 %v983_v46 }
 0x134   : > { %987 = vadd.xlane.f32.xlu1 %v986_v47  ;;  %990 = vadd.xlane.f32.xlu0 %v989_v50 }
 0x138   : > { %993 = vadd.xlane.f32.xlu1 %v992_v51  ;;  %996 = vadd.xlane.f32.xlu0 %v995_v54 }
 0x13c   : > { %999 = vadd.xlane.f32.xlu1 %v998_v55 }
 0x1a5   : > { %v955_v56 = vpop.xlane.xlu0 %954 }
 0x1a6   : > { %v1002_v58 = vmul.f32 0.03125, %v955_v56 }
 0x1a8   : > { %v6395_v60 = vsub.f32 %v934_v24, %v1002_v58 }
 0x1a9   : > { %v961_v57 = vpop.xlane.xlu1 %960  ;;  %v958_v62 = vpop.xlane.xlu0 %957 }
 0x1aa   : > { %v1004_v59 = vmul.f32 0.03125, %v961_v57  ;;  %v1003_v0 = vmul.f32 0.03125, %v958_v62  ;;  %v1034_v2 = vmul.f32 %v6395_v60, %v6395_v60 }
 0x1ac   : > { %v6397_v61 = vsub.f32 %v936_v25, %v1004_v59  ;;  %v6403_v4 = vsub.f32 %v935_v26, %v1003_v0  ;;  %v1050_v6 = vsel %vm952_vm4, %v1034_v2, 0.0 }
 0x1ad   : > { %v964_v63 = vpop.xlane.xlu1 %963  ;;  %1051 = vadd.xlane.f32.xlu0 %v1050_v6  ;;  %v967_v7 = vpop.xlane.xlu0 %966 }
 0x1ae   : > { %v1005_v1 = vmul.f32 0.03125, %v964_v63  ;;  %v1036_v3 = vmul.f32 %v6397_v61, %v6397_v61  ;;  %v1006_v10 = vmul.f32 0.03125, %v967_v7  ;;  %v1035_v12 = vmul.f32 %v6403_v4, %v6403_v4 }
 0x1b0   : > { %v6405_v5 = vsub.f32 %v937_v29, %v1005_v1  ;;  %v1056_v9 = vsel %vm952_vm4, %v1036_v3, 0.0  ;;  %v6414_v14 = vsub.f32 %v6345_v30, %v1006_v10  ;;  %v1053_v16 = vsel %vm952_vm4, %v1035_v12, 0.0 }
 0x1b1   : > { %v970_v8 = vpop.xlane.xlu1 %969  ;;  %1057 = vadd.xlane.f32.xlu0 %v1056_v9  ;;  %1054 = vadd.xlane.f32.xlu1 %v1053_v16  ;;  %v973_v17 = vpop.xlane.xlu0 %972 }
 0x1b2   : > { %v1007_v11 = vmul.f32 0.03125, %v970_v8  ;;  %v1037_v13 = vmul.f32 %v6405_v5, %v6405_v5  ;;  %v1008_v20 = vmul.f32 0.03125, %v973_v17  ;;  %v1038_v22 = vmul.f32 %v6414_v14, %v6414_v14 }
 0x1b4   : > { %v6417_v15 = vsub.f32 %v6347_v31, %v1007_v11  ;;  %v1059_v19 = vsel %vm952_vm4, %v1037_v13, 0.0  ;;  %v6426_v24 = vsub.f32 %v6351_v34, %v1008_v20  ;;  %v1062_v26 = vsel %vm952_vm4, %v1038_v22, 0.0  ;;  %v5575_v13 = vld [vmem:[%s6263_s16] sm:$0xff]  }
 0x1b5   : > { %v976_v18 = vpop.xlane.xlu1 %975  ;;  %1060 = vadd.xlane.f32.xlu1 %v1059_v19  ;;  %1063 = vadd.xlane.f32.xlu0 %v1062_v26  ;;  %v979_v27 = vpop.xlane.xlu0 %978 }
 0x1b6   : > { %v1009_v21 = vmul.f32 0.03125, %v976_v18  ;;  %v1039_v23 = vmul.f32 %v6417_v15, %v6417_v15  ;;  %v1010_v30 = vmul.f32 0.03125, %v979_v27  ;;  %v1040_v32 = vmul.f32 %v6426_v24, %v6426_v24 }
 0x1b8   : > { %v6429_v25 = vsub.f32 %v6353_v35, %v1009_v21  ;;  %v1065_v29 = vsel %vm952_vm4, %v1039_v23, 0.0  ;;  %v6438_v34 = vsub.f32 %v6363_v40, %v1010_v30  ;;  %v1068_v36 = vsel %vm952_vm4, %v1040_v32, 0.0 }
 0x1b9   : > { %v982_v28 = vpop.xlane.xlu1 %981  ;;  %1066 = vadd.xlane.f32.xlu1 %v1065_v29  ;;  %1069 = vadd.xlane.f32.xlu0 %v1068_v36  ;;  %v985_v37 = vpop.xlane.xlu0 %984 }
 0x1ba   : > { %v1011_v31 = vmul.f32 0.03125, %v982_v28  ;;  %v1041_v33 = vmul.f32 %v6429_v25, %v6429_v25  ;;  %v1012_v42 = vmul.f32 0.03125, %v985_v37  ;;  %v1042_v46 = vmul.f32 %v6438_v34, %v6438_v34 }
 0x1bc   : > { %v6441_v35 = vsub.f32 %v6365_v41, %v1011_v31  ;;  %v1071_v39 = vsel %vm952_vm4, %v1041_v33, 0.0  ;;  %v6450_v47 = vsub.f32 %v6371_v44, %v1012_v42  ;;  %v1074_v50 = vsel %vm952_vm4, %v1042_v46, 0.0 }
 0x1bd   : > { %v988_v38 = vpop.xlane.xlu1 %987  ;;  %1072 = vadd.xlane.f32.xlu1 %v1071_v39  ;;  %1075 = vadd.xlane.f32.xlu0 %v1074_v50  ;;  %v991_v51 = vpop.xlane.xlu0 %990 }
 0x1be   : > { %v1013_v43 = vmul.f32 0.03125, %v988_v38  ;;  %v1043_v40 = vmul.f32 %v6441_v35, %v6441_v35  ;;  %v1014_v56 = vmul.f32 0.03125, %v991_v51  ;;  %v1044_v58 = vmul.f32 %v6450_v47, %v6450_v47 }
 0x1c0   : > { %v6453_v41 = vsub.f32 %v6373_v45, %v1013_v43  ;;  %v1077_v55 = vsel %vm952_vm4, %v1043_v40, 0.0  ;;  %v6462_v59 = vsub.f32 %v6379_v48, %v1014_v56  ;;  %v1080_v62 = vsel %vm952_vm4, %v1044_v58, 0.0  ;;  %v6494_v56 = vld [vmem:[%s8452_s28] ss:$0 sm:$0xff] }
 0x1c1   : > { %v994_v54 = vpop.xlane.xlu1 %993  ;;  %1078 = vadd.xlane.f32.xlu1 %v1077_v55  ;;  %1081 = vadd.xlane.f32.xlu0 %v1080_v62  ;;  %v997_v63 = vpop.xlane.xlu0 %996 }
 0x1c2   : > { %v1015_v57 = vmul.f32 0.03125, %v994_v54  ;;  %v1045_v44 = vmul.f32 %v6453_v41, %v6453_v41  ;;  %v1016_v2 = vmul.f32 0.03125, %v997_v63  ;;  %v1046_v6 = vmul.f32 %v6462_v59, %v6462_v59 }
 0x1c4   : > { %v6465_v45 = vsub.f32 %v6381_v49, %v1015_v57  ;;  %v1083_v1 = vsel %vm952_vm4, %v1045_v44, 0.0  ;;  %v6474_v49 = vsub.f32 %v6387_v52, %v1016_v2  ;;  %v1086_v8 = vsel %vm952_vm4, %v1046_v6, 0.0 }
 0x1c5   : > { %v1000_v0 = vpop.xlane.xlu1 %999  ;;  %1084 = vadd.xlane.f32.xlu1 %v1083_v1  ;;  %1087 = vadd.xlane.f32.xlu0 %v1086_v8 }
 0x1c6   : > { %v1017_v3 = vmul.f32 0.03125, %v1000_v0  ;;  %v1047_v48 = vmul.f32 %v6465_v45, %v6465_v45  ;;  %v1048_v10 = vmul.f32 %v6474_v49, %v6474_v49 }
 0x1c8   : > { %v6477_v7 = vsub.f32 %v6389_v53, %v1017_v3  ;;  %v1089_v9 = vsel %vm952_vm4, %v1047_v48, 0.0  ;;  %v1092_v12 = vsel %vm952_vm4, %v1048_v10, 0.0  ;;  %v5574_v53 = vld [vmem:[%s6263_s16 + $0x8] sm:$0xff]   ;;  %v6503_v48 = vld [vmem:[%s8453_s27] ss:$0 sm:$0xff]  ;;  %s6062_s16 = smov 16  }
 0x1c9   : > { %1090 = vadd.xlane.f32.xlu1 %v1089_v9  ;;  %1093 = vadd.xlane.f32.xlu0 %v1092_v12 }
 0x1ca   : > { %v1049_v11 = vmul.f32 %v6477_v7, %v6477_v7  ;;  %4964 = vmatprep.subr.bf16.mxu0 %v5574_v53 }
 0x1cb   : > { %4965 = vmatpush3.bf16.msra.mxu0 %v5574_v53 }
 0x1cc   : > { %v1095_v52 = vsel %vm952_vm4, %v1049_v11, 0.0  ;;  %4966 = vmatprep.subr.bf16.mxu0 %v5575_v13 }
 0x1cd   : > { %1096 = vadd.xlane.f32.xlu1 %v1095_v52 }
 0x1cf   : > { %4967 = vmatpush3.bf16.msra.mxu0 %v5575_v13 }
 0x236   : > { %v1052_v16 = vpop.xlane.xlu0 %1051 }
 0x237   : > { %v1098_v17 = vmul.f32 0.03125, %v1052_v16 }
 0x239   : > { %v1114_v18 = vadd.f32 1e-05, %v1098_v17 }
 0x23a   : > { %v1055_v19 = vpop.xlane.xlu1 %1054  ;;  %v1058_v20 = vpop.xlane.xlu0 %1057 }
 0x23b   : > { %5588 = vrsqrt.f32 %v1114_v18  ;;  %v1099_v21 = vmul.f32 0.03125, %v1055_v19  ;;  %v1100_v22 = vmul.f32 0.03125, %v1058_v20 }
 0x23d   : > { %v1115_v23 = vadd.f32 1e-05, %v1099_v21  ;;  %v1116_v26 = vadd.f32 1e-05, %v1100_v22 }
 0x23e   : > { %v1061_v27 = vpop.xlane.xlu1 %1060  ;;  %v1064_v28 = vpop.xlane.xlu0 %1063 }
 0x23f   : > { %5590 = vrsqrt.f32 %v1115_v23  ;;  %v1101_v29 = vmul.f32 0.03125, %v1061_v27  ;;  %v1102_v30 = vmul.f32 0.03125, %v1064_v28 }
 0x240   : > { %5592 = vrsqrt.f32 %v1116_v26 }
 0x241   : > { %v1117_v31 = vadd.f32 1e-05, %v1101_v29  ;;  %v1118_v32 = vadd.f32 1e-05, %v1102_v30 }
 0x242   : > { %v1067_v33 = vpop.xlane.xlu1 %1066  ;;  %v1070_v36 = vpop.xlane.xlu0 %1069 }
 0x243   : > { %5594 = vrsqrt.f32 %v1117_v31  ;;  %v1103_v37 = vmul.f32 0.03125, %v1067_v33  ;;  %v1104_v38 = vmul.f32 0.03125, %v1070_v36 }
 0x244   : > { %5596 = vrsqrt.f32 %v1118_v32 }
 0x245   : > { %v1119_v39 = vadd.f32 1e-05, %v1103_v37  ;;  %v1120_v42 = vadd.f32 1e-05, %v1104_v38 }
 0x246   : > { %v1073_v43 = vpop.xlane.xlu1 %1072  ;;  %v1076_v46 = vpop.xlane.xlu0 %1075 }
 0x247   : > { %5598 = vrsqrt.f32 %v1119_v39  ;;  %v1105_v40 = vmul.f32 0.03125, %v1073_v43  ;;  %v1106_v50 = vmul.f32 0.03125, %v1076_v46 }
 0x248   : > { %v5589_v51 = vpop.eup %5588  ;;  %5600 = vrsqrt.f32 %v1120_v42 }
 0x249   : > { %v1121_v54 = vadd.f32 1e-05, %v1105_v40  ;;  %v1122_v55 = vadd.f32 1e-05, %v1106_v50  ;;  %v1146_v57 = vmul.f32 %v5589_v51, %v6395_v60 }
 0x24a   : > { %v1079_v58 = vpop.xlane.xlu1 %1078  ;;  %v1082_v44 = vpop.xlane.xlu0 %1081 }
 0x24b   : > { %5602 = vrsqrt.f32 %v1121_v54  ;;  %v1107_v62 = vmul.f32 0.03125, %v1079_v58  ;;  %v1108_v63 = vmul.f32 0.03125, %v1082_v44  ;;  %v1168_v1 = vmul.f32 %v6494_v56, %v1146_v57 }
 0x24c   : > { %v5591_v0 = vpop.eup %5590  ;;  %5604 = vrsqrt.f32 %v1122_v55 }
 0x24d   : > { %v5593_v2 = vpop.eup %5592  ;;  %v1123_v3 = vadd.f32 1e-05, %v1107_v62  ;;  %v1124_v6 = vadd.f32 1e-05, %v1108_v63  ;;  %v1147_v60 = vmul.f32 %v5591_v0, %v6403_v4  ;;  %v1190_v13 = vadd.f32 %v6503_v48, %v1168_v1 }
 0x24e   : > { %v1085_v8 = vpop.xlane.xlu1 %1084  ;;  %v1088_v9 = vpop.xlane.xlu0 %1087  ;;  %v1148_v10 = vmul.f32 %v5593_v2, %v6397_v61 }
 0x24f   : > { %5606 = vrsqrt.f32 %v1123_v3  ;;  %v1109_v11 = vmul.f32 0.03125, %v1085_v8  ;;  %v1110_v12 = vmul.f32 0.03125, %v1088_v9  ;;  %v1169_v52 = vmul.f32 %v6494_v56, %v1147_v60 }
 0x250   : > { %v5595_v53 = vpop.eup %5594  ;;  %5608 = vrsqrt.f32 %v1124_v6  ;;  %v1170_v61 = vmul.f32 %v6494_v56, %v1148_v10 }
 0x251   : > { %v5597_v16 = vpop.eup %5596  ;;  %v1125_v17 = vadd.f32 1e-05, %v1109_v11  ;;  %v1126_v18 = vadd.f32 1e-05, %v1110_v12  ;;  %v1191_v19 = vadd.f32 %v6503_v48, %v1169_v52  ;;  %v1149_v4 = vmul.f32 %v5595_v53, %v6405_v5 }
 0x252   : > { %v1091_v20 = vpop.xlane.xlu1 %1090  ;;  %v1094_v21 = vpop.xlane.xlu0 %1093  ;;  %v1150_v22 = vmul.f32 %v5597_v16, %v6414_v14  ;;  %v1192_v14 = vadd.f32 %v6503_v48, %v1170_v61 }
 0x253   : > { %5610 = vrsqrt.f32 %v1125_v17  ;;  %v1111_v23 = vmul.f32 0.03125, %v1091_v20  ;;  %v1112_v26 = vmul.f32 0.03125, %v1094_v21  ;;  %v1206_v27 = vpack.c.bf16 %v1191_v19, %v1190_v13 }
 0x254   : > { %v5599_v28 = vpop.eup %5598  ;;  %5612 = vrsqrt.f32 %v1126_v18  ;;  %v1171_v29 = vmul.f32 %v6494_v56, %v1149_v4  ;;  %v1172_v30 = vmul.f32 %v6494_v56, %v1150_v22 }
 0x255   : > { %v5601_v31 = vpop.eup %5600  ;;  %v1127_v32 = vadd.f32 1e-05, %v1111_v23  ;;  %v1128_v33 = vadd.f32 1e-05, %v1112_v26  ;;  %4968 = vmatprep.mubr.msk.bf16.mxu0 %vm952_vm4, %v1206_v27  ;;  %v1151_v5 = vmul.f32 %v5599_v28, %v6417_v15 }
 0x256   : > { %v1097_v36 = vpop.xlane.xlu1 %1096  ;;  %v1193_v37 = vadd.f32 %v6503_v48, %v1171_v29  ;;  %v1152_v38 = vmul.f32 %v5601_v31, %v6426_v24  ;;  %v1194_v40 = vadd.f32 %v6503_v48, %v1172_v30 }
 0x257   : > { %5614 = vrsqrt.f32 %v1127_v32  ;;  %v1113_v39 = vmul.f32 0.03125, %v1097_v36  ;;  %v1173_v42 = vmul.f32 %v6494_v56, %v1151_v5 }
 0x258   : > { %v5603_v43 = vpop.eup %5602  ;;  %5616 = vrsqrt.f32 %v1128_v33  ;;  %v1207_v46 = vpack.c.bf16 %v1193_v37, %v1192_v14  ;;  %v1174_v55 = vmul.f32 %v6494_v56, %v1152_v38 }
 0x259   : > { %v5605_v50 = vpop.eup %5604  ;;  %v1129_v51 = vadd.f32 1e-05, %v1113_v39  ;;  %v1195_v15 = vadd.f32 %v6503_v48, %v1173_v42  ;;  %v1153_v54 = vmul.f32 %v5603_v43, %v6429_v25 }
 0x25a   : > { %4969 = vmatmul.mubr.msk.bf16.vlgmr.msra.gmra.mxu0 %vm952_vm4, %v1207_v46  ;;  %v1154_v24 = vmul.f32 %v5605_v50, %v6438_v34  ;;  %v1196_v63 = vadd.f32 %v6503_v48, %v1174_v55 }
 0x25b   : > { %5618 = vrsqrt.f32 %v1129_v51  ;;  %v1208_v57 = vpack.c.bf16 %v1195_v15, %v1194_v40  ;;  %v1175_v58 = vmul.f32 %v6494_v56, %v1153_v54 }
 0x25c   : > { %v5607_v44 = vpop.eup %5606  ;;  %v1176_v1 = vmul.f32 %v6494_v56, %v1154_v24 }
 0x25d   : > { %v5609_v62 = vpop.eup %5608  ;;  %4972 = vmatprep.mubr.msk.bf16.mxu0 %vm952_vm4, %v1208_v57  ;;  %v1197_v0 = vadd.f32 %v6503_v48, %v1175_v58  ;;  %v1155_v25 = vmul.f32 %v5607_v44, %v6441_v35 }
 0x25e   : > { %v1156_v2 = vmul.f32 %v5609_v62, %v6450_v47  ;;  %v1198_v8 = vadd.f32 %v6503_v48, %v1176_v1 }
 0x25f   : > { %v1209_v3 = vpack.c.bf16 %v1197_v0, %v1196_v63  ;;  %v1177_v34 = vmul.f32 %v6494_v56, %v1155_v25 }
 0x260   : > { %v5611_v6 = vpop.eup %5610  ;;  %v1178_v11 = vmul.f32 %v6494_v56, %v1156_v2 }
 0x261   : > { %v5613_v60 = vpop.eup %5612  ;;  %v1199_v9 = vadd.f32 %v6503_v48, %v1177_v34  ;;  %v1157_v10 = vmul.f32 %v5611_v6, %v6453_v41 }
 0x262   : > { %4973 = vmatmul.mubr.msk.bf16.gmra.mxu0 %vm952_vm4, %v1209_v3  ;;  %v1158_v35 = vmul.f32 %v5613_v60, %v6462_v59  ;;  %v1200_v13 = vadd.f32 %v6503_v48, %v1178_v11 }
 0x263   : > { %v1210_v12 = vpack.c.bf16 %v1199_v9, %v1198_v8  ;;  %v1179_v47 = vmul.f32 %v6494_v56, %v1157_v10 }
 0x264   : > { %v5615_v52 = vpop.eup %5614  ;;  %v1180_v41 = vmul.f32 %v6494_v56, %v1158_v35 }
 0x265   : > { %v5617_v53 = vpop.eup %5616  ;;  %4976 = vmatprep.mubr.msk.bf16.mxu0 %vm952_vm4, %v1210_v12  ;;  %v1201_v16 = vadd.f32 %v6503_v48, %v1179_v47  ;;  %v1159_v17 = vmul.f32 %v5615_v52, %v6465_v45 }
 0x266   : > { %v1160_v18 = vmul.f32 %v5617_v53, %v6474_v49  ;;  %v1202_v20 = vadd.f32 %v6503_v48, %v1180_v41 }
 0x267   : > { %v1211_v19 = vpack.c.bf16 %v1201_v16, %v1200_v13  ;;  %v1181_v59 = vmul.f32 %v6494_v56, %v1159_v17 }
 0x268   : > { %v5619_v4 = vpop.eup %5618  ;;  %v1182_v22 = vmul.f32 %v6494_v56, %v1160_v18 }
 0x269   : > { %v1203_v21 = vadd.f32 %v6503_v48, %v1181_v59  ;;  %v1161_v61 = vmul.f32 %v5619_v4, %v6477_v7 }
 0x26a   : > { %4977 = vmatmul.mubr.msk.bf16.gmra.mxu0 %vm952_vm4, %v1211_v19  ;;  %v1204_v49 = vadd.f32 %v6503_v48, %v1182_v22 }
 0x26b   : > { %v1212_v23 = vpack.c.bf16 %v1203_v21, %v1202_v20  ;;  %v1183_v45 = vmul.f32 %v6494_v56, %v1161_v61 }
 0x26d   : > { %4980 = vmatprep.mubr.msk.bf16.mxu0 %vm952_vm4, %v1212_v23  ;;  %v1205_v26 = vadd.f32 %v6503_v48, %v1183_v45 }
 0x26f   : > { %v1213_v27 = vpack.c.bf16 %v1205_v26, %v1204_v49 }
 0x272   : > { %4981 = vmatmul.mubr.msk.bf16.gmra.mxu0 %vm952_vm4, %v1213_v27 }
 0x31a   : > { %v4970_v28 = vpop.f32.mrf.mxu0 }
 0x31c   : > { %v1288_v29 = vpop.f32.mrf.mxu0 }
 0x31e   : > { %v4971_v30 = vpop.f32.mrf.mxu0 }
 0x31f   : > { %v6574_v15 = vpack.c.bf16 %v4971_v30, %v4970_v28 }
 0x320   : > { %v1291_v7 = vpop.f32.mrf.mxu0 }
 0x321   : > { %v6559_v31 = vpack.c.bf16 %v1291_v7, %v1288_v29 }
 0x322   : > { %v4974_v32 = vpop.f32.mrf.mxu0 }
 0x323   : > { %5000 = vmatprep.mubr.msk.bf16.mxu1 %vm1431_vm5, %v6559_v31 }
 0x324   : > { %v1304_v56 = vpop.f32.mrf.mxu0 }
 0x326   : > { %v4975_v33 = vpop.f32.mrf.mxu0 }
 0x327   : > { %v6568_v50 = vpack.c.bf16 %v4975_v33, %v4974_v32 }
 0x328   : > { %v1307_v5 = vpop.f32.mrf.mxu0 }
 0x329   : > { %v6581_v55 = vpack.c.bf16 %v1307_v5, %v1304_v56 }
 0x32a   : > { %v4978_v36 = vpop.f32.mrf.mxu0 }
 0x32c   : > { %v1320_v14 = vpop.f32.mrf.mxu0 }
 0x32e   : > { %v4979_v48 = vpop.f32.mrf.mxu0 }
 0x32f   : > { %v6571_v51 = vpack.c.bf16 %v4979_v48, %v4978_v36 }
 0x330   : > { %v1323_v37 = vpop.f32.mrf.mxu0 }
 0x331   : > { %v6577_v54 = vpack.c.bf16 %v1323_v37, %v1320_v14 }
 0x332   : > { %v4982_v38 = vpop.f32.mrf.mxu0 }
 0x334   : > { %v1336_v39 = vpop.f32.mrf.mxu0 }
 0x336   : > { %v4983_v42 = vpop.f32.mrf.mxu0 }
 0x337   : > { %v6563_v43 = vpack.c.bf16 %v4983_v42, %v4982_v38 }
 0x338   : > { %v1339_v46 = vpop.f32.mrf.mxu0 }
 0x339   : > { %v6565_v40 = vpack.c.bf16 %v1339_v46, %v1336_v39  ;;  %1381 = vrot.lane.b32.xlu0 %v6563_v43, %s6056_s17 }
 0x33b   : > { %1379 = vrot.lane.b32.xlu1 %v6565_v40, %s6056_s17 }
 0x33d   : > { %1373 = vrot.lane.b32.xlu0 %v6568_v50, %s6056_s17 }
 0x33f   : > { %1377 = vrot.lane.b32.xlu1 %v6571_v51, %s6056_s17 }
 0x341   : > { %1369 = vrot.lane.b32.xlu0 %v6574_v15, %s6056_s17 }
 0x343   : > { %1375 = vrot.lane.b32.xlu1 %v6577_v54, %s6056_s17 }
 0x345   : > { %1429 = vrot.lane.b32.xlu0 %v6563_v43, %s6057_s2 }
 0x347   : > { %1371 = vrot.lane.b32.xlu1 %v6581_v55, %s6056_s17 }
 0x349   : > { %1397 = vrot.lane.b32.xlu0 %v6563_v43, %s6058_s25 }
 0x34b   : > { %1367 = vrot.lane.b32.xlu1 %v6559_v31, %s6056_s17  ;;  %s8521_s17 = scalar_lea.vmem %s8357_s11, %s6246_s1 }
 0x34d   : > { %1427 = vrot.lane.b32.xlu0 %v6565_v40, %s6057_s2 }
 0x351   : > { %1395 = vrot.lane.b32.xlu0 %v6565_v40, %s6058_s25 }
 0x355   : > { %1425 = vrot.lane.b32.xlu0 %v6571_v51, %s6057_s2 }
 0x359   : > { %1393 = vrot.lane.b32.xlu0 %v6571_v51, %s6058_s25 }
 0x35d   : > { %1423 = vrot.lane.b32.xlu0 %v6577_v54, %s6057_s2 }
 0x361   : > { %1391 = vrot.lane.b32.xlu0 %v6577_v54, %s6058_s25 }
 0x365   : > { %1421 = vrot.lane.b32.xlu0 %v6568_v50, %s6057_s2 }
 0x369   : > { %1389 = vrot.lane.b32.xlu0 %v6568_v50, %s6058_s25 }
 0x36d   : > { %1419 = vrot.lane.b32.xlu0 %v6581_v55, %s6057_s2 }
 0x371   : > { %1387 = vrot.lane.b32.xlu0 %v6581_v55, %s6058_s25 }
 0x375   : > { %1417 = vrot.lane.b32.xlu0 %v6574_v15, %s6057_s2 }
 0x379   : > { %1385 = vrot.lane.b32.xlu0 %v6574_v15, %s6058_s25 }
 0x37d   : > { %1415 = vrot.lane.b32.xlu0 %v6559_v31, %s6057_s2 }
 0x381   : > { %1383 = vrot.lane.b32.xlu0 %v6559_v31, %s6058_s25 }
 0x3ab   : > { %v6609_v24 = vpop.permute.xlu0 %1381 }
 0x3ac   : > { %1591 = vrot.lane.b32.xlu1 %v6609_v24, %s6057_s2 }
 0x3ad   : > { %v6613_v57 = vpop.permute.xlu1 %1379 }
 0x3af   : > { %v6615_v58 = vpop.permute.xlu0 %1373 }
 0x3b0   : > { %1413 = vrot.lane.b32.xlu1 %v6563_v43, %s6059_s8 }
 0x3b1   : > { %v6619_v44 = vpop.permute.xlu1 %1377 }
 0x3b3   : > { %v6621_v62 = vpop.permute.xlu0 %1369 }
 0x3b4   : > { %1589 = vrot.lane.b32.xlu1 %v6613_v57, %s6057_s2 }
 0x3b5   : > { %v6625_v63 = vpop.permute.xlu1 %1375 }
 0x3b7   : > { %v1430_v0 = vpop.permute.xlu0 %1429 }
 0x3b8   : > { %5336 = vmatprep.subr.msk.bf16.mxu1 %vm1431_vm5, %v1430_v0  ;;  %1411 = vrot.lane.b32.xlu1 %v6565_v40, %s6059_s8  ;;  %v1478_v25 = vsel %vm1431_vm5, %v1430_v0, 0 }
 0x3b9   : > { %4985 = vmatpush3.bf16.xpose.msra.mxu1 %v1478_v25  ;;  %v6631_v1 = vpop.permute.xlu1 %1371 }
 0x3bb   : > { %v6633_v2 = vpop.permute.xlu0 %1397 }
 0x3bc   : > { %1752 = vrot.lane.b32.xlu0 %v6633_v2, %s6057_s2  ;;  %1587 = vrot.lane.b32.xlu1 %v6619_v44, %s6057_s2 }
 0x3bd   : > { %v6639_v3 = vpop.permute.xlu1 %1367 }
 0x3be   : > { %5032 = vmatprep.mubr.msk.bf16.mxu0 %vm1431_vm5, %v6639_v3 }
 0x3bf   : > { %v1428_v34 = vpop.permute.xlu0 %1427 }
 0x3c0   : > { %5337 = vmatprep.subr.msk.bf16.mxu1 %vm1431_vm5, %v1428_v34  ;;  %1409 = vrot.lane.b32.xlu1 %v6571_v51, %s6059_s8  ;;  %v1475_v6 = vsel %vm1431_vm5, %v1428_v34, 0 }
 0x3c1   : > { %4987 = vmatpush3.bf16.xpose.msra.mxu1 %v1475_v6 }
 0x3c3   : > { %v6647_v60 = vpop.permute.xlu0 %1395 }
 0x3c4   : > { %1750 = vrot.lane.b32.xlu0 %v6647_v60, %s6057_s2  ;;  %1585 = vrot.lane.b32.xlu1 %v6625_v63, %s6057_s2 }
 0x3c7   : > { %v1426_v8 = vpop.permute.xlu0 %1425 }
 0x3c8   : > { %5338 = vmatprep.subr.msk.bf16.mxu1 %vm1431_vm5, %v1426_v8  ;;  %1407 = vrot.lane.b32.xlu1 %v6577_v54, %s6059_s8  ;;  %v1472_v9 = vsel %vm1431_vm5, %v1426_v8, 0 }
 0x3c9   : > { %4989 = vmatpush3.bf16.xpose.msra.mxu1 %v1472_v9 }
 0x3cb   : > { %v6657_v10 = vpop.permute.xlu0 %1393 }
 0x3cc   : > { %1748 = vrot.lane.b32.xlu0 %v6657_v10, %s6057_s2  ;;  %1583 = vrot.lane.b32.xlu1 %v6615_v58, %s6057_s2 }
 0x3cf   : > { %v1424_v11 = vpop.permute.xlu0 %1423 }
 0x3d0   : > { %5339 = vmatprep.subr.msk.bf16.mxu1 %vm1431_vm5, %v1424_v11  ;;  %1405 = vrot.lane.b32.xlu1 %v6568_v50, %s6059_s8  ;;  %v1469_v35 = vsel %vm1431_vm5, %v1424_v11, 0 }
 0x3d1   : > { %4991 = vmatpush3.bf16.xpose.msra.mxu1 %v1469_v35 }
 0x3d3   : > { %v6667_v12 = vpop.permute.xlu0 %1391 }
 0x3d4   : > { %1746 = vrot.lane.b32.xlu0 %v6667_v12, %s6057_s2  ;;  %1581 = vrot.lane.b32.xlu1 %v6631_v1, %s6057_s2 }
 0x3d7   : > { %v1422_v47 = vpop.permute.xlu0 %1421 }
 0x3d8   : > { %5340 = vmatprep.subr.msk.bf16.mxu1 %vm1431_vm5, %v1422_v47  ;;  %1403 = vrot.lane.b32.xlu1 %v6581_v55, %s6059_s8  ;;  %v1466_v52 = vsel %vm1431_vm5, %v1422_v47, 0 }
 0x3d9   : > { %4993 = vmatpush3.bf16.xpose.msra.mxu1 %v1466_v52 }
 0x3db   : > { %v6677_v53 = vpop.permute.xlu0 %1389 }
 0x3dc   : > { %1744 = vrot.lane.b32.xlu0 %v6677_v53, %s6057_s2  ;;  %1579 = vrot.lane.b32.xlu1 %v6621_v62, %s6057_s2 }
 0x3df   : > { %v1420_v13 = vpop.permute.xlu0 %1419 }
 0x3e0   : > { %5341 = vmatprep.subr.msk.bf16.mxu1 %vm1431_vm5, %v1420_v13  ;;  %1401 = vrot.lane.b32.xlu1 %v6574_v15, %s6059_s8  ;;  %v1463_v16 = vsel %vm1431_vm5, %v1420_v13, 0 }
 0x3e1   : > { %4995 = vmatpush3.bf16.xpose.msra.mxu1 %v1463_v16 }
 0x3e3   : > { %v6687_v17 = vpop.permute.xlu0 %1387 }
 0x3e4   : > { %1742 = vrot.lane.b32.xlu0 %v6687_v17, %s6057_s2  ;;  %1577 = vrot.lane.b32.xlu1 %v6639_v3, %s6057_s2 }
 0x3e7   : > { %v1418_v41 = vpop.permute.xlu0 %1417 }
 0x3e8   : > { %5342 = vmatprep.subr.msk.bf16.mxu1 %vm1431_vm5, %v1418_v41  ;;  %1399 = vrot.lane.b32.xlu1 %v6559_v31, %s6059_s8  ;;  %v1460_v18 = vsel %vm1431_vm5, %v1418_v41, 0  ;;  %s8522_s8 = scalar_lea.vmem %s8361_s15, %s6246_s1  ;;  %s8523_s1 = sld [smem:[#allocation8_spill]] }
 0x3e9   : > { %4997 = vmatpush3.bf16.xpose.msra.mxu1 %v1460_v18 }
 0x3eb   : > { %v6697_v19 = vpop.permute.xlu0 %1385 }
 0x3ec   : > { %1740 = vrot.lane.b32.xlu0 %v6697_v19, %s6057_s2 }
 0x3ee   : > { %p4761_p1 = scmp.ne.s32.totalorder %s8523_s1, 1 }
 0x3ef   : > { %v1416_v59 = vpop.permute.xlu0 %1415  ;;  %s8526_s27 = sld [smem:[#allocation59_spill]] (!%p4761_p1) }
 0x3f0   : > { %5343 = vmatprep.subr.msk.bf16.mxu1 %vm1431_vm5, %v1416_v59  ;;  %v1457_v4 = vsel %vm1431_vm5, %v1416_v59, 0  ;;  %s8527_s25 = sld [smem:[#allocation61_spill]] (!%p4761_p1) }
 0x3f1   : > { %4999 = vmatpush3.bf16.xpose.msra.mxu1 %v1457_v4 }
 0x3f3   : > { %v6703_v20 = vpop.permute.xlu0 %1383 }
 0x3f4   : > { %8454 = vst [vmem:[#allocation18_spill] sm:$0xff] %v6703_v20  ;;  %1738 = vrot.lane.b32.xlu0 %v6703_v20, %s6057_s2 }
 0x3f8   : > { %5001 = vmatmul.mubr.msk.bf16.vlgmr.msra.gmra.mxu1 %vm1431_vm5, %v6574_v15  ;;  %2751 = vrot.lane.b32.xlu0 %v6563_v43, %s6060_s3 }
 0x3f9   : > { %5004 = vmatprep.mubr.msk.bf16.mxu1 %vm1431_vm5, %v6581_v55 }
 0x3fc   : > { %2749 = vrot.lane.b32.xlu0 %v6565_v40, %s6060_s3 }
 0x400   : > { %5005 = vmatmul.mubr.msk.bf16.gmra.mxu1 %vm1431_vm5, %v6568_v50  ;;  %2868 = vrot.lane.b32.xlu0 %v6619_v44, %s6060_s3 }
 0x401   : > { %5008 = vmatprep.mubr.msk.bf16.mxu1 %vm1431_vm5, %v6577_v54 }
 0x404   : > { %2864 = vrot.lane.b32.xlu0 %v6615_v58, %s6060_s3 }
 0x408   : > { %5009 = vmatmul.mubr.msk.bf16.gmra.mxu1 %vm1431_vm5, %v6571_v51  ;;  %2862 = vrot.lane.b32.xlu0 %v6631_v1, %s6060_s3 }
 0x409   : > { %5012 = vmatprep.mubr.msk.bf16.mxu1 %vm1431_vm5, %v6565_v40 }
 0x40c   : > { %2737 = vrot.lane.b32.xlu0 %v6559_v31, %s6060_s3 }
 0x410   : > { %5013 = vmatmul.mubr.msk.bf16.gmra.mxu1 %vm1431_vm5, %v6563_v43  ;;  %2858 = vrot.lane.b32.xlu0 %v6639_v3, %s6060_s3 }
 0x411   : > { %5064 = vmatprep.mubr.msk.bf16.mxu1 %vm1431_vm5, %v6703_v20 }
 0x414   : > { %2993 = vrot.lane.b32.xlu0 %v6633_v2, %s6060_s3 }
 0x418   : > { %2989 = vrot.lane.b32.xlu0 %v6657_v10, %s6060_s3 }
 0x41e   : > { %v1592_v21 = vpop.permute.xlu1 %1591 }
 0x41f   : > { %5344 = vmatprep.subr.msk.bf16.mxu0 %vm1431_vm5, %v1592_v21  ;;  %v1639_v61 = vsel %vm1431_vm5, %v1592_v21, 0 }
 0x420   : > { %5017 = vmatpush3.bf16.xpose.msra.mxu0 %v1639_v61 }
 0x422   : > { %v6743_v22 = vpop.permute.xlu1 %1413 }
 0x423   : > { %1913 = vrot.lane.b32.xlu1 %v6743_v22, %s6057_s2 }
 0x426   : > { %v1590_v23 = vpop.permute.xlu1 %1589 }
 0x427   : > { %5345 = vmatprep.subr.msk.bf16.mxu0 %vm1431_vm5, %v1590_v23  ;;  %v1636_v45 = vsel %vm1431_vm5, %v1590_v23, 0 }
 0x428   : > { %5019 = vmatpush3.bf16.xpose.msra.mxu0 %v1636_v45 }
 0x42a   : > { %v6749_v49 = vpop.permute.xlu1 %1411 }
 0x42b   : > { %1911 = vrot.lane.b32.xlu1 %v6749_v49, %s6057_s2 }
 0x42e   : > { %v1753_v26 = vpop.permute.xlu0 %1752  ;;  %v1588_v27 = vpop.permute.xlu1 %1587 }
 0x42f   : > { %5346 = vmatprep.subr.msk.bf16.mxu0 %vm1431_vm5, %v1588_v27  ;;  %5352 = vmatprep.subr.msk.bf16.mxu1 %vm1431_vm5, %v1753_v26  ;;  %v1633_v28 = vsel %vm1431_vm5, %v1588_v27, 0  ;;  %v1800_v29 = vsel %vm1431_vm5, %v1753_v26, 0 }
 0x430   : > { %5021 = vmatpush3.bf16.xpose.msra.mxu0 %v1633_v28  ;;  %5049 = vmatpush3.bf16.xpose.msra.mxu1 %v1800_v29 }
 0x432   : > { %v6757_v30 = vpop.permute.xlu1 %1409 }
 0x433   : > { %3110 = vrot.lane.b32.xlu0 %v6757_v30, %s6060_s3  ;;  %1909 = vrot.lane.b32.xlu1 %v6757_v30, %s6057_s2 }
 0x436   : > { %v1751_v7 = vpop.permute.xlu0 %1750  ;;  %v1586_v31 = vpop.permute.xlu1 %1585 }
 0x437   : > { %5347 = vmatprep.subr.msk.bf16.mxu0 %vm1431_vm5, %v1586_v31  ;;  %5353 = vmatprep.subr.msk.bf16.mxu1 %vm1431_vm5, %v1751_v7  ;;  %v1630_v32 = vsel %vm1431_vm5, %v1586_v31, 0  ;;  %v1797_v56 = vsel %vm1431_vm5, %v1751_v7, 0 }
 0x438   : > { %5023 = vmatpush3.bf16.xpose.msra.mxu0 %v1630_v32  ;;  %5051 = vmatpush3.bf16.xpose.msra.mxu1 %v1797_v56 }
 0x43a   : > { %v6767_v33 = vpop.permute.xlu1 %1407 }
 0x43b   : > { %1907 = vrot.lane.b32.xlu1 %v6767_v33, %s6057_s2 }
 0x43e   : > { %v1749_v5 = vpop.permute.xlu0 %1748  ;;  %v1584_v36 = vpop.permute.xlu1 %1583 }
 0x43f   : > { %5348 = vmatprep.subr.msk.bf16.mxu0 %vm1431_vm5, %v1584_v36  ;;  %5354 = vmatprep.subr.msk.bf16.mxu1 %vm1431_vm5, %v1749_v5  ;;  %v1627_v14 = vsel %vm1431_vm5, %v1584_v36, 0  ;;  %v1794_v48 = vsel %vm1431_vm5, %v1749_v5, 0 }
 0x440   : > { %5025 = vmatpush3.bf16.xpose.msra.mxu0 %v1627_v14  ;;  %5053 = vmatpush3.bf16.xpose.msra.mxu1 %v1794_v48 }
 0x442   : > { %v6775_v37 = vpop.permute.xlu1 %1405 }
 0x443   : > { %3106 = vrot.lane.b32.xlu0 %v6775_v37, %s6060_s3  ;;  %1905 = vrot.lane.b32.xlu1 %v6775_v37, %s6057_s2 }
 0x446   : > { %v1747_v38 = vpop.permute.xlu0 %1746  ;;  %v1582_v39 = vpop.permute.xlu1 %1581 }
 0x447   : > { %5349 = vmatprep.subr.msk.bf16.mxu0 %vm1431_vm5, %v1582_v39  ;;  %5355 = vmatprep.subr.msk.bf16.mxu1 %vm1431_vm5, %v1747_v38  ;;  %v1624_v42 = vsel %vm1431_vm5, %v1582_v39, 0  ;;  %v1791_v43 = vsel %vm1431_vm5, %v1747_v38, 0 }
 0x448   : > { %5027 = vmatpush3.bf16.xpose.msra.mxu0 %v1624_v42  ;;  %5055 = vmatpush3.bf16.xpose.msra.mxu1 %v1791_v43 }
 0x44a   : > { %v6785_v46 = vpop.permute.xlu1 %1403 }
 0x44b   : > { %3104 = vrot.lane.b32.xlu0 %v6785_v46, %s6060_s3  ;;  %1903 = vrot.lane.b32.xlu1 %v6785_v46, %s6057_s2 }
 0x44e   : > { %v1745_v40 = vpop.permute.xlu0 %1744  ;;  %v1580_v0 = vpop.permute.xlu1 %1579 }
 0x44f   : > { %5356 = vmatprep.subr.msk.bf16.mxu1 %vm1431_vm5, %v1745_v40  ;;  %2991 = vrot.lane.b32.xlu0 %v6647_v60, %s6060_s3  ;;  %v1621_v25 = vsel %vm1431_vm5, %v1580_v0, 0  ;;  %v1788_v3 = vsel %vm1431_vm5, %v1745_v40, 0 }
 0x450   : > { %5350 = vmatprep.subr.msk.bf16.mxu0 %vm1431_vm5, %v1580_v0  ;;  %5057 = vmatpush3.bf16.xpose.msra.mxu1 %v1788_v3 }
 0x451   : > { %5029 = vmatpush3.bf16.xpose.msra.mxu0 %v1621_v25 }
 0x452   : > { %v6797_v34 = vpop.permute.xlu1 %1401 }
 0x453   : > { %8455 = vst [vmem:[#allocation19_spill] sm:$0xff] %v6797_v34  ;;  %1901 = vrot.lane.b32.xlu1 %v6797_v34, %s6057_s2 }
 0x456   : > { %v1743_v6 = vpop.permute.xlu0 %1742  ;;  %v1578_v8 = vpop.permute.xlu1 %1577 }
 0x457   : > { %5351 = vmatprep.subr.msk.bf16.mxu0 %vm1431_vm5, %v1578_v8  ;;  %5357 = vmatprep.subr.msk.bf16.mxu1 %vm1431_vm5, %v1743_v6  ;;  %v1618_v9 = vsel %vm1431_vm5, %v1578_v8, 0  ;;  %v1785_v11 = vsel %vm1431_vm5, %v1743_v6, 0 }
 0x458   : > { %5059 = vmatpush3.bf16.xpose.msra.mxu1 %v1785_v11 }
 0x459   : > { %5031 = vmatpush3.bf16.xpose.msra.mxu0 %v1618_v9 }
 0x45a   : > { %v6805_v35 = vpop.permute.xlu1 %1399 }
 0x45b   : > { %8456 = vst [vmem:[#allocation20_spill] sm:$0xff] %v6805_v35  ;;  %1899 = vrot.lane.b32.xlu1 %v6805_v35, %s6057_s2 }
 0x45e   : > { %v1741_v47 = vpop.permute.xlu0 %1740 }
 0x45f   : > { %5358 = vmatprep.subr.msk.bf16.mxu1 %vm1431_vm5, %v1741_v47  ;;  %2872 = vrot.lane.b32.xlu1 %v6609_v24, %s6060_s3  ;;  %v1782_v52 = vsel %vm1431_vm5, %v1741_v47, 0 }
 0x460   : > { %5033 = vmatmul.mubr.msk.bf16.vlgmr.msra.gmra.mxu0 %vm1431_vm5, %v6621_v62  ;;  %5061 = vmatpush3.bf16.xpose.msra.mxu1 %v1782_v52 }
 0x461   : > { %5036 = vmatprep.mubr.msk.bf16.mxu0 %vm1431_vm5, %v6631_v1 }
 0x463   : > { %2747 = vrot.lane.b32.xlu1 %v6571_v51, %s6060_s3 }
 0x466   : > { %v1739_v13 = vpop.permute.xlu0 %1738 }
 0x467   : > { %5359 = vmatprep.subr.msk.bf16.mxu1 %vm1431_vm5, %v1739_v13  ;;  %2745 = vrot.lane.b32.xlu1 %v6577_v54, %s6060_s3  ;;  %v1779_v16 = vsel %vm1431_vm5, %v1739_v13, 0 }
 0x468   : > { %5037 = vmatmul.mubr.msk.bf16.gmra.mxu0 %vm1431_vm5, %v6615_v58  ;;  %5063 = vmatpush3.bf16.xpose.msra.mxu1 %v1779_v16 }
 0x469   : > { %5040 = vmatprep.mubr.msk.bf16.mxu0 %vm1431_vm5, %v6625_v63 }
 0x46a   : > { %v2752_v41 = vpop.permute.xlu0 %2751 }
 0x46b   : > { %5112 = vmatprep.subr.bf16.mxu1 %v2752_v41  ;;  %2866 = vrot.lane.b32.xlu1 %v6625_v63, %s6060_s3 }
 0x46e   : > { %v2750_v51 = vpop.permute.xlu0 %2749 }
 0x46f   : > { %5065 = vmatmul.mubr.msk.bf16.vlgmr.msra.gmra.mxu1 %vm1431_vm5, %v6697_v19  ;;  %2743 = vrot.lane.b32.xlu1 %v6568_v50, %s6060_s3 }
 0x470   : > { %5041 = vmatmul.mubr.msk.bf16.gmra.mxu0 %vm1431_vm5, %v6619_v44  ;;  %5068 = vmatprep.mubr.msk.bf16.mxu1 %vm1431_vm5, %v6687_v17 }
 0x471   : > { %5044 = vmatprep.mubr.msk.bf16.mxu0 %vm1431_vm5, %v6613_v57  ;;  %5113 = vmatpush3.bf16.msra.mxu1 %v2752_v41 }
 0x472   : > { %5114 = vmatprep.subr.bf16.mxu1 %v2750_v51  ;;  %v2869_v40 = vpop.permute.xlu0 %2868 }
 0x473   : > { %2741 = vrot.lane.b32.xlu1 %v6581_v55, %s6060_s3 }
 0x475   : > { %5115 = vmatpush3.bf16.msra.mxu1 %v2750_v51 }
 0x476   : > { %v2865_v13 = vpop.permute.xlu0 %2864 }
 0x477   : > { %5069 = vmatmul.mubr.msk.bf16.gmra.mxu1 %vm1431_vm5, %v6677_v53  ;;  %2739 = vrot.lane.b32.xlu1 %v6574_v15, %s6060_s3 }
 0x478   : > { %5045 = vmatmul.mubr.msk.bf16.gmra.mxu0 %vm1431_vm5, %v6609_v24  ;;  %5072 = vmatprep.mubr.msk.bf16.mxu1 %vm1431_vm5, %v6667_v12 }
 0x479   : > { %5096 = vmatprep.mubr.msk.bf16.mxu0 %vm1431_vm5, %v6805_v35 }
 0x47b   : > { %2860 = vrot.lane.b32.xlu1 %v6621_v62, %s6060_s3  ;;  %v2060_v62 = vlaneseq }
 0x47d   : > { %v6883_v63 = vand.u32 127, %v2060_v62 }
 0x47f   : > { %5073 = vmatmul.mubr.msk.bf16.gmra.mxu1 %vm1431_vm5, %v6657_v10  ;;  %3114 = vrot.lane.b32.xlu1 %v6743_v22, %s6060_s3  ;;  %vm2062_vm6 = vcmp.lt.s32.totalorder %v6883_v63, 17 }
 0x480   : > { %5076 = vmatprep.mubr.msk.bf16.mxu1 %vm1431_vm5, %v6647_v60 }
 0x483   : > { %2987 = vrot.lane.b32.xlu1 %v6667_v12, %s6060_s3 }
 0x487   : > { %5077 = vmatmul.mubr.msk.bf16.gmra.mxu1 %vm1431_vm5, %v6633_v2  ;;  %3108 = vrot.lane.b32.xlu1 %v6767_v33, %s6060_s3 }
 0x48b   : > { %2985 = vrot.lane.b32.xlu1 %v6677_v53, %s6060_s3 }
 0x48f   : > { %2983 = vrot.lane.b32.xlu1 %v6687_v17, %s6060_s3 }
 0x493   : > { %2981 = vrot.lane.b32.xlu1 %v6697_v19, %s6060_s3 }
 0x495   : > { %v1914_v50 = vpop.permute.xlu1 %1913 }
 0x496   : > { %5360 = vmatprep.subr.msk.bf16.mxu0 %vm1431_vm5, %v1914_v50  ;;  %v1961_v15 = vsel %vm1431_vm5, %v1914_v50, 0  ;;  %v2863_v50 = vpop.permute.xlu0 %2862 }
 0x497   : > { %2870 = vrot.lane.b32.xlu1 %v6613_v57, %s6060_s3  ;;  %5081 = vmatpush3.bf16.xpose.msra.mxu0 %v1961_v15 }
 0x49b   : > { %3112 = vrot.lane.b32.xlu1 %v6749_v49, %s6060_s3 }
 0x49d   : > { %v1912_v54 = vpop.permute.xlu1 %1911 }
 0x49e   : > { %5361 = vmatprep.subr.msk.bf16.mxu0 %vm1431_vm5, %v1912_v54  ;;  %v1958_v55 = vsel %vm1431_vm5, %v1912_v54, 0  ;;  %v2738_v54 = vpop.permute.xlu0 %2737 }
 0x49f   : > { %5083 = vmatpush3.bf16.xpose.msra.mxu0 %v1958_v55 }
 0x4a5   : > { %v1910_v24 = vpop.permute.xlu1 %1909 }
 0x4a6   : > { %5362 = vmatprep.subr.msk.bf16.mxu0 %vm1431_vm5, %v1910_v24  ;;  %v1955_v58 = vsel %vm1431_vm5, %v1910_v24, 0  ;;  %v2859_v24 = vpop.permute.xlu0 %2858 }
 0x4a7   : > { %5085 = vmatpush3.bf16.xpose.msra.mxu0 %v1955_v58 }
 0x4ad   : > { %v1908_v44 = vpop.permute.xlu1 %1907 }
 0x4ae   : > { %5363 = vmatprep.subr.msk.bf16.mxu0 %vm1431_vm5, %v1908_v44  ;;  %v1952_v57 = vsel %vm1431_vm5, %v1908_v44, 0 }
 0x4af   : > { %5087 = vmatpush3.bf16.xpose.msra.mxu0 %v1952_v57 }
 0x4b5   : > { %v1906_v1 = vpop.permute.xlu1 %1905 }
 0x4b6   : > { %5364 = vmatprep.subr.msk.bf16.mxu0 %vm1431_vm5, %v1906_v1  ;;  %v1949_v2 = vsel %vm1431_vm5, %v1906_v1, 0 }
 0x4b7   : > { %5089 = vmatpush3.bf16.xpose.msra.mxu0 %v1949_v2 }
 0x4b8   : > { %v5002_v60 = vpop.f32.mrf.mxu1 }
 0x4b9   : > { %v6890_v10 = vsel %vm2062_vm6, %v5002_v60, -1e+30 }
 0x4ba   : > { %v1514_v12 = vpop.f32.mrf.mxu1  ;;  %2133 = vmax.xlane.f32.xlu0 %v6890_v10 }
 0x4bb   : > { %v6895_v17 = vsel %vm2062_vm6, %v1514_v12, -1e+30 }
 0x4bc   : > { %v5003_v53 = vpop.f32.mrf.mxu1 }
 0x4bd   : > { %v1904_v18 = vpop.permute.xlu1 %1903  ;;  %v6907_v61 = vsel %vm2062_vm6, %v5003_v53, -1e+30 }
 0x4be   : > { %v1517_v19 = vpop.f32.mrf.mxu1  ;;  %2129 = vmax.xlane.f32.xlu0 %v6895_v17  ;;  %5365 = vmatprep.subr.msk.bf16.mxu0 %vm1431_vm5, %v1904_v18  ;;  %v1946_v59 = vsel %vm1431_vm5, %v1904_v18, 0 }
 0x4bf   : > { %v6902_v4 = vsel %vm2062_vm6, %v1517_v19, -1e+30  ;;  %5091 = vmatpush3.bf16.xpose.msra.mxu0 %v1946_v59 }
 0x4c0   : > { %v5006_v21 = vpop.f32.mrf.mxu1  ;;  %2131 = vmax.xlane.f32.xlu1 %v6902_v4 }
 0x4c1   : > { %v6912_v26 = vsel %vm2062_vm6, %v5006_v21, -1e+30 }
 0x4c2   : > { %v1530_v23 = vpop.f32.mrf.mxu1  ;;  %2135 = vmax.xlane.f32.xlu0 %v6907_v61 }
 0x4c3   : > { %v6924_v32 = vsel %vm2062_vm6, %v1530_v23, -1e+30 }
 0x4c4   : > { %v5007_v45 = vpop.f32.mrf.mxu1 }
 0x4c5   : > { %v6916_v27 = vsel %vm2062_vm6, %v5007_v45, -1e+30  ;;  %v1902_v28 = vpop.permute.xlu1 %1901 }
 0x4c6   : > { %v1533_v29 = vpop.f32.mrf.mxu1  ;;  %2141 = vmax.xlane.f32.xlu0 %v6912_v26  ;;  %2143 = vmax.xlane.f32.xlu1 %v6916_v27  ;;  %v1943_v7 = vsel %vm1431_vm5, %v1902_v28, 0 }
 0x4c7   : > { %5366 = vmatprep.subr.msk.bf16.mxu0 %vm1431_vm5, %v1902_v28  ;;  %v6928_v56 = vsel %vm2062_vm6, %v1533_v29, -1e+30 }
 0x4c8   : > { %5093 = vmatpush3.bf16.xpose.msra.mxu0 %v1943_v7  ;;  %v5010_v31 = vpop.f32.mrf.mxu1 }
 0x4c9   : > { %v6934_v14 = vsel %vm2062_vm6, %v5010_v31, -1e+30 }
 0x4ca   : > { %v1546_v5 = vpop.f32.mrf.mxu1  ;;  %2137 = vmax.xlane.f32.xlu0 %v6924_v32  ;;  %2139 = vmax.xlane.f32.xlu1 %v6928_v56 }
 0x4cb   : > { %v6946_v0 = vsel %vm2062_vm6, %v1546_v5, -1e+30 }
 0x4cc   : > { %v5011_v36 = vpop.f32.mrf.mxu1 }
 0x4cd   : > { %v6938_v48 = vsel %vm2062_vm6, %v5011_v36, -1e+30  ;;  %v1900_v38 = vpop.permute.xlu1 %1899 }
 0x4ce   : > { %v1549_v39 = vpop.f32.mrf.mxu1  ;;  %2149 = vmax.xlane.f32.xlu0 %v6934_v14  ;;  %2151 = vmax.xlane.f32.xlu1 %v6938_v48  ;;  %v1940_v42 = vsel %vm1431_vm5, %v1900_v38, 0 }
 0x4cf   : > { %5367 = vmatprep.subr.msk.bf16.mxu0 %vm1431_vm5, %v1900_v38  ;;  %v6950_v25 = vsel %vm2062_vm6, %v1549_v39, -1e+30 }
 0x4d0   : > { %5095 = vmatpush3.bf16.xpose.msra.mxu0 %v1940_v42  ;;  %v5014_v43 = vpop.f32.mrf.mxu1 }
 0x4d1   : > { %v2873_v3 = vpop.permute.xlu1 %2872  ;;  %v6956_v9 = vsel %vm2062_vm6, %v5014_v43, -1e+30 }
 0x4d2   : > { %v1562_v6 = vpop.f32.mrf.mxu1  ;;  %2145 = vmax.xlane.f32.xlu0 %v6946_v0  ;;  %2147 = vmax.xlane.f32.xlu1 %v6950_v25 }
 0x4d3   : > { %5144 = vmatprep.subr.bf16.mxu0 %v2873_v3  ;;  %v6970_v16 = vsel %vm2062_vm6, %v1562_v6, -1e+30 }
 0x4d4   : > { %v5015_v8 = vpop.f32.mrf.mxu1 }
 0x4d5   : > { %v6960_v11 = vsel %vm2062_vm6, %v5015_v8, -1e+30  ;;  %v2748_v47 = vpop.permute.xlu1 %2747 }
 0x4d6   : > { %v1565_v52 = vpop.f32.mrf.mxu1  ;;  %2157 = vmax.xlane.f32.xlu0 %v6956_v9  ;;  %2159 = vmax.xlane.f32.xlu1 %v6960_v11 }
 0x4d7   : > { %5097 = vmatmul.mubr.msk.bf16.vlgmr.msra.gmra.mxu0 %vm1431_vm5, %v6797_v34  ;;  %5116 = vmatprep.subr.bf16.mxu1 %v2748_v47  ;;  %v6974_v41 = vsel %vm2062_vm6, %v1565_v52, -1e+30 }
 0x4d8   : > { %5100 = vmatprep.mubr.msk.bf16.mxu0 %vm1431_vm5, %v6785_v46  ;;  %5117 = vmatpush3.bf16.msra.mxu1 %v2748_v47 }
 0x4d9   : > { %5145 = vmatpush3.bf16.msra.mxu0 %v2873_v3  ;;  %v2746_v51 = vpop.permute.xlu1 %2745 }
 0x4da   : > { %2153 = vmax.xlane.f32.xlu0 %v6970_v16  ;;  %2155 = vmax.xlane.f32.xlu1 %v6974_v41 }
 0x4db   : > { %5118 = vmatprep.subr.bf16.mxu1 %v2746_v51 }
 0x4dc   : > { %5119 = vmatpush3.bf16.msra.mxu1 %v2746_v51 }
 0x4dd   : > { %v2867_v15 = vpop.permute.xlu1 %2866 }
 0x4df   : > { %5101 = vmatmul.mubr.msk.bf16.gmra.mxu0 %vm1431_vm5, %v6775_v37 }
 0x4e0   : > { %5104 = vmatprep.mubr.msk.bf16.mxu0 %vm1431_vm5, %v6767_v33  ;;  %v6986_v33 = vpop.permute.xlu0 %2993 }
 0x4e1   : > { %v2744_v46 = vpop.permute.xlu1 %2743 }
 0x4e2   : > { %5120 = vmatprep.subr.bf16.mxu1 %v2744_v46 }
 0x4e3   : > { %5121 = vmatpush3.bf16.msra.mxu1 %v2744_v46 }
 0x4e4   : > { %v7014_v19 = vpop.permute.xlu0 %2989 }
 0x4e5   : > { %v2742_v55 = vpop.permute.xlu1 %2741 }
 0x4e6   : > { %5122 = vmatprep.subr.bf16.mxu1 %v2742_v55 }
 0x4e7   : > { %5105 = vmatmul.mubr.msk.bf16.gmra.mxu0 %vm1431_vm5, %v6757_v30  ;;  %5123 = vmatpush3.bf16.msra.mxu1 %v2742_v55 }
 0x4e8   : > { %5108 = vmatprep.mubr.msk.bf16.mxu0 %vm1431_vm5, %v6749_v49  ;;  %v7016_v21 = vpop.permute.xlu0 %3110 }
 0x4e9   : > { %v2740_v58 = vpop.permute.xlu1 %2739  ;;  %8463 = vst [vmem:[#allocation27_spill] sm:$0xff] %v7016_v21 }
 0x4ea   : > { %5124 = vmatprep.subr.bf16.mxu1 %v2740_v58 }
 0x4eb   : > { %5125 = vmatpush3.bf16.msra.mxu1 %v2740_v58 }
 0x4ec   : > { %5126 = vmatprep.subr.bf16.mxu1 %v2738_v54  ;;  %v7023_v7 = vpop.permute.xlu0 %3106 }
 0x4ed   : > { %v2861_v37 = vpop.permute.xlu1 %2860  ;;  %8464 = vst [vmem:[#allocation28_spill] sm:$0xff] %v7023_v7 }
 0x4ef   : > { %5109 = vmatmul.mubr.msk.bf16.gmra.mxu0 %vm1431_vm5, %v6743_v22  ;;  %5127 = vmatpush3.bf16.msra.mxu1 %v2738_v54 }
 0x4f0   : > { %5176 = vmatprep.subr.bf16.mxu1 %v6986_v33  ;;  %v7035_v39 = vpop.permute.xlu0 %3104 }
 0x4f1   : > { %v6991_v44 = vpop.permute.xlu1 %3114  ;;  %8465 = vst [vmem:[#allocation29_spill] sm:$0xff] %v7035_v39 }
 0x4f2   : > { %8457 = vst [vmem:[#allocation21_spill] sm:$0xff] %v6991_v44 }
 0x4f5   : > { %v6993_v30 = vpop.permute.xlu1 %2987 }
 0x4f6   : > { %8458 = vst [vmem:[#allocation22_spill] sm:$0xff] %v6993_v30 }
 0x4f9   : > { %v6995_v57 = vpop.permute.xlu1 %3108 }
 0x4fa   : > { %8459 = vst [vmem:[#allocation23_spill] sm:$0xff] %v6995_v57 }
 0x4fd   : > { %v6997_v49 = vpop.permute.xlu1 %2985 }
 0x4fe   : > { %8460 = vst [vmem:[#allocation24_spill] sm:$0xff] %v6997_v49 }
 0x501   : > { %v6999_v62 = vpop.permute.xlu1 %2983 }
 0x502   : > { %8461 = vst [vmem:[#allocation25_spill] sm:$0xff] %v6999_v62 }
 0x505   : > { %v7001_v1 = vpop.permute.xlu1 %2981 }
 0x506   : > { %8462 = vst [vmem:[#allocation26_spill] sm:$0xff] %v7001_v1 }
 0x509   : > { %v2871_v2 = vpop.permute.xlu1 %2870 }
 0x50a   : > { %5146 = vmatprep.subr.bf16.mxu0 %v2871_v2 }
 0x50b   : > { %5147 = vmatpush3.bf16.msra.mxu0 %v2871_v2 }
 0x50c   : > { %5148 = vmatprep.subr.bf16.mxu0 %v2869_v40 }
 0x50d   : > { %v7079_v2 = vpop.permute.xlu1 %3112 }
 0x50e   : > { %8466 = vst [vmem:[#allocation30_spill] sm:$0xff] %v7079_v2 }
 0x50f   : > { %5149 = vmatpush3.bf16.msra.mxu0 %v2869_v40 }
 0x510   : > { %5150 = vmatprep.subr.bf16.mxu0 %v2867_v15 }
 0x513   : > { %5151 = vmatpush3.bf16.msra.mxu0 %v2867_v15 }
 0x514   : > { %5152 = vmatprep.subr.bf16.mxu0 %v2865_v13 }
 0x517   : > { %5153 = vmatpush3.bf16.msra.mxu0 %v2865_v13  ;;  %v7057_v13 = vpop.permute.xlu0 %2991 }
 0x518   : > { %5154 = vmatprep.subr.bf16.mxu0 %v2863_v50 }
 0x51b   : > { %5155 = vmatpush3.bf16.msra.mxu0 %v2863_v50 }
 0x51c   : > { %5156 = vmatprep.subr.bf16.mxu0 %v2861_v37 }
 0x51f   : > { %5157 = vmatpush3.bf16.msra.mxu0 %v2861_v37 }
 0x520   : > { %v5034_v22 = vpop.f32.mrf.mxu0  ;;  %5158 = vmatprep.subr.bf16.mxu0 %v2859_v24 }
 0x521   : > { %v7005_v60 = vsel %vm2062_vm6, %v5034_v22, -1e+30 }
 0x522   : > { %2165 = vmax.xlane.f32.xlu0 %v7005_v60  ;;  %v1675_v12 = vpop.f32.mrf.mxu0 }
 0x523   : > { %5159 = vmatpush3.bf16.msra.mxu0 %v2859_v24  ;;  %v7027_v31 = vsel %vm2062_vm6, %v1675_v12, -1e+30 }
 0x524   : > { %v5035_v53 = vpop.f32.mrf.mxu0  ;;  %5208 = vmatprep.subr.bf16.mxu0 %v6991_v44 }
 0x525   : > { %v7011_v18 = vsel %vm2062_vm6, %v5035_v53, -1e+30 }
 0x526   : > { %2167 = vmax.xlane.f32.xlu1 %v7011_v18  ;;  %v1678_v45 = vpop.f32.mrf.mxu0 }
 0x527   : > { %v7039_v42 = vsel %vm2062_vm6, %v1678_v45, -1e+30 }
 0x528   : > { %v5038_v36 = vpop.f32.mrf.mxu0 }
 0x529   : > { %v7049_v6 = vsel %vm2062_vm6, %v5038_v36, -1e+30 }
 0x52a   : > { %v1691_v40 = vpop.f32.mrf.mxu0 }
 0x52b   : > { %v7071_v55 = vsel %vm2062_vm6, %v1691_v40, -1e+30 }
 0x52c   : > { %v5039_v47 = vpop.f32.mrf.mxu0 }
 0x52d   : > { %v7061_v51 = vsel %vm2062_vm6, %v5039_v47, -1e+30 }
 0x52e   : > { %v1694_v15 = vpop.f32.mrf.mxu0 }
 0x52f   : > { %v5066_v59 = vpop.f32.mrf.mxu1  ;;  %v7083_v12 = vsel %vm2062_vm6, %v1694_v15, -1e+30 }
 0x530   : > { %v7020_v23 = vsel %vm2062_vm6, %v5066_v59, -1e+30  ;;  %v5042_v58 = vpop.f32.mrf.mxu0 }
 0x531   : > { %v1836_v28 = vpop.f32.mrf.mxu1  ;;  %2197 = vmax.xlane.f32.xlu0 %v7020_v23  ;;  %v7095_v36 = vsel %vm2062_vm6, %v5042_v58, -1e+30 }
 0x532   : > { %v7043_v43 = vsel %vm2062_vm6, %v1836_v28, -1e+30  ;;  %v1707_v59 = vpop.f32.mrf.mxu0 }
 0x533   : > { %v5067_v29 = vpop.f32.mrf.mxu1  ;;  %v7119_v35 = vsel %vm2062_vm6, %v1707_v59, -1e+30 }
 0x534   : > { %v7031_v5 = vsel %vm2062_vm6, %v5067_v29, -1e+30  ;;  %v5043_v40 = vpop.f32.mrf.mxu0 }
 0x535   : > { %v1839_v38 = vpop.f32.mrf.mxu1  ;;  %2161 = vmax.xlane.f32.xlu0 %v7027_v31  ;;  %2199 = vmax.xlane.f32.xlu1 %v7031_v5 }
 0x536   : > { %v7053_v8 = vsel %vm2062_vm6, %v1839_v38, -1e+30  ;;  %v1710_v58 = vpop.f32.mrf.mxu0 }
 0x537   : > { %v5070_v3 = vpop.f32.mrf.mxu1  ;;  %v7132_v2 = vsel %vm2062_vm6, %v1710_v58, -1e+30 }
 0x538   : > { %v7065_v50 = vsel %vm2062_vm6, %v5070_v3, -1e+30  ;;  %v5046_v7 = vpop.f32.mrf.mxu0 }
 0x539   : > { %2193 = vmax.xlane.f32.xlu0 %v7043_v43  ;;  %2163 = vmax.xlane.f32.xlu1 %v7039_v42  ;;  %v1852_v52 = vpop.f32.mrf.mxu1 }
 0x53a   : > { %v7087_v53 = vsel %vm2062_vm6, %v1852_v52, -1e+30  ;;  %v7107_v52 = vsel %vm2062_vm6, %v5043_v40, -1e+30 }
 0x53b   : > { %v5071_v46 = vpop.f32.mrf.mxu1 }
 0x53c   : > { %v7075_v24 = vsel %vm2062_vm6, %v5071_v46, -1e+30 }
 0x53d   : > { %2173 = vmax.xlane.f32.xlu0 %v7049_v6  ;;  %2195 = vmax.xlane.f32.xlu1 %v7053_v8  ;;  %v1855_v37 = vpop.f32.mrf.mxu1 }
 0x53e   : > { %v7099_v38 = vsel %vm2062_vm6, %v1855_v37, -1e+30 }
 0x53f   : > { %v5074_v45 = vpop.f32.mrf.mxu1 }
 0x540   : > { %v7111_v15 = vsel %vm2062_vm6, %v5074_v45, -1e+30 }
 0x541   : > { %2205 = vmax.xlane.f32.xlu0 %v7065_v50  ;;  %2175 = vmax.xlane.f32.xlu1 %v7061_v51  ;;  %v1868_v3 = vpop.f32.mrf.mxu1 }
 0x542   : > { %v7136_v59 = vsel %vm2062_vm6, %v1868_v3, -1e+30 }
 0x543   : > { %v2134_v54 = vpop.xlane.xlu0 %2133  ;;  %v5075_v37 = vpop.f32.mrf.mxu1 }
 0x544   : > { %v7123_v40 = vsel %vm2062_vm6, %v5075_v37, -1e+30  ;;  %v2259_v21 = vsub.f32 %v6890_v10, %v2134_v54  ;;  %v1723_v37 = vpop.f32.mrf.mxu0  ;;  %v7146_v54 = vsel %vm2062_vm6, %v5046_v7, -1e+30 }
 0x545   : > { %2169 = vmax.xlane.f32.xlu0 %v7071_v55  ;;  %2207 = vmax.xlane.f32.xlu1 %v7075_v24  ;;  %v1871_v45 = vpop.f32.mrf.mxu1 }
 0x546   : > { %v2325_v1 = vmul.f32 1.442695, %v2259_v21  ;;  %v7150_v3 = vsel %vm2062_vm6, %v1871_v45, -1e+30  ;;  %v5047_v62 = vpop.f32.mrf.mxu0 }
 0x547   : > { %v2130_v22 = vpop.xlane.xlu0 %2129  ;;  %v5078_v44 = vpop.f32.mrf.mxu1  ;;  %v7158_v7 = vsel %vm2062_vm6, %v5047_v62, -1e+30 }
 0x548   : > { %v2257_v20 = vsub.f32 %v6895_v17, %v2130_v22  ;;  %5620 = vpow2.f32 %v2325_v1  ;;  %v7162_v22 = vsel %vm2062_vm6, %v5078_v44, -1e+30  ;;  %v7171_v1 = vsel %vm2062_vm6, %v1723_v37, -1e+30 }
 0x549   : > { %2201 = vmax.xlane.f32.xlu0 %v7087_v53  ;;  %2171 = vmax.xlane.f32.xlu1 %v7083_v12  ;;  %v7091_v28 = vpop.xlane.xlu1 %2131  ;;  %v1884_v49 = vpop.f32.mrf.mxu1  ;;  %8467 = vst [vmem:[#allocation31_spill] sm:$0xff] %v7162_v22 }
 0x54a   : > { %v2321_v17 = vmul.f32 1.442695, %v2257_v20  ;;  %v2258_v20 = vsub.f32 %v6902_v4, %v7091_v28 }
 0x54b   : > { %v2136_v29 = vpop.xlane.xlu0 %2135  ;;  %v5079_v30 = vpop.f32.mrf.mxu1 }
 0x54c   : > { %v2260_v21 = vsub.f32 %v6907_v61, %v2136_v29  ;;  %5622 = vpow2.f32 %v2321_v17  ;;  %v7175_v44 = vsel %vm2062_vm6, %v5079_v30, -1e+30  ;;  %v1726_v29 = vpop.f32.mrf.mxu0  ;;  %v7187_v30 = vsel %vm2062_vm6, %v1884_v49, -1e+30 }
 0x54d   : > { %2181 = vmax.xlane.f32.xlu0 %v7095_v36  ;;  %2203 = vmax.xlane.f32.xlu1 %v7099_v38  ;;  %8468 = vst [vmem:[#allocation32_spill] sm:$0xff] %v7175_v44  ;;  %v7183_v28 = vsel %vm2062_vm6, %v1726_v29, -1e+30  ;;  %v1887_v37 = vpop.f32.mrf.mxu1 }
 0x54e   : > { %v2327_v61 = vmul.f32 1.442695, %v2260_v21  ;;  %v7197_v17 = vsel %vm2062_vm6, %v1887_v37, -1e+30 }
 0x54f   : > { %v7103_v47 = vpop.xlane.xlu1 %2143  ;;  %v7113_v46 = vpop.xlane.xlu0 %2141 }
 0x550   : > { %v2263_v4 = vsub.f32 %v6912_v26, %v7113_v46 }
 0x551   : > { %2213 = vmax.xlane.f32.xlu0 %v7111_v15  ;;  %2183 = vmax.xlane.f32.xlu1 %v7107_v52 }
 0x553   : > { %v2140_v39 = vpop.xlane.xlu1 %2139  ;;  %v7127_v57 = vpop.xlane.xlu0 %2137 }
 0x554   : > { %v2262_v10 = vsub.f32 %v6928_v56, %v2140_v39  ;;  %v2261_v26 = vsub.f32 %v6924_v32, %v7127_v57 }
 0x555   : > { %2177 = vmax.xlane.f32.xlu0 %v7119_v35  ;;  %2215 = vmax.xlane.f32.xlu1 %v7123_v40  ;;  %v7193_v46 = vpop.eup %5620 }
 0x556   : > { %v2331_v56 = vmul.f32 1.442695, %v2262_v10  ;;  %v2323_v10 = vmul.f32 1.442695, %v2258_v20 }
 0x557   : > { %v7141_v34 = vpop.xlane.xlu1 %2151  ;;  %v2150_v58 = vpop.xlane.xlu0 %2149 }
 0x558   : > { %v2267_v39 = vsub.f32 %v6934_v14, %v2150_v58  ;;  %5624 = vpow2.f32 %v2331_v56  ;;  %v2333_v58 = vmul.f32 1.442695, %v2263_v4  ;;  %v2264_v56 = vsub.f32 %v6916_v27, %v7103_v47 }
 0x559   : > { %2209 = vmax.xlane.f32.xlu0 %v7136_v59  ;;  %2179 = vmax.xlane.f32.xlu1 %v7132_v2  ;;  %5626 = vpow2.f32 %v2327_v61  ;;  %v7201_v49 = vpop.eup %5622  ;;  %v2268_v47 = vsub.f32 %v6938_v48, %v7141_v34 }
 0x55a   : > { %v2341_v14 = vmul.f32 1.442695, %v2267_v39  ;;  %v2329_v39 = vmul.f32 1.442695, %v2261_v26  ;;  %v2335_v20 = vmul.f32 1.442695, %v2264_v56 }
 0x55b   : > { %v2148_v45 = vpop.xlane.xlu1 %2147  ;;  %v2146_v21 = vpop.xlane.xlu0 %2145 }
 0x55c   : > { %v2266_v62 = vsub.f32 %v6950_v25, %v2148_v45  ;;  %5628 = vpow2.f32 %v2341_v14  ;;  %v2265_v61 = vsub.f32 %v6946_v0, %v2146_v21  ;;  %v2343_v0 = vmul.f32 1.442695, %v2268_v47 }
 0x55d   : > { %2189 = vmax.xlane.f32.xlu0 %v7146_v54  ;;  %2211 = vmax.xlane.f32.xlu1 %v7150_v3  ;;  %5630 = vpow2.f32 %v2323_v10 }
 0x55e   : > { %v2339_v25 = vmul.f32 1.442695, %v2266_v62  ;;  %v2337_v62 = vmul.f32 1.442695, %v2265_v61 }
 0x55f   : > { %v2158_v57 = vpop.xlane.xlu0 %2157 }
 0x560   : > { %5632 = vpow2.f32 %v2339_v25  ;;  %v2271_v48 = vsub.f32 %v6956_v9, %v2158_v57 }
 0x561   : > { %2221 = vmax.xlane.f32.xlu0 %v7162_v22  ;;  %2191 = vmax.xlane.f32.xlu1 %v7158_v7  ;;  %5634 = vpow2.f32 %v2333_v58 }
 0x562   : > { %5636 = vpow2.f32 %v2329_v39  ;;  %v2349_v21 = vmul.f32 1.442695, %v2271_v48 }
 0x563   : > { %5638 = vpow2.f32 %v2335_v20  ;;  %v2154_v10 = vpop.xlane.xlu0 %2153 }
 0x564   : > { %5640 = vpow2.f32 %v2337_v62  ;;  %v2269_v4 = vsub.f32 %v6970_v16, %v2154_v10  ;;  %v2160_v16 = vpop.xlane.xlu1 %2159 }
 0x565   : > { %2185 = vmax.xlane.f32.xlu0 %v7171_v1  ;;  %2223 = vmax.xlane.f32.xlu1 %v7175_v44  ;;  %v7205_v32 = vpop.eup %5624  ;;  %5642 = vpow2.f32 %v2343_v0  ;;  %v2272_v39 = vsub.f32 %v6960_v11, %v2160_v16 }
 0x566   : > { %v7209_v45 = vpop.eup %5626  ;;  %v2345_v37 = vmul.f32 1.442695, %v2269_v4 }
 0x567   : > { %v2351_v47 = vmul.f32 1.442695, %v2272_v39 }
 0x568   : > { %5644 = vpow2.f32 %v2345_v37  ;;  %v2156_v61 = vpop.xlane.xlu1 %2155 }
 0x569   : > { %2217 = vmax.xlane.f32.xlu0 %v7187_v30  ;;  %2187 = vmax.xlane.f32.xlu1 %v7183_v28  ;;  %v7212_v14 = vpop.eup %5628  ;;  %5646 = vpow2.f32 %v2349_v21  ;;  %v2270_v9 = vsub.f32 %v6974_v41, %v2156_v61 }
 0x56a   : > { %v7216_v27 = vpop.eup %5630  ;;  %5648 = vpow2.f32 %v2351_v47 }
 0x56b   : > { %v2347_v57 = vmul.f32 1.442695, %v2270_v9 }
 0x56d   : > { %2453 = vadd.xlane.f32.xlu0 %v7193_v46  ;;  %2219 = vmax.xlane.f32.xlu1 %v7197_v17  ;;  %v7220_v29 = vpop.eup %5632  ;;  %5650 = vpow2.f32 %v2347_v57 }
 0x56e   : > { %v7225_v25 = vpop.eup %5634 }
 0x56f   : > { %v7228_v58 = vpop.eup %5636 }
 0x570   : > { %v7231_v34 = vpop.eup %5638 }
 0x571   : > { %2449 = vadd.xlane.f32.xlu1 %v7201_v49  ;;  %2459 = vadd.xlane.f32.xlu0 %v7205_v32  ;;  %v7235_v26 = vpop.eup %5640 }
 0x572   : > { %v7238_v56 = vpop.eup %5642 }
 0x575   : > { %2455 = vadd.xlane.f32.xlu1 %v7209_v45  ;;  %2469 = vadd.xlane.f32.xlu0 %v7212_v14  ;;  %v7242_v20 = vpop.eup %5644 }
 0x576   : > { %8469 = vst [vmem:[#allocation33_spill] sm:$0xff] %v7242_v20  ;;  %v7251_v4 = vpop.eup %5646 }
 0x577   : > { %8470 = vst [vmem:[#allocation34_spill] sm:$0xff] %v7251_v4  ;;  %v7269_v47 = vpop.eup %5648 }
 0x578   : > { %8471 = vst [vmem:[#allocation35_spill] sm:$0xff] %v7269_v47 }
 0x579   : > { %2451 = vadd.xlane.f32.xlu1 %v7216_v27  ;;  %2467 = vadd.xlane.f32.xlu0 %v7220_v29 }
 0x57d   : > { %2461 = vadd.xlane.f32.xlu1 %v7225_v25 }
 0x581   : > { %2457 = vadd.xlane.f32.xlu1 %v7228_v58 }
 0x585   : > { %2463 = vadd.xlane.f32.xlu1 %v7231_v34 }
 0x589   : > { %2465 = vadd.xlane.f32.xlu1 %v7235_v26 }
 0x58d   : > { %2471 = vadd.xlane.f32.xlu1 %v7238_v56 }
 0x591   : > { %2473 = vadd.xlane.f32.xlu1 %v7242_v20 }
 0x597   : > { %v5098_v62 = vpop.f32.mrf.mxu0 }
 0x598   : > { %v7248_v10 = vsel %vm2062_vm6, %v5098_v62, -1e+30 }
 0x599   : > { %v1997_v0 = vpop.f32.mrf.mxu0  ;;  %2229 = vmax.xlane.f32.xlu0 %v7248_v10 }
 0x59a   : > { %v7261_v16 = vsel %vm2062_vm6, %v1997_v0, -1e+30  ;;  %v7277_v0 = vpop.eup %5650 }
 0x59b   : > { %v5099_v11 = vpop.f32.mrf.mxu0  ;;  %8472 = vst [vmem:[#allocation36_spill] sm:$0xff] %v7277_v0 }
 0x59c   : > { %v7255_v37 = vsel %vm2062_vm6, %v5099_v11, -1e+30 }
 0x59d   : > { %v2000_v48 = vpop.f32.mrf.mxu0  ;;  %2231 = vmax.xlane.f32.xlu1 %v7255_v37  ;;  %2477 = vadd.xlane.f32.xlu0 %v7251_v4 }
 0x59e   : > { %v7265_v21 = vsel %vm2062_vm6, %v2000_v48, -1e+30 }
 0x59f   : > { %v5102_v41 = vpop.f32.mrf.mxu0 }
 0x5a1   : > { %v2013_v39 = vpop.f32.mrf.mxu0  ;;  %2227 = vmax.xlane.f32.xlu1 %v7265_v21  ;;  %2225 = vmax.xlane.f32.xlu0 %v7261_v16 }
 0x5a3   : > { %v5103_v61 = vpop.f32.mrf.mxu0 }
 0x5a4   : > { %v7273_v9 = vsel %vm2062_vm6, %v5103_v61, -1e+30  ;;  %v7287_v61 = vsel %vm2062_vm6, %v5102_v41, -1e+30 }
 0x5a5   : > { %v2016_v57 = vpop.f32.mrf.mxu0  ;;  %2239 = vmax.xlane.f32.xlu1 %v7273_v9  ;;  %2479 = vadd.xlane.f32.xlu0 %v7269_v47  ;;  %8474 = vst [vmem:[#allocation38_spill] sm:$0xff] %v7287_v61 }
 0x5a6   : > { %v7281_v11 = vsel %vm2062_vm6, %v2016_v57, -1e+30 }
 0x5a7   : > { %v5106_v62 = vpop.f32.mrf.mxu0  ;;  %8473 = vst [vmem:[#allocation37_spill] sm:$0xff] %v7281_v11 }
 0x5a9   : > { %v2029_v48 = vpop.f32.mrf.mxu0  ;;  %2235 = vmax.xlane.f32.xlu1 %v7281_v11  ;;  %2475 = vadd.xlane.f32.xlu0 %v7277_v0  ;;  %v7298_v0 = vsel %vm2062_vm6, %v2013_v39, -1e+30 }
 0x5aa   : > { %v7318_v39 = vsel %vm2062_vm6, %v2029_v48, -1e+30 }
 0x5ab   : > { %v5107_v4 = vpop.f32.mrf.mxu0  ;;  %v2166_v20 = vpop.xlane.xlu0 %2165  ;;  %8479 = vst [vmem:[#allocation43_spill] sm:$0xff] %v7318_v39 }
 0x5ac   : > { %v7291_v47 = vsel %vm2062_vm6, %v5107_v4, -1e+30  ;;  %v2275_v57 = vsub.f32 %v7005_v60, %v2166_v20 }
 0x5ad   : > { %8475 = vst [vmem:[#allocation39_spill] sm:$0xff] %v7291_v47  ;;  %v2032_v44 = vpop.f32.mrf.mxu0  ;;  %2247 = vmax.xlane.f32.xlu1 %v7291_v47  ;;  %2237 = vmax.xlane.f32.xlu0 %v7287_v61  ;;  %v7308_v61 = vsel %vm2062_vm6, %v5106_v62, -1e+30 }
 0x5ae   : > { %v7302_v41 = vsel %vm2062_vm6, %v2032_v44, -1e+30  ;;  %v2357_v4 = vmul.f32 1.442695, %v2275_v57  ;;  %8477 = vst [vmem:[#allocation41_spill] sm:$0xff] %v7308_v61 }
 0x5af   : > { %v5110_v11 = vpop.f32.mrf.mxu0  ;;  %8476 = vst [vmem:[#allocation40_spill] sm:$0xff] %v7302_v41  ;;  %v2168_v44 = vpop.xlane.xlu1 %2167 }
 0x5b0   : > { %5652 = vpow2.f32 %v2357_v4  ;;  %v7330_v4 = vsel %vm2062_vm6, %v5110_v11, -1e+30 }
 0x5b1   : > { %v2045_v22 = vpop.f32.mrf.mxu0  ;;  %2243 = vmax.xlane.f32.xlu1 %v7302_v41  ;;  %2233 = vmax.xlane.f32.xlu0 %v7298_v0 }
 0x5b3   : > { %v5111_v47 = vpop.f32.mrf.mxu0 }
 0x5b4   : > { %v7312_v60 = vsel %vm2062_vm6, %v5111_v47, -1e+30  ;;  %v2276_v47 = vsub.f32 %v7011_v18, %v2168_v44 }
 0x5b5   : > { %8478 = vst [vmem:[#allocation42_spill] sm:$0xff] %v7312_v60  ;;  %v2048_v20 = vpop.f32.mrf.mxu0  ;;  %2255 = vmax.xlane.f32.xlu1 %v7312_v60  ;;  %2245 = vmax.xlane.f32.xlu0 %v7308_v61 }
 0x5b6   : > { %v7322_v57 = vsel %vm2062_vm6, %v2048_v20, -1e+30  ;;  %v2359_v48 = vmul.f32 1.442695, %v2276_v47 }
 0x5b7   : > { %8480 = vst [vmem:[#allocation44_spill] sm:$0xff] %v7322_v57 }
 0x5b9   : > { %2251 = vmax.xlane.f32.xlu1 %v7322_v57  ;;  %2241 = vmax.xlane.f32.xlu0 %v7318_v39  ;;  %v7336_v39 = vsel %vm2062_vm6, %v2045_v22, -1e+30 }
 0x5ba   : > { %v2198_v62 = vpop.xlane.xlu0 %2197 }
 0x5bb   : > { %v2291_v60 = vsub.f32 %v7020_v23, %v2198_v62 }
 0x5bd   : > { %v2389_v41 = vmul.f32 1.442695, %v2291_v60  ;;  %2253 = vmax.xlane.f32.xlu0 %v7330_v4  ;;  %v7341_v47 = vpop.eup %5652 }
 0x5be   : > { %v2162_v61 = vpop.xlane.xlu0 %2161  ;;  %v2200_v20 = vpop.xlane.xlu1 %2199 }
 0x5bf   : > { %5654 = vpow2.f32 %v2389_v41  ;;  %v2273_v57 = vsub.f32 %v7027_v31, %v2162_v61  ;;  %v2292_v60 = vsub.f32 %v7031_v5, %v2200_v20 }
 0x5c0   : > { %5656 = vpow2.f32 %v2359_v48 }
 0x5c1   : > { %v2353_v18 = vmul.f32 1.442695, %v2273_v57  ;;  %2249 = vmax.xlane.f32.xlu0 %v7336_v39  ;;  %v2391_v22 = vmul.f32 1.442695, %v2292_v60 }
 0x5c2   : > { %v2194_v23 = vpop.xlane.xlu0 %2193  ;;  %v2164_v11 = vpop.xlane.xlu1 %2163 }
 0x5c3   : > { %5658 = vpow2.f32 %v2353_v18  ;;  %v2289_v44 = vsub.f32 %v7043_v43, %v2194_v23  ;;  %v2274_v61 = vsub.f32 %v7039_v42, %v2164_v11 }
 0x5c5   : > { %v2385_v41 = vmul.f32 1.442695, %v2289_v44  ;;  %2485 = vadd.xlane.f32.xlu0 %v7341_v47  ;;  %v2355_v43 = vmul.f32 1.442695, %v2274_v61 }
 0x5c6   : > { %v2174_v31 = vpop.xlane.xlu0 %2173  ;;  %v2196_v63 = vpop.xlane.xlu1 %2195 }
 0x5c7   : > { %5660 = vpow2.f32 %v2385_v41  ;;  %v2290_v57 = vsub.f32 %v7053_v8, %v2196_v63  ;;  %v2279_v62 = vsub.f32 %v7049_v6, %v2174_v31 }
 0x5c8   : > { %5662 = vpow2.f32 %v2391_v22 }
 0x5c9   : > { %v2387_v48 = vmul.f32 1.442695, %v2290_v57  ;;  %v2365_v44 = vmul.f32 1.442695, %v2279_v62 }
 0x5ca   : > { %v2206_v18 = vpop.xlane.xlu0 %2205  ;;  %v2176_v5 = vpop.xlane.xlu1 %2175 }
 0x5cb   : > { %v2280_v20 = vsub.f32 %v7061_v51, %v2176_v5  ;;  %5664 = vpow2.f32 %v2387_v48  ;;  %v2295_v60 = vsub.f32 %v7065_v50, %v2206_v18 }
 0x5cc   : > { %v7348_v23 = vpop.eup %5654  ;;  %5666 = vpow2.f32 %v2355_v43 }
 0x5cd   : > { %8481 = vst [vmem:[#allocation45_spill] sm:$0xff] %v7348_v23  ;;  %2517 = vadd.xlane.f32.xlu1 %v7348_v23  ;;  %v7352_v8 = vpop.eup %5656  ;;  %v2367_v6 = vmul.f32 1.442695, %v2280_v20  ;;  %5668 = vpow2.f32 %v2365_v44  ;;  %v2397_v31 = vmul.f32 1.442695, %v2295_v60 }
 0x5ce   : > { %v2170_v42 = vpop.xlane.xlu0 %2169  ;;  %v2208_v11 = vpop.xlane.xlu1 %2207 }
 0x5cf   : > { %v2277_v51 = vsub.f32 %v7071_v55, %v2170_v42  ;;  %5670 = vpow2.f32 %v2367_v6  ;;  %v2296_v43 = vsub.f32 %v7075_v24, %v2208_v11 }
 0x5d0   : > { %v7354_v41 = vpop.eup %5658  ;;  %5672 = vpow2.f32 %v2397_v31 }
 0x5d1   : > { %2481 = vadd.xlane.f32.xlu0 %v7354_v41  ;;  %2487 = vadd.xlane.f32.xlu1 %v7352_v8  ;;  %v2361_v57 = vmul.f32 1.442695, %v2277_v51 }
 0x5d2   : > { %v2202_v63 = vpop.xlane.xlu0 %2201  ;;  %v2172_v50 = vpop.xlane.xlu1 %2171 }
 0x5d3   : > { %v2293_v22 = vsub.f32 %v7087_v53, %v2202_v63  ;;  %5674 = vpow2.f32 %v2361_v57  ;;  %v2278_v31 = vsub.f32 %v7083_v12, %v2172_v50 }
 0x5d4   : > { %v7360_v61 = vpop.eup %5660 }
 0x5d5   : > { %2513 = vadd.xlane.f32.xlu0 %v7360_v61  ;;  %v2393_v18 = vmul.f32 1.442695, %v2293_v22  ;;  %v7364_v5 = vpop.eup %5662 }
 0x5d6   : > { %v2182_v62 = vpop.xlane.xlu0 %2181  ;;  %v2204_v48 = vpop.xlane.xlu1 %2203  ;;  %8482 = vst [vmem:[#allocation46_spill] sm:$0xff] %v7364_v5 }
 0x5d7   : > { %v2294_v55 = vsub.f32 %v7099_v38, %v2204_v48  ;;  %5676 = vpow2.f32 %v2393_v18  ;;  %v2399_v38 = vmul.f32 1.442695, %v2296_v43  ;;  %v2283_v57 = vsub.f32 %v7095_v36, %v2182_v62 }
 0x5d8   : > { %v7367_v20 = vpop.eup %5664 }
 0x5d9   : > { %v2395_v44 = vmul.f32 1.442695, %v2294_v55  ;;  %2519 = vadd.xlane.f32.xlu0 %v7364_v5  ;;  %2515 = vadd.xlane.f32.xlu1 %v7367_v20  ;;  %v7372_v6 = vpop.eup %5666  ;;  %v2373_v55 = vmul.f32 1.442695, %v2283_v57 }
 0x5da   : > { %v2214_v53 = vpop.xlane.xlu0 %2213  ;;  %v2184_v60 = vpop.xlane.xlu1 %2183 }
 0x5db   : > { %v2299_v42 = vsub.f32 %v7111_v15, %v2214_v53  ;;  %5678 = vpow2.f32 %v2395_v44  ;;  %v7375_v51 = vpop.eup %5668  ;;  %v2363_v15 = vmul.f32 1.442695, %v2278_v31 }
 0x5dc   : > { %v7379_v22 = vpop.eup %5670 }
 0x5dd   : > { %v2405_v24 = vmul.f32 1.442695, %v2299_v42  ;;  %2483 = vadd.xlane.f32.xlu0 %v7372_v6  ;;  %2493 = vadd.xlane.f32.xlu1 %v7375_v51  ;;  %v7382_v48 = vpop.eup %5672 }
 0x5de   : > { %v2178_v11 = vpop.xlane.xlu0 %2177  ;;  %v2216_v63 = vpop.xlane.xlu1 %2215 }
 0x5df   : > { %5680 = vpow2.f32 %v2405_v24  ;;  %v2281_v18 = vsub.f32 %v7119_v35, %v2178_v11 }
 0x5e0   : > { %5682 = vpow2.f32 %v2399_v38  ;;  %v7387_v43 = vpop.eup %5674 }
 0x5e1   : > { %2495 = vadd.xlane.f32.xlu0 %v7379_v22  ;;  %2525 = vadd.xlane.f32.xlu1 %v7382_v48  ;;  %5684 = vpow2.f32 %v2363_v15  ;;  %v2369_v42 = vmul.f32 1.442695, %v2281_v18 }
 0x5e2   : > { %v2210_v12 = vpop.xlane.xlu0 %2209  ;;  %v2180_v50 = vpop.xlane.xlu1 %2179  ;;  %5686 = vpow2.f32 %v2373_v55 }
 0x5e3   : > { %v2297_v36 = vsub.f32 %v7136_v59, %v2210_v12  ;;  %5688 = vpow2.f32 %v2369_v42 }
 0x5e4   : > { %v7392_v38 = vpop.eup %5676 }
 0x5e5   : > { %2489 = vadd.xlane.f32.xlu1 %v7387_v43  ;;  %8483 = vst [vmem:[#allocation47_spill] sm:$0xff] %v7392_v38  ;;  %v2401_v57 = vmul.f32 1.442695, %v2297_v36 }
 0x5e6   : > { %v2190_v44 = vpop.xlane.xlu0 %2189  ;;  %v2212_v53 = vpop.xlane.xlu1 %2211 }
 0x5e7   : > { %v2298_v62 = vsub.f32 %v7150_v3, %v2212_v53  ;;  %v2287_v31 = vsub.f32 %v7146_v54, %v2190_v44  ;;  %v2284_v3 = vsub.f32 %v7107_v52, %v2184_v60  ;;  %v2300_v44 = vsub.f32 %v7123_v40, %v2216_v63 }
 0x5e8   : > { %v7395_v24 = vpop.eup %5678 }
 0x5e9   : > { %8484 = vst [vmem:[#allocation48_spill] sm:$0xff] %v7395_v24  ;;  %v2403_v35 = vmul.f32 1.442695, %v2298_v62  ;;  %2521 = vadd.xlane.f32.xlu1 %v7392_v38  ;;  %2523 = vadd.xlane.f32.xlu0 %v7395_v24  ;;  %v2381_v12 = vmul.f32 1.442695, %v2287_v31 }
 0x5ea   : > { %v7399_v11 = vpop.xlane.xlu0 %2221  ;;  %v2192_v15 = vpop.xlane.xlu1 %2191  ;;  %v2375_v42 = vmul.f32 1.442695, %v2284_v3  ;;  %v2407_v62 = vmul.f32 1.442695, %v2300_v44 }
 0x5eb   : > { %5690 = vpow2.f32 %v2403_v35  ;;  %v2282_v35 = vsub.f32 %v7132_v2, %v2180_v50 }
 0x5ec   : > { %v7401_v59 = vpop.eup %5680  ;;  %5692 = vpow2.f32 %v2401_v57  ;;  %v2288_v57 = vsub.f32 %v7158_v7, %v2192_v15 }
 0x5ed   : > { %v7404_v18 = vpop.eup %5682  ;;  %2533 = vadd.xlane.f32.xlu0 %v7401_v59  ;;  %5694 = vpow2.f32 %v2381_v12 }
 0x5ee   : > { %2527 = vadd.xlane.f32.xlu1 %v7404_v18  ;;  %v2186_v54 = vpop.xlane.xlu0 %2185  ;;  %v7408_v55 = vpop.xlane.xlu1 %2223 }
 0x5ef   : > { %v2285_v53 = vsub.f32 %v7171_v1, %v2186_v54  ;;  %v7412_v36 = vpop.eup %5684  ;;  %v2371_v54 = vmul.f32 1.442695, %v2282_v35 }
 0x5f0   : > { %v7417_v23 = vpop.eup %5686 }
 0x5f1   : > { %v2377_v52 = vmul.f32 1.442695, %v2285_v53  ;;  %v7422_v12 = vpop.eup %5688  ;;  %v2383_v53 = vmul.f32 1.442695, %v2288_v57 }
 0x5f2   : > { %2491 = vadd.xlane.f32.xlu1 %v7412_v36  ;;  %v2188_v60 = vpop.xlane.xlu1 %2187  ;;  %v2218_v40 = vpop.xlane.xlu0 %2217 }
 0x5f3   : > { %5696 = vpow2.f32 %v2377_v52  ;;  %v2286_v31 = vsub.f32 %v7183_v28, %v2188_v60  ;;  %v2301_v28 = vsub.f32 %v7187_v30, %v2218_v40 }
 0x5f4   : > { %5698 = vpow2.f32 %v2375_v42 }
 0x5f5   : > { %v2379_v63 = vmul.f32 1.442695, %v2286_v31  ;;  %5700 = vpow2.f32 %v2407_v62  ;;  %v2409_v7 = vmul.f32 1.442695, %v2301_v28 }
 0x5f6   : > { %2501 = vadd.xlane.f32.xlu1 %v7417_v23  ;;  %v2220_v1 = vpop.xlane.xlu1 %2219 }
 0x5f7   : > { %v2302_v3 = vsub.f32 %v7197_v17, %v2220_v1  ;;  %5702 = vpow2.f32 %v2379_v63  ;;  %v2454_v17 = vpop.xlane.xlu0 %2453 }
 0x5f8   : > { %v7425_v44 = vpop.eup %5690 }
 0x5f9   : > { %v2411_v2 = vmul.f32 1.442695, %v2302_v3  ;;  %2531 = vadd.xlane.f32.xlu0 %v7425_v44  ;;  %v7429_v42 = vpop.eup %5692 }
 0x5fa   : > { %2497 = vadd.xlane.f32.xlu1 %v7422_v12  ;;  %v2450_v50 = vpop.xlane.xlu1 %2449  ;;  %v7431_v15 = vpop.eup %5694 }
 0x5fb   : > { %5704 = vpow2.f32 %v2411_v2  ;;  %v2460_v62 = vpop.xlane.xlu0 %2459 }
 0x5fc   : > { %5706 = vpow2.f32 %v2371_v54 }
 0x5fd   : > { %2509 = vadd.xlane.f32.xlu0 %v7431_v15  ;;  %5708 = vpow2.f32 %v2383_v53 }
 0x5fe   : > { %2529 = vadd.xlane.f32.xlu1 %v7429_v42  ;;  %v2456_v30 = vpop.xlane.xlu1 %2455  ;;  %5710 = vpow2.f32 %v2409_v7 }
 0x5ff   : > { %5712 = vrcp.f32 %v2456_v30  ;;  %v2470_v57 = vpop.xlane.xlu0 %2469 }
 0x600   : > { %v7435_v52 = vpop.eup %5696  ;;  %5714 = vrcp.f32 %v2450_v50 }
 0x601   : > { %v7437_v60 = vpop.eup %5698  ;;  %2505 = vadd.xlane.f32.xlu0 %v7435_v52  ;;  %5716 = vrcp.f32 %v2454_v17 }
 0x602   : > { %2503 = vadd.xlane.f32.xlu1 %v7437_v60  ;;  %v2452_v31 = vpop.xlane.xlu1 %2451  ;;  %v7441_v35 = vpop.eup %5700 }
 0x603   : > { %5718 = vrcp.f32 %v2452_v31  ;;  %v2468_v53 = vpop.xlane.xlu0 %2467 }
 0x604   : > { %v7443_v40 = vpop.eup %5702  ;;  %5720 = vrcp.f32 %v2460_v62 }
 0x605   : > { %2507 = vadd.xlane.f32.xlu0 %v7443_v40 }
 0x606   : > { %2535 = vadd.xlane.f32.xlu1 %v7441_v35  ;;  %v2462_v63 = vpop.xlane.xlu1 %2461 }
 0x608   : > { %v7447_v1 = vpop.eup %5704 }
 0x609   : > { %8485 = vst [vmem:[#allocation49_spill] sm:$0xff] %v7447_v1  ;;  %v7449_v3 = vpop.eup %5706  ;;  %2539 = vadd.xlane.f32.xlu0 %v7447_v1 }
 0x60a   : > { %2499 = vadd.xlane.f32.xlu1 %v7449_v3  ;;  %v2458_v54 = vpop.xlane.xlu1 %2457  ;;  %v7453_v28 = vpop.eup %5708 }
 0x60b   : > { %5722 = vrcp.f32 %v2458_v54  ;;  %v7455_v2 = vpop.eup %5710 }
 0x60c   : > { %8486 = vst [vmem:[#allocation50_spill] sm:$0xff] %v7455_v2  ;;  %5724 = vrcp.f32 %v2462_v63  ;;  %v5713_v50 = vpop.eup %5712 }
 0x60d   : > { %v5715_v17 = vpop.eup %5714  ;;  %v2644_v31 = vmul.f32 %v5713_v50, %v7209_v45 }
 0x60e   : > { %2537 = vadd.xlane.f32.xlu1 %v7455_v2  ;;  %v2464_v7 = vpop.xlane.xlu1 %2463  ;;  %v5717_v30 = vpop.eup %5716  ;;  %v2641_v1 = vmul.f32 %v5715_v17, %v7201_v49 }
 0x60f   : > { %5726 = vrcp.f32 %v2464_v7  ;;  %v2643_v63 = vmul.f32 %v5717_v30, %v7193_v46 }
 0x610   : > { %v5719_v62 = vpop.eup %5718  ;;  %5728 = vrcp.f32 %v2468_v53 }
 0x611   : > { %v2642_v24 = vmul.f32 %v5719_v62, %v7216_v27  ;;  %v2706_v2 = vpack.c.bf16 %v2644_v31, %v2643_v63  ;;  %v5721_v5 = vpop.eup %5720  ;;  %v8488_v31 = vld [vmem:[#allocation24_spill] sm:$0xff] }
 0x612   : > { %2511 = vadd.xlane.f32.xlu1 %v7453_v28  ;;  %v2466_v54 = vpop.xlane.xlu1 %2465  ;;  %v2646_v45 = vmul.f32 %v5721_v5, %v7205_v32 }
 0x613   : > { %5730 = vrcp.f32 %v2466_v54  ;;  %v2705_v38 = vpack.c.bf16 %v2642_v24, %v2641_v1 }
 0x614   : > { %5732 = vrcp.f32 %v2470_v57 }
 0x615   : > { %5128 = vmatprep.mubr.bf16.mxu1 %v2705_v38 }
 0x616   : > { %v2472_v7 = vpop.xlane.xlu1 %2471  ;;  %5129 = vmatmul.mubr.bf16.vlgmr.msra.gmra.mxu1 %v2706_v2 }
 0x617   : > { %5734 = vrcp.f32 %v2472_v7  ;;  %5177 = vmatpush3.bf16.msra.mxu1 %v6986_v33  ;;  %v8489_v7 = vld [vmem:[#allocation25_spill] sm:$0xff] }
 0x618   : > { %v5723_v53 = vpop.eup %5722  ;;  %5178 = vmatprep.subr.bf16.mxu1 %v7057_v13 }
 0x619   : > { %v2645_v49 = vmul.f32 %v5723_v53, %v7228_v58  ;;  %v5725_v27 = vpop.eup %5724  ;;  %v8487_v58 = vld [vmem:[#allocation22_spill] sm:$0xff] }
 0x61a   : > { %v2647_v38 = vmul.f32 %v5725_v27, %v7225_v25  ;;  %v2474_v2 = vpop.xlane.xlu1 %2473  ;;  %v8490_v27 = vld [vmem:[#allocation26_spill] sm:$0xff] }
 0x61b   : > { %v2707_v50 = vpack.c.bf16 %v2646_v45, %v2645_v49  ;;  %5179 = vmatpush3.bf16.msra.mxu1 %v7057_v13 }
 0x61c   : > { %v5727_v46 = vpop.eup %5726  ;;  %5180 = vmatprep.subr.bf16.mxu1 %v7014_v19 }
 0x61d   : > { %5132 = vmatprep.mubr.bf16.mxu1 %v2707_v50  ;;  %v2648_v24 = vmul.f32 %v5727_v46, %v7231_v34  ;;  %v5729_v1 = vpop.eup %5728 }
 0x61e   : > { %v2650_v5 = vmul.f32 %v5729_v1, %v7220_v29 }
 0x61f   : > { %v2708_v33 = vpack.c.bf16 %v2648_v24, %v2647_v38  ;;  %5181 = vmatpush3.bf16.msra.mxu1 %v7014_v19 }
 0x620   : > { %v5731_v57 = vpop.eup %5730  ;;  %5182 = vmatprep.subr.bf16.mxu1 %v8487_v58 }
 0x621   : > { %5133 = vmatmul.mubr.bf16.gmra.mxu1 %v2708_v33  ;;  %v2649_v32 = vmul.f32 %v5731_v57, %v7235_v26  ;;  %v5733_v13 = vpop.eup %5732  ;;  %v8491_v33 = vld [vmem:[#allocation31_spill] sm:$0xff] }
 0x622   : > { %v2230_v17 = vpop.xlane.xlu0 %2229  ;;  %v2651_v19 = vmul.f32 %v5733_v13, %v7212_v14  ;;  %v2303_v57 = vsub.f32 %v8491_v33, %v7399_v11 }
 0x623   : > { %v2307_v30 = vsub.f32 %v7248_v10, %v2230_v17  ;;  %v2709_v25 = vpack.c.bf16 %v2650_v5, %v2649_v32  ;;  %5183 = vmatpush3.bf16.msra.mxu1 %v8487_v58  ;;  %v8492_v32 = vld [vmem:[#allocation38_spill] sm:$0xff] }
 0x624   : > { %v5735_v62 = vpop.eup %5734  ;;  %5184 = vmatprep.subr.bf16.mxu1 %v8488_v31  ;;  %v2413_v17 = vmul.f32 1.442695, %v2303_v57  ;;  %v8500_v57 = vld [vmem:[#allocation34_spill] sm:$0xff] }
 0x625   : > { %v2421_v34 = vmul.f32 1.442695, %v2307_v30  ;;  %5136 = vmatprep.mubr.bf16.mxu1 %v2709_v25  ;;  %v2652_v54 = vmul.f32 %v5735_v62, %v7238_v56  ;;  %v8494_v62 = vld [vmem:[#allocation37_spill] sm:$0xff] }
 0x626   : > { %v2478_v26 = vpop.xlane.xlu0 %2477  ;;  %v2232_v63 = vpop.xlane.xlu1 %2231 }
 0x627   : > { %5736 = vpow2.f32 %v2421_v34  ;;  %v2710_v29 = vpack.c.bf16 %v2652_v54, %v2651_v19  ;;  %5185 = vmatpush3.bf16.msra.mxu1 %v8488_v31  ;;  %v2308_v49 = vsub.f32 %v7255_v37, %v2232_v63 }
 0x628   : > { %5186 = vmatprep.subr.bf16.mxu1 %v8489_v7 }
 0x629   : > { %5137 = vmatmul.mubr.bf16.gmra.mxu1 %v2710_v29  ;;  %v2423_v50 = vmul.f32 1.442695, %v2308_v49 }
 0x62a   : > { %v2226_v10 = vpop.xlane.xlu0 %2225  ;;  %v2228_v53 = vpop.xlane.xlu1 %2227 }
 0x62b   : > { %v2305_v45 = vsub.f32 %v7261_v16, %v2226_v10  ;;  %5187 = vmatpush3.bf16.msra.mxu1 %v8489_v7  ;;  %v2306_v46 = vsub.f32 %v7265_v21, %v2228_v53 }
 0x62c   : > { %5188 = vmatprep.subr.bf16.mxu1 %v8490_v27 }
 0x62d   : > { %v2417_v14 = vmul.f32 1.442695, %v2305_v45  ;;  %v2419_v16 = vmul.f32 1.442695, %v2306_v46 }
 0x62e   : > { %v2480_v56 = vpop.xlane.xlu0 %2479  ;;  %v2240_v38 = vpop.xlane.xlu1 %2239 }
 0x62f   : > { %5738 = vpow2.f32 %v2417_v14  ;;  %5189 = vmatpush3.bf16.msra.mxu1 %v8490_v27  ;;  %v2312_v37 = vsub.f32 %v7273_v9, %v2240_v38  ;;  %v8493_v9 = vld [vmem:[#allocation32_spill] sm:$0xff] }
 0x630   : > { %5740 = vrcp.f32 %v2474_v2  ;;  %v2304_v30 = vsub.f32 %v8493_v9, %v7408_v55  ;;  %v8495_v55 = vld [vmem:[#allocation41_spill] sm:$0xff]  ;;  %v8498_v38 = vld [vmem:[#allocation36_spill] sm:$0xff] }
 0x631   : > { %5742 = vrcp.f32 %v2480_v56  ;;  %v2431_v21 = vmul.f32 1.442695, %v2312_v37 }
 0x632   : > { %5744 = vrcp.f32 %v2478_v26  ;;  %v2476_v24 = vpop.xlane.xlu0 %2475  ;;  %v2236_v13 = vpop.xlane.xlu1 %2235  ;;  %v2415_v63 = vmul.f32 1.442695, %v2304_v30 }
 0x633   : > { %5746 = vpow2.f32 %v2423_v50  ;;  %v2310_v34 = vsub.f32 %v8494_v62, %v2236_v13  ;;  %v8497_v50 = vld [vmem:[#allocation33_spill] sm:$0xff]  ;;  %v8501_v13 = vld [vmem:[#allocation39_spill] sm:$0xff] }
 0x634   : > { %v7489_v1 = vpop.eup %5736  ;;  %5748 = vrcp.f32 %v2476_v24 }
 0x635   : > { %2549 = vadd.xlane.f32.xlu0 %v7489_v1  ;;  %5750 = vpow2.f32 %v2419_v16  ;;  %v2427_v10 = vmul.f32 1.442695, %v2310_v34  ;;  %v8499_v16 = vld [vmem:[#allocation43_spill] sm:$0xff] }
 0x636   : > { %v2238_v58 = vpop.xlane.xlu0 %2237  ;;  %5752 = vpow2.f32 %v2431_v21  ;;  %v2248_v27 = vpop.xlane.xlu1 %2247 }
 0x637   : > { %v2311_v5 = vsub.f32 %v8492_v32, %v2238_v58 }
 0x639   : > { %v2429_v2 = vmul.f32 1.442695, %v2311_v5 }
 0x63a   : > { %v2234_v25 = vpop.xlane.xlu0 %2233  ;;  %v2244_v34 = vpop.xlane.xlu1 %2243 }
 0x63b   : > { %5754 = vpow2.f32 %v2429_v2  ;;  %v2309_v31 = vsub.f32 %v7298_v0, %v2234_v25  ;;  %v8496_v0 = vld [vmem:[#allocation35_spill] sm:$0xff]  ;;  %v2316_v2 = vsub.f32 %v8501_v13, %v2248_v27 }
 0x63c   : > { %v7499_v19 = vpop.eup %5738  ;;  %5756 = vpow2.f32 %v2413_v17 }
 0x63d   : > { %v5741_v11 = vpop.eup %5740  ;;  %v2425_v54 = vmul.f32 1.442695, %v2309_v31  ;;  %2545 = vadd.xlane.f32.xlu0 %v7499_v19 }
 0x63e   : > { %v5743_v26 = vpop.eup %5742  ;;  %v2246_v29 = vpop.xlane.xlu0 %2245  ;;  %v2653_v46 = vmul.f32 %v5741_v11, %v8497_v50  ;;  %v2439_v11 = vmul.f32 1.442695, %v2316_v2 }
 0x63f   : > { %v5745_v7 = vpop.eup %5744  ;;  %5758 = vpow2.f32 %v2425_v54  ;;  %v2315_v53 = vsub.f32 %v8495_v55, %v2246_v29  ;;  %v2656_v14 = vmul.f32 %v5743_v26, %v8496_v0 }
 0x640   : > { %v7503_v49 = vpop.eup %5746  ;;  %5760 = vpow2.f32 %v2415_v63  ;;  %v2655_v21 = vmul.f32 %v5745_v7, %v8500_v57  ;;  %v8502_v63 = vld [vmem:[#allocation40_spill] sm:$0xff] }
 0x641   : > { %v5749_v45 = vpop.eup %5748  ;;  %2551 = vadd.xlane.f32.xlu0 %v7503_v49  ;;  %5762 = vpow2.f32 %v2427_v10  ;;  %v2437_v24 = vmul.f32 1.442695, %v2315_v53  ;;  %v2314_v29 = vsub.f32 %v8502_v63, %v2244_v34 }
 0x642   : > { %v2242_v56 = vpop.xlane.xlu0 %2241  ;;  %v2654_v37 = vmul.f32 %v5749_v45, %v8498_v38  ;;  %v7511_v58 = vpop.eup %5750  ;;  %v2712_v5 = vpack.c.bf16 %v2656_v14, %v2655_v21 }
 0x643   : > { %v2313_v33 = vsub.f32 %v8499_v16, %v2242_v56  ;;  %v7515_v30 = vpop.eup %5752  ;;  %5764 = vpow2.f32 %v2437_v24  ;;  %v2435_v53 = vmul.f32 1.442695, %v2314_v29  ;;  %v7532_v45 = vpop.xlane.xlu1 %2255 }
 0x644   : > { %v2711_v32 = vpack.c.bf16 %v2654_v37, %v2653_v46 }
 0x645   : > { %2547 = vadd.xlane.f32.xlu0 %v7511_v58  ;;  %v2433_v17 = vmul.f32 1.442695, %v2313_v33 }
 0x646   : > { %5140 = vmatprep.mubr.bf16.mxu1 %v2711_v32  ;;  %v2254_v9 = vpop.xlane.xlu0 %2253 }
 0x647   : > { %v2319_v25 = vsub.f32 %v7330_v4, %v2254_v9  ;;  %5141 = vmatmul.mubr.bf16.gmra.mxu1 %v2712_v5  ;;  %5766 = vpow2.f32 %v2433_v17  ;;  %v7540_v14 = vpop.xlane.xlu1 %2251 }
 0x648   : > { %v7518_v62 = vpop.eup %5754 }
 0x649   : > { %v2445_v31 = vmul.f32 1.442695, %v2319_v25  ;;  %2557 = vadd.xlane.f32.xlu1 %v7518_v62  ;;  %2559 = vadd.xlane.f32.xlu0 %v7515_v30  ;;  %v7522_v26 = vpop.eup %5756 }
 0x64a   : > { %v2250_v54 = vpop.xlane.xlu0 %2249 }
 0x64b   : > { %5768 = vpow2.f32 %v2445_v31  ;;  %v2317_v7 = vsub.f32 %v7336_v39, %v2250_v54 }
 0x64c   : > { %v7526_v4 = vpop.eup %5758  ;;  %5770 = vpow2.f32 %v2439_v11  ;;  %v8503_v11 = vld [vmem:[#allocation19_spill] sm:$0xff] }
 0x64d   : > { %v2441_v10 = vmul.f32 1.442695, %v2317_v7  ;;  %2553 = vadd.xlane.f32.xlu1 %v7526_v4  ;;  %2541 = vadd.xlane.f32.xlu0 %v7522_v26  ;;  %v7530_v55 = vpop.eup %5760  ;;  %v8504_v7 = vld [vmem:[#allocation18_spill] sm:$0xff] }
 0x64e   : > { %v7534_v0 = vpop.eup %5762  ;;  %v2486_v27 = vpop.xlane.xlu0 %2485 }
 0x64f   : > { %5772 = vpow2.f32 %v2441_v10 }
 0x650   : > { %5774 = vpow2.f32 %v2435_v53  ;;  %v7538_v39 = vpop.eup %5764 }
 0x651   : > { %2543 = vadd.xlane.f32.xlu0 %v7530_v55  ;;  %2555 = vadd.xlane.f32.xlu1 %v7534_v0 }
 0x654   : > { %v7543_v56 = vpop.eup %5766 }
 0x655   : > { %2565 = vadd.xlane.f32.xlu1 %v7538_v39 }
 0x656   : > { %v7547_v46 = vpop.xlane.xlu1 %2517 }
 0x658   : > { %v7545_v50 = vpop.eup %5768 }
 0x659   : > { %2573 = vadd.xlane.f32.xlu0 %v7545_v50  ;;  %2561 = vadd.xlane.f32.xlu1 %v7543_v56  ;;  %v7551_v37 = vpop.eup %5770 }
 0x65a   : > { %v2482_v38 = vpop.xlane.xlu0 %2481  ;;  %v2488_v33 = vpop.xlane.xlu1 %2487 }
 0x65c   : > { %v7553_v24 = vpop.eup %5772 }
 0x65d   : > { %2569 = vadd.xlane.f32.xlu0 %v7553_v24  ;;  %2567 = vadd.xlane.f32.xlu1 %v7551_v37  ;;  %v7557_v57 = vpop.eup %5774 }
 0x65e   : > { %v2514_v16 = vpop.xlane.xlu0 %2513 }
 0x65f   : > { %5776 = vrcp.f32 %v2514_v16 }
 0x660   : > { %5778 = vrcp.f32 %v2488_v33 }
 0x661   : > { %2563 = vadd.xlane.f32.xlu1 %v7557_v57 }
 0x662   : > { %v7560_v21 = vpop.xlane.xlu0 %2519  ;;  %v2516_v32 = vpop.xlane.xlu1 %2515 }
 0x663   : > { %5780 = vrcp.f32 %v2516_v32 }
 0x664   : > { %5782 = vrcp.f32 %v2482_v38 }
 0x665   : > { %5784 = vrcp.f32 %v2486_v27 }
 0x666   : > { %v2484_v5 = vpop.xlane.xlu0 %2483  ;;  %v2494_v13 = vpop.xlane.xlu1 %2493 }
 0x667   : > { %5786 = vrcp.f32 %v2484_v5 }
 0x66a   : > { %v2526_v2 = vpop.xlane.xlu1 %2525  ;;  %v2496_v16 = vpop.xlane.xlu0 %2495 }
 0x66b   : > { %5788 = vrcp.f32 %v2526_v2 }
 0x66c   : > { %v5777_v17 = vpop.eup %5776  ;;  %5790 = vrcp.f32 %v2496_v16 }
 0x66d   : > { %v5779_v25 = vpop.eup %5778  ;;  %v2673_v54 = vmul.f32 %v5777_v17, %v7360_v61 }
 0x66e   : > { %v2490_v9 = vpop.xlane.xlu1 %2489  ;;  %v2660_v38 = vmul.f32 %v5779_v25, %v7352_v8  ;;  %v8505_v8 = vld [vmem:[#allocation21_spill] sm:$0xff] }
 0x670   : > { %v5781_v34 = vpop.eup %5780 }
 0x671   : > { %v5783_v31 = vpop.eup %5782  ;;  %v2674_v63 = vmul.f32 %v5781_v34, %v7367_v20 }
 0x672   : > { %3102 = vrot.lane.b32.xlu1 %v8503_v11, %s6060_s3  ;;  %v5785_v29 = vpop.eup %5784  ;;  %v7568_v10 = vpop.xlane.xlu1 %2521  ;;  %v2657_v33 = vmul.f32 %v5783_v31, %v7354_v41  ;;  %v8508_v11 = vld [vmem:[#allocation42_spill] sm:$0xff] }
 0x673   : > { %2979 = vrot.lane.b32.xlu0 %v8504_v7, %s6060_s3  ;;  %v2721_v27 = vpack.c.bf16 %v2674_v63, %v2673_v54  ;;  %v2659_v61 = vmul.f32 %v5785_v29, %v7341_v47  ;;  %v7574_v34 = vpop.xlane.xlu0 %2523  ;;  %v8507_v47 = vld [vmem:[#allocation30_spill] sm:$0xff]  ;;  %v2320_v54 = vsub.f32 %v8508_v11, %v7532_v45  ;;  %v8512_v11 = vld [vmem:[#allocation29_spill] sm:$0xff] }
 0x674   : > { %v5787_v53 = vpop.eup %5786 }
 0x675   : > { %v2658_v32 = vmul.f32 %v5787_v53, %v7372_v6  ;;  %5192 = vmatprep.mubr.bf16.mxu1 %v2721_v27  ;;  %v2714_v17 = vpack.c.bf16 %v2660_v38, %v2659_v61  ;;  %v8506_v6 = vld [vmem:[#allocation44_spill] sm:$0xff]  ;;  %v2447_v53 = vmul.f32 1.442695, %v2320_v54 }
 0x676   : > { %v2318_v25 = vsub.f32 %v8506_v6, %v7540_v14  ;;  %v8510_v14 = vld [vmem:[#allocation23_spill] sm:$0xff] }
 0x677   : > { %v2528_v20 = vpop.xlane.xlu1 %2527  ;;  %v2713_v5 = vpack.c.bf16 %v2658_v32, %v2657_v33  ;;  %v2534_v2 = vpop.xlane.xlu0 %2533 }
 0x678   : > { %5792 = vrcp.f32 %v2528_v20  ;;  %v2443_v63 = vmul.f32 1.442695, %v2318_v25  ;;  %v5789_v7 = vpop.eup %5788 }
 0x679   : > { %5160 = vmatprep.mubr.bf16.mxu0 %v2713_v5  ;;  %5794 = vrcp.f32 %v2490_v9  ;;  %v8509_v9 = vld [vmem:[#allocation27_spill] sm:$0xff]  ;;  %v5791_v27 = vpop.eup %5790  ;;  %v7588_v32 = vmul.f32 %v5789_v7, %v7382_v48  ;;  %v8511_v5 = vld [vmem:[#allocation28_spill] sm:$0xff] }
 0x67a   : > { %5161 = vmatmul.mubr.bf16.vlgmr.msra.gmra.mxu0 %v2714_v17  ;;  %5796 = vrcp.f32 %v2494_v13 }
 0x67b   : > { %5209 = vmatpush3.bf16.msra.mxu0 %v8505_v8  ;;  %v2492_v41 = vpop.xlane.xlu1 %2491  ;;  %v2664_v8 = vmul.f32 %v5791_v27, %v7379_v22 }
 0x67c   : > { %5798 = vrcp.f32 %v2492_v41  ;;  %5210 = vmatprep.subr.bf16.mxu0 %v8507_v47 }
 0x67d   : > { %5800 = vpow2.f32 %v2443_v63 }
 0x67f   : > { %5211 = vmatpush3.bf16.msra.mxu0 %v8507_v47  ;;  %v2502_v31 = vpop.xlane.xlu1 %2501 }
 0x680   : > { %5212 = vmatprep.subr.bf16.mxu0 %v8509_v9 }
 0x682   : > { %v2532_v13 = vpop.xlane.xlu0 %2531 }
 0x683   : > { %5213 = vmatpush3.bf16.msra.mxu0 %v8509_v9  ;;  %v2498_v29 = vpop.xlane.xlu1 %2497  ;;  %5802 = vrcp.f32 %v2532_v13 }
 0x684   : > { %5214 = vmatprep.subr.bf16.mxu0 %v8510_v14  ;;  %5804 = vpow2.f32 %v2447_v53 }
 0x685   : > { %v5793_v38 = vpop.eup %5792 }
 0x686   : > { %v5795_v16 = vpop.eup %5794  ;;  %v2510_v33 = vpop.xlane.xlu0 %2509  ;;  %v7591_v61 = vmul.f32 %v5793_v38, %v7404_v18 }
 0x687   : > { %5215 = vmatpush3.bf16.msra.mxu0 %v8510_v14  ;;  %v2530_v45 = vpop.xlane.xlu1 %2529  ;;  %v5797_v20 = vpop.eup %5796  ;;  %v2661_v6 = vmul.f32 %v5795_v16, %v7387_v43 }
 0x688   : > { %5216 = vmatprep.subr.bf16.mxu0 %v8511_v5  ;;  %5806 = vrcp.f32 %v2530_v45  ;;  %v2724_v41 = vpack.c.bf16 %v7591_v61, %v7588_v32  ;;  %v2663_v47 = vmul.f32 %v5797_v20, %v7375_v51 }
 0x689   : > { %v5799_v17 = vpop.eup %5798  ;;  %5808 = vrcp.f32 %v2534_v2 }
 0x68a   : > { %v2662_v25 = vmul.f32 %v5799_v17, %v7412_v36  ;;  %v2506_v48 = vpop.xlane.xlu0 %2505  ;;  %v2716_v63 = vpack.c.bf16 %v2664_v8, %v2663_v47  ;;  %5810 = vrcp.f32 %v2502_v31  ;;  %v7603_v43 = vpop.eup %5800 }
 0x68b   : > { %5217 = vmatpush3.bf16.msra.mxu0 %v8511_v5  ;;  %v2504_v18 = vpop.xlane.xlu1 %2503  ;;  %5812 = vrcp.f32 %v2498_v29 }
 0x68c   : > { %5218 = vmatprep.subr.bf16.mxu0 %v8512_v11  ;;  %v2715_v54 = vpack.c.bf16 %v2662_v25, %v2661_v6 }
 0x68e   : > { %5164 = vmatprep.mubr.bf16.mxu0 %v2715_v54  ;;  %v2508_v9 = vpop.xlane.xlu0 %2507 }
 0x68f   : > { %5165 = vmatmul.mubr.bf16.gmra.mxu0 %v2716_v63  ;;  %v2536_v22 = vpop.xlane.xlu1 %2535 }
 0x690   : > { %5219 = vmatpush3.bf16.msra.mxu0 %v8512_v11  ;;  %5814 = vrcp.f32 %v2536_v22  ;;  %v5803_v36 = vpop.eup %5802  ;;  %v8513_v22 = vld [vmem:[#allocation20_spill] sm:$0xff] }
 0x691   : > { %5816 = vrcp.f32 %v2504_v18  ;;  %v7606_v13 = vpop.eup %5804  ;;  %v7615_v7 = vmul.f32 %v5803_v36, %v7425_v44 }
 0x692   : > { %2571 = vadd.xlane.f32.xlu0 %v7603_v43  ;;  %5818 = vrcp.f32 %v2508_v9 }
 0x693   : > { %v2500_v51 = vpop.xlane.xlu1 %2499  ;;  %5820 = vrcp.f32 %v2506_v48 }
 0x694   : > { %5822 = vrcp.f32 %v2500_v51 }
 0x695   : > { %v5807_v2 = vpop.eup %5806  ;;  %5824 = vrcp.f32 %v2510_v33 }
 0x696   : > { %2575 = vadd.xlane.f32.xlu1 %v7606_v13  ;;  %v7612_v29 = vmul.f32 %v5807_v2, %v7429_v42  ;;  %v5809_v14 = vpop.eup %5808 }
 0x697   : > { %v7609_v31 = vpop.xlane.xlu1 %2537  ;;  %v5811_v38 = vpop.eup %5810  ;;  %v7620_v5 = vmul.f32 %v5809_v14, %v7401_v59 }
 0x698   : > { %v2725_v53 = vpack.c.bf16 %v7615_v7, %v7612_v29  ;;  %v5813_v16 = vpop.eup %5812  ;;  %v2667_v59 = vmul.f32 %v5811_v38, %v7417_v23  ;;  %v2540_v23 = vpop.xlane.xlu0 %2539 }
 0x699   : > { %v2665_v25 = vmul.f32 %v5813_v16, %v7422_v12 }
 0x69b   : > { %v2512_v27 = vpop.xlane.xlu1 %2511 }
 0x69c   : > { %5826 = vrcp.f32 %v2512_v27 }
 0x69d   : > { %v5815_v45 = vpop.eup %5814 }
 0x69e   : > { %v5817_v20 = vpop.eup %5816  ;;  %v7623_v42 = vmul.f32 %v5815_v45, %v7441_v35 }
 0x69f   : > { %v5819_v17 = vpop.eup %5818  ;;  %v2668_v33 = vmul.f32 %v5817_v20, %v7437_v60 }
 0x6a0   : > { %v5821_v44 = vpop.eup %5820  ;;  %v2726_v8 = vpack.c.bf16 %v7623_v42, %v7620_v5  ;;  %v2670_v18 = vmul.f32 %v5819_v17, %v7443_v40 }
 0x6a1   : > { %v5823_v6 = vpop.eup %5822  ;;  %v2669_v35 = vmul.f32 %v5821_v44, %v7435_v52  ;;  %v2718_v11 = vpack.c.bf16 %v2668_v33, %v2667_v59 }
 0x6a2   : > { %v2666_v48 = vmul.f32 %v5823_v6, %v7449_v3  ;;  %v5825_v54 = vpop.eup %5824 }
 0x6a3   : > { %v2719_v63 = vpack.c.bf16 %v2670_v18, %v2669_v35  ;;  %v2671_v12 = vmul.f32 %v5825_v54, %v7431_v15 }
 0x6a4   : > { %v2717_v47 = vpack.c.bf16 %v2666_v48, %v2665_v25 }
 0x6a6   : > { %5168 = vmatprep.mubr.bf16.mxu0 %v2717_v47 }
 0x6a7   : > { %5169 = vmatmul.mubr.bf16.gmra.mxu0 %v2718_v11 }
 0x6a8   : > { %3100 = vrot.lane.b32.xlu0 %v8513_v22, %s6060_s3  ;;  %5172 = vmatprep.mubr.bf16.mxu0 %v2719_v63  ;;  %v8514_v22 = vld [vmem:[#allocation46_spill] sm:$0xff] }
 0x6a9   : > { %v5827_v60 = vpop.eup %5826 }
 0x6aa   : > { %v2672_v3 = vmul.f32 %v5827_v60, %v7453_v28 }
 0x6ac   : > { %v2720_v40 = vpack.c.bf16 %v2672_v3, %v2671_v12  ;;  %v8515_v3 = vld [vmem:[#allocation47_spill] sm:$0xff] }
 0x6af   : > { %5173 = vmatmul.mubr.bf16.gmra.mxu0 %v2720_v40 }
 0x6be   : > { %v2550_v9 = vpop.xlane.xlu0 %2549 }
 0x6bf   : > { %5828 = vrcp.f32 %v2550_v9  ;;  %v8516_v9 = vld [vmem:[#allocation48_spill] sm:$0xff] }
 0x6c6   : > { %v2546_v51 = vpop.xlane.xlu0 %2545 }
 0x6ca   : > { %v2552_v52 = vpop.xlane.xlu0 %2551 }
 0x6cb   : > { %5830 = vrcp.f32 %v2552_v52 }
 0x6cc   : > { %5832 = vrcp.f32 %v2546_v51  ;;  %v5829_v27 = vpop.eup %5828  ;;  %v8517_v51 = vld [vmem:[#allocation45_spill] sm:$0xff] }
 0x6cd   : > { %v7642_v16 = vmul.f32 %v5829_v27, %v7489_v1  ;;  %v8518_v27 = vld [vmem:[#allocation50_spill] sm:$0xff] }
 0x6ce   : > { %v2548_v36 = vpop.xlane.xlu0 %2547 }
 0x6cf   : > { %5834 = vrcp.f32 %v2548_v36 }
 0x6d2   : > { %v2560_v2 = vpop.xlane.xlu0 %2559  ;;  %v2558_v14 = vpop.xlane.xlu1 %2557 }
 0x6d3   : > { %5836 = vrcp.f32 %v2560_v2 }
 0x6d4   : > { %5838 = vrcp.f32 %v2558_v14 }
 0x6d5   : > { %5840 = vrcp.f32 %v7560_v21 }
 0x6d6   : > { %v7637_v38 = vpop.xlane.xlu1 %2553  ;;  %v2542_v28 = vpop.xlane.xlu0 %2541  ;;  %5842 = vrcp.f32 %v7574_v34 }
 0x6d7   : > { %5844 = vrcp.f32 %v7568_v10 }
 0x6d8   : > { %v5831_v15 = vpop.eup %5830  ;;  %5846 = vrcp.f32 %v7547_v46 }
 0x6d9   : > { %v7645_v45 = vmul.f32 %v5831_v15, %v7503_v49  ;;  %v5833_v20 = vpop.eup %5832  ;;  %5848 = vrcp.f32 %v7609_v31 }
 0x6da   : > { %v2556_v17 = vpop.xlane.xlu1 %2555  ;;  %v2689_v21 = vmul.f32 %v5833_v20, %v7499_v19  ;;  %v2544_v33 = vpop.xlane.xlu0 %2543  ;;  %5850 = vrcp.f32 %v2540_v23  ;;  %v8519_v20 = vld [vmem:[#allocation49_spill] sm:$0xff] }
 0x6db   : > { %v2730_v44 = vpack.c.bf16 %v7645_v45, %v7642_v16  ;;  %5852 = vrcp.f32 %v2544_v33 }
 0x6dc   : > { %v5835_v6 = vpop.eup %5834  ;;  %5854 = vrcp.f32 %v2542_v28 }
 0x6dd   : > { %v2690_v34 = vmul.f32 %v5835_v6, %v7511_v58  ;;  %5856 = vrcp.f32 %v2556_v17 }
 0x6de   : > { %v2566_v1 = vpop.xlane.xlu1 %2565  ;;  %5858 = vrcp.f32 %v7637_v38 }
 0x6df   : > { %v2729_v25 = vpack.c.bf16 %v2690_v34, %v2689_v21 }
 0x6e0   : > { %v5837_v48 = vpop.eup %5836 }
 0x6e1   : > { %v5839_v49 = vpop.eup %5838  ;;  %5224 = vmatprep.mubr.bf16.mxu0 %v2729_v25  ;;  %v7654_v18 = vmul.f32 %v5837_v48, %v7515_v30 }
 0x6e2   : > { %v7656_v10 = vpop.xlane.xlu0 %2573  ;;  %v2562_v46 = vpop.xlane.xlu1 %2561  ;;  %v7659_v59 = vmul.f32 %v5839_v49, %v7518_v62 }
 0x6e3   : > { %v5841_v47 = vpop.eup %5840 }
 0x6e4   : > { %v2732_v19 = vpack.c.bf16 %v7654_v18, %v7659_v59  ;;  %v5843_v58 = vpop.eup %5842  ;;  %v2676_v60 = vmul.f32 %v5841_v47, %v8514_v22 }
 0x6e5   : > { %v5845_v54 = vpop.eup %5844  ;;  %v2678_v62 = vmul.f32 %v5843_v58, %v8516_v9 }
 0x6e6   : > { %v2570_v35 = vpop.xlane.xlu0 %2569  ;;  %v2568_v11 = vpop.xlane.xlu1 %2567  ;;  %v2677_v40 = vmul.f32 %v5845_v54, %v8515_v3 }
 0x6e7   : > { %v5847_v63 = vpop.eup %5846 }
 0x6e8   : > { %v2675_v52 = vmul.f32 %v5847_v63, %v8517_v51  ;;  %v2723_v14 = vpack.c.bf16 %v2678_v62, %v2677_v40  ;;  %v5849_v31 = vpop.eup %5848 }
 0x6e9   : > { %v5851_v23 = vpop.eup %5850  ;;  %v2685_v15 = vmul.f32 %v5849_v31, %v8518_v27 }
 0x6ea   : > { %v2980_v30 = vpop.permute.xlu0 %2979  ;;  %v2564_v12 = vpop.xlane.xlu1 %2563  ;;  %v2722_v36 = vpack.c.bf16 %v2676_v60, %v2675_v52  ;;  %v2686_v6 = vmul.f32 %v5851_v23, %v8519_v20 }
 0x6eb   : > { %5190 = vmatprep.subr.bf16.mxu1 %v2980_v30  ;;  %v5853_v21 = vpop.eup %5852  ;;  %5860 = vrcp.f32 %v2564_v12 }
 0x6ec   : > { %5191 = vmatpush3.bf16.msra.mxu1 %v2980_v30  ;;  %v2727_v34 = vpack.c.bf16 %v2686_v6, %v2685_v15  ;;  %v5855_v28 = vpop.eup %5854  ;;  %v2688_v32 = vmul.f32 %v5853_v21, %v7530_v55  ;;  %5862 = vrcp.f32 %v2562_v46 }
 0x6ed   : > { %v2687_v61 = vmul.f32 %v5855_v28, %v7522_v26  ;;  %v5857_v7 = vpop.eup %5856  ;;  %5864 = vrcp.f32 %v2568_v11 }
 0x6ee   : > { %v3103_v2 = vpop.permute.xlu1 %3102  ;;  %v2694_v42 = vmul.f32 %v5857_v7, %v7534_v0 }
 0x6ef   : > { %5193 = vmatmul.mubr.bf16.vlgmr.msra.gmra.mxu1 %v2722_v36  ;;  %5220 = vmatprep.subr.bf16.mxu0 %v3103_v2 }
 0x6f0   : > { %5196 = vmatprep.mubr.bf16.mxu1 %v2723_v14  ;;  %5221 = vmatpush3.bf16.msra.mxu0 %v3103_v2 }
 0x6f7   : > { %5197 = vmatmul.mubr.bf16.gmra.mxu1 %v2724_v41  ;;  %v2728_v41 = vpack.c.bf16 %v2688_v32, %v2687_v61 }
 0x6f8   : > { %5200 = vmatprep.mubr.bf16.mxu1 %v2725_v53  ;;  %v5859_v53 = vpop.eup %5858 }
 0x6f9   : > { %v2693_v26 = vmul.f32 %v5859_v53, %v7526_v4  ;;  %v5861_v17 = vpop.eup %5860 }
 0x6fa   : > { %v5863_v38 = vpop.eup %5862  ;;  %v2698_v33 = vmul.f32 %v5861_v17, %v7557_v57 }
 0x6fb   : > { %v2697_v0 = vmul.f32 %v5863_v38, %v7543_v56 }
 0x6fd   : > { %v2733_v25 = vpack.c.bf16 %v2698_v33, %v2697_v0 }
 0x6ff   : > { %5201 = vmatmul.mubr.bf16.gmra.mxu1 %v2726_v8  ;;  %v2731_v8 = vpack.c.bf16 %v2694_v42, %v2693_v26  ;;  %v5576_v26 = vld [vmem:[%s6268_s24 + $0x8] sm:$0xff]  }
 0x700   : > { %5204 = vmatprep.mubr.bf16.mxu1 %v2727_v34  ;;  %5240 = vmatprep.subr.bf16.mxu1 %v5576_v26 }
 0x701   : > { %5241 = vmatpush3.bf16.msra.mxu1 %v5576_v26 }
 0x707   : > { %5205 = vmatmul.mubr.bf16.gmra.mxu1 %v2728_v41 }
 0x71b   : > { %v2572_v29 = vpop.xlane.xlu0 %2571 }
 0x71c   : > { %5866 = vrcp.f32 %v2572_v29 }
 0x71d   : > { %5868 = vrcp.f32 %v2566_v1  ;;  %v5865_v1 = vpop.eup %5864 }
 0x71e   : > { %5870 = vrcp.f32 %v2570_v35  ;;  %v2700_v45 = vmul.f32 %v5865_v1, %v7551_v37 }
 0x71f   : > { %v3101_v5 = vpop.permute.xlu0 %3100  ;;  %v2576_v55 = vpop.xlane.xlu1 %2575 }
 0x720   : > { %5222 = vmatprep.subr.bf16.mxu0 %v3101_v5  ;;  %5872 = vrcp.f32 %v2576_v55  ;;  %v5577_v55 = vld [vmem:[%s6268_s24] sm:$0xff]   ;;  %s6063_s24 = smov 24  }
 0x721   : > { %5223 = vmatpush3.bf16.msra.mxu0 %v3101_v5  ;;  %5874 = vrcp.f32 %v7656_v10  ;;  %5242 = vmatprep.subr.bf16.mxu1 %v5577_v55 }
 0x722   : > { %5243 = vmatpush3.bf16.msra.mxu1 %v5577_v55 }
 0x724   : > { %5225 = vmatmul.mubr.bf16.vlgmr.msra.gmra.mxu0 %v2730_v44 }
 0x725   : > { %5228 = vmatprep.mubr.bf16.mxu0 %v2731_v8 }
 0x729   : > { %v5867_v48 = vpop.eup %5866 }
 0x72a   : > { %v5869_v4 = vpop.eup %5868  ;;  %v2702_v44 = vmul.f32 %v5867_v48, %v7603_v43 }
 0x72b   : > { %v5871_v16 = vpop.eup %5870  ;;  %v2699_v57 = vmul.f32 %v5869_v4, %v7538_v39  ;;  %v7700_v39 = vpop.f32.mrf.mxu1 }
 0x72c   : > { %5229 = vmatmul.mubr.bf16.gmra.mxu0 %v2732_v19  ;;  %v2701_v49 = vmul.f32 %v5871_v16, %v7553_v24 }
 0x72d   : > { %5232 = vmatprep.mubr.bf16.mxu0 %v2733_v25  ;;  %v2734_v10 = vpack.c.bf16 %v2700_v45, %v2699_v57  ;;  %v5873_v56 = vpop.eup %5872  ;;  %v7702_v24 = vpop.f32.mrf.mxu1 }
 0x72e   : > { %v2735_v46 = vpack.c.bf16 %v2702_v44, %v2701_v49  ;;  %v5875_v47 = vpop.eup %5874  ;;  %v2704_v18 = vmul.f32 %v5873_v56, %v7606_v13 }
 0x72f   : > { %v2703_v59 = vmul.f32 %v5875_v47, %v7545_v50  ;;  %v7704_v11 = vpop.f32.mrf.mxu1 }
 0x731   : > { %v2736_v58 = vpack.c.bf16 %v2704_v18, %v2703_v59  ;;  %v7706_v54 = vpop.f32.mrf.mxu1 }
 0x733   : > { %v7708_v13 = vpop.f32.mrf.mxu1 }
 0x734   : > { %5233 = vmatmul.mubr.bf16.gmra.mxu0 %v2734_v10 }
 0x735   : > { %5236 = vmatprep.mubr.bf16.mxu0 %v2735_v46  ;;  %v7710_v50 = vpop.f32.mrf.mxu1 }
 0x737   : > { %v7712_v63 = vpop.f32.mrf.mxu1 }
 0x739   : > { %v7714_v22 = vpop.f32.mrf.mxu1 }
 0x73a   : > { %v5162_v19 = vpop.f32.mrf.mxu0 }
 0x73b   : > { %v7716_v60 = vpop.f32.mrf.mxu1 }
 0x73c   : > { %5237 = vmatmul.mubr.bf16.gmra.mxu0 %v2736_v58  ;;  %v2916_v37 = vpop.f32.mrf.mxu0 }
 0x73d   : > { %v7718_v30 = vpop.f32.mrf.mxu1 }
 0x73e   : > { %v5163_v35 = vpop.f32.mrf.mxu0 }
 0x73f   : > { %v5454_v43 = vpack.i.bf16 %v5163_v35, %v5162_v19  ;;  %v7720_v12 = vpop.f32.mrf.mxu1 }
 0x740   : > { %v2919_v62 = vpop.f32.mrf.mxu0 }
 0x741   : > { %5455 = vrot.lane.b32.xlu0 %v5454_v43, %s6061_s29  ;;  %v7722_v3 = vpop.f32.mrf.mxu1  ;;  %v5464_v32 = vpack.i.bf16 %v2919_v62, %v2916_v37 }
 0x743   : > { %v7724_v40 = vpop.f32.mrf.mxu1 }
 0x745   : > { %v7726_v9 = vpop.f32.mrf.mxu1 }
 0x747   : > { %v7728_v52 = vpop.f32.mrf.mxu1 }
 0x749   : > { %v7730_v2 = vpop.f32.mrf.mxu1 }
 0x74f   : > { %v5166_v51 = vpop.f32.mrf.mxu0 }
 0x751   : > { %v2932_v36 = vpop.f32.mrf.mxu0 }
 0x753   : > { %v5167_v14 = vpop.f32.mrf.mxu0 }
 0x754   : > { %v5474_v29 = vpack.i.bf16 %v5167_v14, %v5166_v51 }
 0x755   : > { %v2935_v27 = vpop.f32.mrf.mxu0 }
 0x756   : > { %v5484_v53 = vpack.i.bf16 %v2935_v27, %v2932_v36 }
 0x767   : > { %v5170_v6 = vpop.f32.mrf.mxu0 }
 0x769   : > { %v2948_v61 = vpop.f32.mrf.mxu0 }
 0x76b   : > { %v5171_v5 = vpop.f32.mrf.mxu0 }
 0x76c   : > { %v5494_v1 = vpack.i.bf16 %v5171_v5, %v5170_v6 }
 0x76d   : > { %v2951_v33 = vpop.f32.mrf.mxu0 }
 0x76e   : > { %v5499_v48 = vpack.i.bf16 %v2951_v33, %v2948_v61 }
 0x76f   : > { %v5174_v16 = vpop.f32.mrf.mxu0 }
 0x771   : > { %v2964_v45 = vpop.f32.mrf.mxu0 }
 0x773   : > { %v5175_v44 = vpop.f32.mrf.mxu0 }
 0x774   : > { %v5539_v14 = vpack.i.bf16 %v5175_v44, %v5174_v16 }
 0x775   : > { %v2967_v57 = vpop.f32.mrf.mxu0 }
 0x7af   : > { %v5194_v31 = vpop.f32.mrf.mxu1 }
 0x7b1   : > { %v3037_v23 = vpop.f32.mrf.mxu1 }
 0x7b3   : > { %v5195_v15 = vpop.f32.mrf.mxu1  ;;  %v5456_v55 = vpop.permute.xlu0 %5455 }
 0x7b4   : > { %v5459_v20 = vpack.i.bf16 %v5195_v15, %v5194_v31  ;;  %v5458_v44 = vunpack.i.h.bf16 %v5456_v55 }
 0x7b5   : > { %v3040_v21 = vpop.f32.mrf.mxu1 }
 0x7b6   : > { %v5469_v34 = vpack.i.bf16 %v3040_v21, %v3037_v23  ;;  %5460 = vrot.lane.b32.xlu0 %v5459_v20, %s6062_s16  ;;  %v5534_v20 = vpack.i.bf16 %v2967_v57, %v2964_v45  ;;  %v5457_v57 = vunpack.i.l.bf16 %v5456_v55 }
 0x7b7   : > { %v5198_v28 = vpop.f32.mrf.mxu1 }
 0x7b8   : > { %5470 = vrot.lane.b32.xlu1 %v5469_v34, %s6062_s16 }
 0x7b9   : > { %v3053_v41 = vpop.f32.mrf.mxu1 }
 0x7ba   : > { %5465 = vrot.lane.b32.xlu0 %v5464_v32, %s6061_s29 }
 0x7bb   : > { %v5199_v7 = vpop.f32.mrf.mxu1 }
 0x7bc   : > { %5475 = vrot.lane.b32.xlu1 %v5474_v29, %s6061_s29  ;;  %v5479_v8 = vpack.i.bf16 %v5199_v7, %v5198_v28 }
 0x7bd   : > { %v3056_v42 = vpop.f32.mrf.mxu1 }
 0x7be   : > { %5485 = vrot.lane.b32.xlu0 %v5484_v53, %s6061_s29  ;;  %v5489_v38 = vpack.i.bf16 %v3056_v42, %v3053_v41 }
 0x7bf   : > { %v5202_v17 = vpop.f32.mrf.mxu1 }
 0x7c0   : > { %5480 = vrot.lane.b32.xlu1 %v5479_v8, %s6062_s16 }
 0x7c1   : > { %v3069_v0 = vpop.f32.mrf.mxu1 }
 0x7c2   : > { %5490 = vrot.lane.b32.xlu0 %v5489_v38, %s6062_s16 }
 0x7c3   : > { %v5203_v25 = vpop.f32.mrf.mxu1 }
 0x7c4   : > { %5495 = vrot.lane.b32.xlu1 %v5494_v1, %s6061_s29  ;;  %v5519_v4 = vpack.i.bf16 %v5203_v25, %v5202_v17 }
 0x7c5   : > { %v3072_v19 = vpop.f32.mrf.mxu1 }
 0x7c6   : > { %5500 = vrot.lane.b32.xlu0 %v5499_v48, %s6061_s29  ;;  %v5514_v35 = vpack.i.bf16 %v3072_v19, %v3069_v0  ;;  %v3416_v19 = vsel %vm1431_vm5, %v7704_v11, %v5458_v44 }
 0x7c7   : > { %v5206_v62 = vpop.f32.mrf.mxu1 }
 0x7c8   : > { %5520 = vrot.lane.b32.xlu1 %v5519_v4, %s6062_s16 }
 0x7c9   : > { %v3085_v23 = vpop.f32.mrf.mxu1 }
 0x7cb   : > { %v5207_v21 = vpop.f32.mrf.mxu1 }
 0x7cc   : > { %v5559_v32 = vpack.i.bf16 %v5207_v21, %v5206_v62 }
 0x7cd   : > { %v3088_v41 = vpop.f32.mrf.mxu1 }
 0x7ce   : > { %v5554_v53 = vpack.i.bf16 %v3088_v41, %v3085_v23 }
 0x7e4   : > { %v5226_v49 = vpop.f32.mrf.mxu0 }
 0x7e6   : > { %v3158_v10 = vpop.f32.mrf.mxu0 }
 0x7e8   : > { %v5227_v56 = vpop.f32.mrf.mxu0 }
 0x7e9   : > { %v5504_v46 = vpack.i.bf16 %v5227_v56, %v5226_v49 }
 0x7ea   : > { %v3161_v47 = vpop.f32.mrf.mxu0 }
 0x7eb   : > { %5505 = vrot.lane.b32.xlu0 %v5504_v46, %s6063_s24  ;;  %v5509_v59 = vpack.i.bf16 %v3161_v47, %v3158_v10 }
 0x7ec   : > { %v5230_v18 = vpop.f32.mrf.mxu0 }
 0x7ee   : > { %v3174_v58 = vpop.f32.mrf.mxu0 }
 0x7ef   : > { %5510 = vrot.lane.b32.xlu0 %v5509_v59, %s6063_s24 }
 0x7f0   : > { %v5231_v37 = vpop.f32.mrf.mxu0 }
 0x7f1   : > { %v5524_v43 = vpack.i.bf16 %v5231_v37, %v5230_v18 }
 0x7f2   : > { %v3177_v51 = vpop.f32.mrf.mxu0 }
 0x7f3   : > { %5515 = vrot.lane.b32.xlu0 %v5514_v35, %s6062_s16  ;;  %5525 = vrot.lane.b32.xlu1 %v5524_v43, %s6063_s24  ;;  %v5529_v31 = vpack.i.bf16 %v3177_v51, %v3174_v58  ;;  %v3415_v58 = vsel %vm1431_vm5, %v7700_v39, %v5457_v57 }
 0x7f4   : > { %v5234_v36 = vpop.f32.mrf.mxu0 }
 0x7f6   : > { %v3190_v27 = vpop.f32.mrf.mxu0 }
 0x7f7   : > { %5540 = vrot.lane.b32.xlu1 %v5539_v14, %s6061_s29  ;;  %5530 = vrot.lane.b32.xlu0 %v5529_v31, %s6063_s24 }
 0x7f8   : > { %v5235_v15 = vpop.f32.mrf.mxu0 }
 0x7f9   : > { %v5544_v6 = vpack.i.bf16 %v5235_v15, %v5234_v36 }
 0x7fa   : > { %v3193_v34 = vpop.f32.mrf.mxu0 }
 0x7fb   : > { %5535 = vrot.lane.b32.xlu0 %v5534_v20, %s6061_s29  ;;  %5545 = vrot.lane.b32.xlu1 %v5544_v6, %s6063_s24  ;;  %v5549_v61 = vpack.i.bf16 %v3193_v34, %v3190_v27 }
 0x7fc   : > { %v5238_v28 = vpop.f32.mrf.mxu0 }
 0x7fe   : > { %v3206_v29 = vpop.f32.mrf.mxu0 }
 0x7ff   : > { %5560 = vrot.lane.b32.xlu1 %v5559_v32, %s6062_s16  ;;  %5550 = vrot.lane.b32.xlu0 %v5549_v61, %s6063_s24 }
 0x800   : > { %v5239_v7 = vpop.f32.mrf.mxu0 }
 0x801   : > { %v5569_v5 = vpack.i.bf16 %v5239_v7, %v5238_v28 }
 0x802   : > { %v3209_v42 = vpop.f32.mrf.mxu0 }
 0x803   : > { %5555 = vrot.lane.b32.xlu0 %v5554_v53, %s6062_s16  ;;  %5570 = vrot.lane.b32.xlu1 %v5569_v5, %s6063_s24  ;;  %v5564_v26 = vpack.i.bf16 %v3209_v42, %v3206_v29  ;;  %s8524_s16 = sld [smem:[#allocation60_spill]] (!%p4761_p1) }
 0x807   : > { %5565 = vrot.lane.b32.xlu0 %v5564_v26, %s6063_s24 }
 0x828   : > { %v5461_v8 = vpop.permute.xlu0 %5460 }
 0x829   : > { %v5463_v10 = vunpack.i.h.bf16 %v5461_v8  ;;  %v5462_v56 = vunpack.i.l.bf16 %v5461_v8 }
 0x82a   : > { %v5471_v38 = vpop.permute.xlu1 %5470 }
 0x82b   : > { %v5473_v37 = vunpack.i.h.bf16 %v5471_v38  ;;  %v5472_v35 = vunpack.i.l.bf16 %v5471_v38  ;;  %v3433_v51 = vsel %vm3429_vm7, %v3416_v19, %v5463_v10  ;;  %v3432_v36 = vsel %vm3429_vm7, %v3415_v58, %v5462_v56 }
 0x82c   : > { %v5466_v17 = vpop.permute.xlu0 %5465 }
 0x82d   : > { %v5468_v16 = vunpack.i.h.bf16 %v5466_v17  ;;  %v5467_v45 = vunpack.i.l.bf16 %v5466_v17 }
 0x82e   : > { %v5476_v0 = vpop.permute.xlu1 %5475 }
 0x82f   : > { %v3414_v18 = vsel %vm1431_vm5, %v7706_v54, %v5468_v16  ;;  %v3413_v59 = vsel %vm1431_vm5, %v7702_v24, %v5467_v45  ;;  %v5478_v39 = vunpack.i.h.bf16 %v5476_v0  ;;  %v5477_v20 = vunpack.i.l.bf16 %v5476_v0 }
 0x830   : > { %v5486_v33 = vpop.permute.xlu0 %5485  ;;  %v3430_v11 = vsel %vm3429_vm7, %v3413_v59, %v5472_v35  ;;  %v3431_v23 = vsel %vm3429_vm7, %v3414_v18, %v5473_v37 }
 0x831   : > { %v5488_v6 = vunpack.i.h.bf16 %v5486_v33  ;;  %v5487_v21 = vunpack.i.l.bf16 %v5486_v33  ;;  %v3420_v26 = vsel %vm1431_vm5, %v7712_v63, %v5478_v39  ;;  %v3419_v55 = vsel %vm1431_vm5, %v7708_v13, %v5477_v20 }
 0x832   : > { %v5481_v25 = vpop.permute.xlu1 %5480 }
 0x833   : > { %v5483_v61 = vunpack.i.h.bf16 %v5481_v25  ;;  %v5482_v41 = vunpack.i.l.bf16 %v5481_v25  ;;  %v3418_v8 = vsel %vm1431_vm5, %v7714_v22, %v5488_v6  ;;  %v3417_v17 = vsel %vm1431_vm5, %v7710_v50, %v5487_v21 }
 0x834   : > { %v5491_v1 = vpop.permute.xlu0 %5490 }
 0x835   : > { %v5493_v7 = vunpack.i.h.bf16 %v5491_v1  ;;  %v5492_v53 = vunpack.i.l.bf16 %v5491_v1  ;;  %v3436_v0 = vsel %vm3429_vm7, %v3419_v55, %v5482_v41  ;;  %v3437_v1 = vsel %vm3429_vm7, %v3420_v26, %v5483_v61 }
 0x836   : > { %v7759_v4 = vpop.permute.xlu1 %5495 }
 0x837   : > { %v3434_v45 = vsel %vm3429_vm7, %v3417_v17, %v5492_v53  ;;  %v3435_v63 = vsel %vm3429_vm7, %v3418_v8, %v5493_v7  ;;  %v5498_v22 = vunpack.i.h.bf16 %v7759_v4 }
 0x838   : > { %v7757_v48 = vpop.permute.xlu0 %5500 }
 0x839   : > { %v5503_v10 = vunpack.i.h.bf16 %v7757_v48  ;;  %v5502_v56 = vunpack.i.l.bf16 %v7757_v48 }
 0x83a   : > { %v7769_v43 = vpop.permute.xlu1 %5520 }
 0x83b   : > { %v5523_v59 = vunpack.i.h.bf16 %v7769_v43  ;;  %v5522_v19 = vunpack.i.l.bf16 %v7769_v43  ;;  %v3421_v43 = vsel %vm1431_vm5, %v7718_v30, %v5502_v56  ;;  %v5940_v56 = vld [vmem:[#allocation2] sm:$0xff] }
 0x85d   : > { %v5506_v49 = vpop.permute.xlu0 %5505 }
 0x85e   : > { %v5508_v46 = vunpack.i.h.bf16 %v5506_v49  ;;  %v5507_v47 = vunpack.i.l.bf16 %v5506_v49  ;;  %v5497_v49 = vunpack.i.l.bf16 %v7759_v4  ;;  %v3424_v4 = vsel %vm1431_vm5, %v7720_v12, %v5498_v22  ;;  %v7846_v22 = vld [vmem:[%s8520_s4] ss:$0 sm:$0xff] }
 0x860   : > { %v3450_v24 = vsel %vm3446_vm8, %v3433_v51, %v5508_v46  ;;  %v3449_v31 = vsel %vm3446_vm8, %v3432_v36, %v5507_v47  ;;  %v3423_v48 = vsel %vm1431_vm5, %v7716_v60, %v5497_v49  ;;  %v3422_v36 = vsel %vm1431_vm5, %v7722_v3, %v5503_v10 }
 0x861   : > { %v5511_v62 = vpop.permute.xlu0 %5510  ;;  %v3464_v29 = vpack.c.bf16 %v3450_v24, %v3449_v31  ;;  %v3440_v24 = vsel %vm3429_vm7, %v3423_v48, %v5522_v19  ;;  %v3441_v31 = vsel %vm3429_vm7, %v3424_v4, %v5523_v59  ;;  %v5943_v48 = vld [vmem:[#allocation2 + $0x18] sm:$0xff] }
 0x862   : > { %v5513_v54 = vunpack.i.h.bf16 %v5511_v62  ;;  %v5512_v14 = vunpack.i.l.bf16 %v5511_v62 }
 0x864   : > { %v3447_v27 = vsel %vm3446_vm8, %v3430_v11, %v5512_v14  ;;  %v3448_v15 = vsel %vm3446_vm8, %v3431_v23, %v5513_v54 }
 0x865   : > { %v3463_v34 = vpack.c.bf16 %v3448_v15, %v3447_v27  ;;  %v5516_v28 = vpop.permute.xlu0 %5515  ;;  %v5526_v32 = vpop.permute.xlu1 %5525 }
 0x866   : > { %v5528_v5 = vunpack.i.h.bf16 %v5526_v32  ;;  %v5527_v42 = vunpack.i.l.bf16 %v5526_v32  ;;  %v5518_v37 = vunpack.i.h.bf16 %v5516_v28  ;;  %v5517_v35 = vunpack.i.l.bf16 %v5516_v28 }
 0x867   : > { %5244 = vmatprep.mubr.msk.bf16.mxu1 %vm952_vm4, %v3463_v34 }
 0x868   : > { %5245 = vmatmul.mubr.msk.bf16.vlgmr.msra.gmra.mxu1 %vm952_vm4, %v3464_v29  ;;  %v3453_v13 = vsel %vm3446_vm8, %v3436_v0, %v5527_v42  ;;  %v3454_v44 = vsel %vm3446_vm8, %v3437_v1, %v5528_v5  ;;  %v3439_v39 = vsel %vm3429_vm7, %v3422_v36, %v5518_v37  ;;  %v3438_v12 = vsel %vm3429_vm7, %v3421_v43, %v5517_v35 }
 0x869   : > { %v5531_v38 = vpop.permute.xlu0 %5530  ;;  %v5541_v33 = vpop.permute.xlu1 %5540  ;;  %v3466_v58 = vpack.c.bf16 %v3454_v44, %v3453_v13 }
 0x86a   : > { %v5533_v25 = vunpack.i.h.bf16 %v5531_v38  ;;  %v5532_v16 = vunpack.i.l.bf16 %v5531_v38  ;;  %v5543_v3 = vunpack.i.h.bf16 %v5541_v33  ;;  %v5542_v20 = vunpack.i.l.bf16 %v5541_v33 }
 0x86c   : > { %v3452_v50 = vsel %vm3446_vm8, %v3435_v63, %v5533_v25  ;;  %v3451_v57 = vsel %vm3446_vm8, %v3434_v45, %v5532_v16  ;;  %v3428_v26 = vsel %vm1431_vm5, %v7728_v52, %v5543_v3  ;;  %v3427_v55 = vsel %vm1431_vm5, %v7724_v40, %v5542_v20  ;;  %v5946_v20 = vld [vmem:[#allocation2 + $0x30] sm:$0xff] }
 0x86d   : > { %v3465_v46 = vpack.c.bf16 %v3452_v50, %v3451_v57  ;;  %v5536_v47 = vpop.permute.xlu0 %5535  ;;  %v5546_v18 = vpop.permute.xlu1 %5545 }
 0x86e   : > { %v5548_v62 = vunpack.i.h.bf16 %v5546_v18  ;;  %v5547_v51 = vunpack.i.l.bf16 %v5546_v18  ;;  %v5538_v6 = vunpack.i.h.bf16 %v5536_v47  ;;  %v5537_v21 = vunpack.i.l.bf16 %v5536_v47  ;;  %v5941_v18 = vld [vmem:[#allocation2 + $0x10] sm:$0xff] }
 0x86f   : > { %5248 = vmatprep.mubr.msk.bf16.mxu1 %vm952_vm4, %v3465_v46 }
 0x870   : > { %5249 = vmatmul.mubr.msk.bf16.gmra.mxu1 %vm952_vm4, %v3466_v58  ;;  %v3457_v60 = vsel %vm3446_vm8, %v3440_v24, %v5547_v51  ;;  %v3458_v27 = vsel %vm3446_vm8, %v3441_v31, %v5548_v62  ;;  %v3426_v8 = vsel %vm1431_vm5, %v7730_v2, %v5538_v6  ;;  %v3425_v17 = vsel %vm1431_vm5, %v7726_v9, %v5537_v21  ;;  %v5942_v62 = vld [vmem:[#allocation2 + $0x8] sm:$0xff] }
 0x871   : > { %v5551_v54 = vpop.permute.xlu0 %5550  ;;  %v5561_v14 = vpop.permute.xlu1 %5560  ;;  %v3468_v61 = vpack.c.bf16 %v3458_v27, %v3457_v60 }
 0x872   : > { %v5553_v11 = vunpack.i.h.bf16 %v5551_v54  ;;  %v5552_v23 = vunpack.i.l.bf16 %v5551_v54  ;;  %v5563_v41 = vunpack.i.h.bf16 %v5561_v14  ;;  %v5562_v29 = vunpack.i.l.bf16 %v5561_v14 }
 0x874   : > { %v3456_v15 = vsel %vm3446_vm8, %v3439_v39, %v5553_v11  ;;  %v3455_v30 = vsel %vm3446_vm8, %v3438_v12, %v5552_v23  ;;  %v3444_v33 = vsel %vm3429_vm7, %v3427_v55, %v5562_v29  ;;  %v3445_v0 = vsel %vm3429_vm7, %v3428_v26, %v5563_v41  ;;  %v5944_v23 = vld [vmem:[#allocation2 + $0x20] sm:$0xff] }
 0x875   : > { %v3467_v34 = vpack.c.bf16 %v3456_v15, %v3455_v30  ;;  %v5556_v28 = vpop.permute.xlu0 %5555  ;;  %v5571_v32 = vpop.permute.xlu1 %5570  ;;  %v5945_v15 = vld [vmem:[#allocation2 + $0x28] sm:$0xff] }
 0x876   : > { %v5558_v7 = vunpack.i.h.bf16 %v5556_v28  ;;  %v5557_v53 = vunpack.i.l.bf16 %v5556_v28  ;;  %v5573_v5 = vunpack.i.h.bf16 %v5571_v32  ;;  %v5572_v42 = vunpack.i.l.bf16 %v5571_v32 }
 0x877   : > { %5252 = vmatprep.mubr.msk.bf16.mxu1 %vm952_vm4, %v3467_v34  ;;  %v5947_v34 = vld [vmem:[#allocation2 + $0x38] sm:$0xff] }
 0x878   : > { %5253 = vmatmul.mubr.msk.bf16.gmra.mxu1 %vm952_vm4, %v3468_v61  ;;  %v3443_v16 = vsel %vm3429_vm7, %v3426_v8, %v5558_v7  ;;  %v3442_v52 = vsel %vm3429_vm7, %v3425_v17, %v5557_v53  ;;  %v3461_v40 = vsel %vm3446_vm8, %v3444_v33, %v5572_v42  ;;  %v3462_v45 = vsel %vm3446_vm8, %v3445_v0, %v5573_v5  ;;  %v5948_v42 = vld [vmem:[#allocation2 + $0x40] sm:$0xff]  ;;  %v5949_v33 = vld [vmem:[#allocation2 + $0x48] sm:$0xff] }
 0x879   : > { %v5566_v38 = vpop.permute.xlu0 %5565  ;;  %v3470_v13 = vpack.c.bf16 %v3462_v45, %v3461_v40 }
 0x87a   : > { %v5568_v1 = vunpack.i.h.bf16 %v5566_v38  ;;  %v5567_v25 = vunpack.i.l.bf16 %v5566_v38 }
 0x87c   : > { %v3460_v2 = vsel %vm3446_vm8, %v3443_v16, %v5568_v1  ;;  %v3459_v9 = vsel %vm3446_vm8, %v3442_v52, %v5567_v25  ;;  %v5950_v1 = vld [vmem:[#allocation2 + $0x50] sm:$0xff]  ;;  %v5951_v52 = vld [vmem:[#allocation2 + $0x58] sm:$0xff] }
 0x87d   : > { %v3469_v63 = vpack.c.bf16 %v3460_v2, %v3459_v9 }
 0x87f   : > { %5256 = vmatprep.mubr.msk.bf16.mxu1 %vm952_vm4, %v3469_v63 }
 0x880   : > { %5257 = vmatmul.mubr.msk.bf16.gmra.mxu1 %vm952_vm4, %v3470_v13 }
 0x928   : > { %v5246_v44 = vpop.f32.mrf.mxu1 }
 0x929   : > { %v3561_v57 = vadd.f32 %v5246_v44, %v7846_v22 }
 0x92a   : > { %v3552_v50 = vpop.f32.mrf.mxu1 }
 0x92b   : > { %v3553_v49 = vadd.f32 %v7846_v22, %v3552_v50  ;;  %v7852_v59 = vadd.f32 %v5941_v18, %v3561_v57  ;;  %v5952_v57 = vld [vmem:[#allocation2 + $0x60] sm:$0xff]  ;;  %v5953_v18 = vld [vmem:[#allocation2 + $0x68] sm:$0xff] }
 0x92c   : > { %v5247_v10 = vpop.f32.mrf.mxu1 }
 0x92d   : > { %v7850_v46 = vadd.f32 %v5940_v56, %v3553_v49  ;;  %v3564_v19 = vadd.f32 %v5247_v10, %v7846_v22  ;;  %v3639_v14 = vsel %vm952_vm4, %v7852_v59, 0.0 }
 0x92e   : > { %v3555_v47 = vpop.f32.mrf.mxu1 }
 0x92f   : > { %v3556_v58 = vadd.f32 %v7846_v22, %v3555_v47  ;;  %v3633_v37 = vsel %vm952_vm4, %v7850_v46, 0.0  ;;  %v7860_v36 = vadd.f32 %v5943_v48, %v3564_v19 }
 0x930   : > { %v5250_v35 = vpop.f32.mrf.mxu1  ;;  %3634 = vadd.xlane.f32.xlu0 %v3633_v37 }
 0x931   : > { %v7858_v51 = vadd.f32 %v5942_v62, %v3556_v58  ;;  %v3577_v31 = vadd.f32 %v5250_v35, %v7846_v22  ;;  %v3642_v27 = vsel %vm952_vm4, %v7860_v36, 0.0  ;;  %v5954_v58 = vld [vmem:[#allocation2 + $0x70] sm:$0xff]  ;;  %v5955_v35 = vld [vmem:[#allocation2 + $0x78] sm:$0xff] }
 0x932   : > { %v3568_v4 = vpop.f32.mrf.mxu1 }
 0x933   : > { %v3569_v43 = vadd.f32 %v7846_v22, %v3568_v4  ;;  %v3636_v54 = vsel %vm952_vm4, %v7858_v51, 0.0  ;;  %v7876_v6 = vadd.f32 %v5946_v20, %v3577_v31 }
 0x934   : > { %v5251_v24 = vpop.f32.mrf.mxu1  ;;  %3637 = vadd.xlane.f32.xlu1 %v3636_v54  ;;  %3640 = vadd.xlane.f32.xlu0 %v3639_v14 }
 0x935   : > { %v7868_v39 = vadd.f32 %v5944_v23, %v3569_v43  ;;  %v3580_v12 = vadd.f32 %v5251_v24, %v7846_v22  ;;  %v3651_v5 = vsel %vm952_vm4, %v7876_v6, 0.0 }
 0x936   : > { %v3571_v11 = vpop.f32.mrf.mxu1 }
 0x937   : > { %v3572_v60 = vadd.f32 %v7846_v22, %v3571_v11  ;;  %v7878_v28 = vadd.f32 %v5947_v34, %v3580_v12  ;;  %v3645_v41 = vsel %vm952_vm4, %v7868_v39, 0.0 }
 0x938   : > { %v5254_v3 = vpop.f32.mrf.mxu1  ;;  %3643 = vadd.xlane.f32.xlu0 %v3642_v27 }
 0x939   : > { %v7874_v30 = vadd.f32 %v5945_v15, %v3572_v60  ;;  %v3593_v7 = vadd.f32 %v5254_v3, %v7846_v22  ;;  %v3654_v17 = vsel %vm952_vm4, %v7878_v28, 0.0 }
 0x93a   : > { %v3584_v21 = vpop.f32.mrf.mxu1 }
 0x93b   : > { %v3585_v32 = vadd.f32 %v7846_v22, %v3584_v21  ;;  %v3648_v61 = vsel %vm952_vm4, %v7874_v30, 0.0  ;;  %v7896_v25 = vadd.f32 %v5950_v1, %v3593_v7 }
 0x93c   : > { %v5255_v29 = vpop.f32.mrf.mxu1  ;;  %3649 = vadd.xlane.f32.xlu1 %v3648_v61  ;;  %3646 = vadd.xlane.f32.xlu0 %v3645_v41 }
 0x93d   : > { %v7888_v26 = vadd.f32 %v5948_v42, %v3585_v32  ;;  %v3596_v55 = vadd.f32 %v5255_v29, %v7846_v22  ;;  %v3663_v50 = vsel %vm952_vm4, %v7896_v25, 0.0 }
 0x93e   : > { %v3587_v53 = vpop.f32.mrf.mxu1 }
 0x93f   : > { %v3588_v8 = vadd.f32 %v7846_v22, %v3587_v53  ;;  %v7898_v40 = vadd.f32 %v5951_v52, %v3596_v55  ;;  %v3657_v9 = vsel %vm952_vm4, %v7888_v26, 0.0 }
 0x940   : > { %v5258_v38 = vpop.f32.mrf.mxu1  ;;  %3655 = vadd.xlane.f32.xlu1 %v3654_v17  ;;  %3652 = vadd.xlane.f32.xlu0 %v3651_v5 }
 0x941   : > { %v7894_v0 = vadd.f32 %v5949_v33, %v3588_v8  ;;  %v3609_v13 = vadd.f32 %v5258_v38, %v7846_v22  ;;  %v3666_v47 = vsel %vm952_vm4, %v7898_v40, 0.0 }
 0x942   : > { %v3600_v16 = vpop.f32.mrf.mxu1 }
 0x943   : > { %v3601_v45 = vadd.f32 %v7846_v22, %v3600_v16  ;;  %v3660_v2 = vsel %vm952_vm4, %v7894_v0, 0.0  ;;  %v7916_v37 = vadd.f32 %v5954_v58, %v3609_v13  ;;  %v5578_v58 = vld [vmem:[%s6285_s0 + $0x8] sm:$0xff]  }
 0x944   : > { %v5259_v63 = vpop.f32.mrf.mxu1  ;;  %3661 = vadd.xlane.f32.xlu1 %v3660_v2  ;;  %3658 = vadd.xlane.f32.xlu0 %v3657_v9 }
 0x945   : > { %v7908_v49 = vadd.f32 %v5952_v57, %v3601_v45  ;;  %v3612_v10 = vadd.f32 %v5259_v63, %v7846_v22  ;;  %v3675_v43 = vsel %vm952_vm4, %v7916_v37, 0.0  ;;  %5260 = vmatprep.subr.bf16.mxu0 %v5578_v58 }
 0x946   : > { %v3603_v44 = vpop.f32.mrf.mxu1  ;;  %5261 = vmatpush3.bf16.msra.mxu0 %v5578_v58 }
 0x947   : > { %v3604_v56 = vadd.f32 %v7846_v22, %v3603_v44  ;;  %v7918_v62 = vadd.f32 %v5955_v35, %v3612_v10  ;;  %v3669_v22 = vsel %vm952_vm4, %v7908_v49, 0.0 }
 0x948   : > { %3667 = vadd.xlane.f32.xlu1 %v3666_v47  ;;  %3664 = vadd.xlane.f32.xlu0 %v3663_v50 }
 0x949   : > { %v7914_v19 = vadd.f32 %v5953_v18, %v3604_v56  ;;  %v3678_v48 = vsel %vm952_vm4, %v7918_v62, 0.0 }
 0x94b   : > { %v3672_v4 = vsel %vm952_vm4, %v7914_v19, 0.0 }
 0x94c   : > { %3673 = vadd.xlane.f32.xlu1 %v3672_v4  ;;  %3670 = vadd.xlane.f32.xlu0 %v3669_v22 }
 0x950   : > { %3679 = vadd.xlane.f32.xlu1 %v3678_v48  ;;  %3676 = vadd.xlane.f32.xlu0 %v3675_v43 }
 0x9b9   : > { %v3635_v54 = vpop.xlane.xlu0 %3634 }
 0x9ba   : > { %v3681_v14 = vmul.f32 0.03125, %v3635_v54 }
 0x9bc   : > { %v7929_v24 = vsub.f32 %v7850_v46, %v3681_v14 }
 0x9bd   : > { %v3638_v31 = vpop.xlane.xlu1 %3637  ;;  %v3641_v11 = vpop.xlane.xlu0 %3640 }
 0x9be   : > { %v3682_v23 = vmul.f32 0.03125, %v3638_v31  ;;  %v3683_v12 = vmul.f32 0.03125, %v3641_v11  ;;  %v3713_v60 = vmul.f32 %v7929_v24, %v7929_v24 }
 0x9c0   : > { %v7934_v27 = vsub.f32 %v7858_v51, %v3682_v23  ;;  %v7937_v3 = vsub.f32 %v7852_v59, %v3683_v12  ;;  %v3729_v15 = vsel %vm952_vm4, %v3713_v60, 0.0 }
 0x9c1   : > { %3730 = vadd.xlane.f32.xlu0 %v3729_v15  ;;  %v3644_v20 = vpop.xlane.xlu0 %3643 }
 0x9c2   : > { %v3684_v21 = vmul.f32 0.03125, %v3644_v20  ;;  %v3714_v34 = vmul.f32 %v7934_v27, %v7934_v27  ;;  %v3715_v32 = vmul.f32 %v7937_v3, %v7937_v3 }
 0x9c4   : > { %v7945_v61 = vsub.f32 %v7860_v36, %v3684_v21  ;;  %v3732_v41 = vsel %vm952_vm4, %v3714_v34, 0.0  ;;  %v3735_v29 = vsel %vm952_vm4, %v3715_v32, 0.0 }
 0x9c5   : > { %3733 = vadd.xlane.f32.xlu1 %v3732_v41  ;;  %v3650_v7 = vpop.xlane.xlu1 %3649  ;;  %3736 = vadd.xlane.f32.xlu0 %v3735_v29  ;;  %v3647_v53 = vpop.xlane.xlu0 %3646 }
 0x9c6   : > { %v3686_v5 = vmul.f32 0.03125, %v3650_v7  ;;  %v3685_v42 = vmul.f32 0.03125, %v3647_v53  ;;  %v3716_v55 = vmul.f32 %v7945_v61, %v7945_v61 }
 0x9c8   : > { %v7952_v8 = vsub.f32 %v7874_v30, %v3686_v5  ;;  %v7955_v17 = vsub.f32 %v7868_v39, %v3685_v42  ;;  %v3738_v38 = vsel %vm952_vm4, %v3716_v55, 0.0 }
 0x9c9   : > { %v3656_v33 = vpop.xlane.xlu1 %3655  ;;  %3739 = vadd.xlane.f32.xlu1 %v3738_v38  ;;  %v3653_v1 = vpop.xlane.xlu0 %3652 }
 0x9ca   : > { %v3688_v16 = vmul.f32 0.03125, %v3656_v33  ;;  %v3687_v52 = vmul.f32 0.03125, %v3653_v1  ;;  %v3718_v45 = vmul.f32 %v7952_v8, %v7952_v8  ;;  %v3717_v2 = vmul.f32 %v7955_v17, %v7955_v17 }
 0x9cc   : > { %v7963_v9 = vsub.f32 %v7878_v28, %v3688_v16  ;;  %v7966_v63 = vsub.f32 %v7876_v6, %v3687_v52  ;;  %v3744_v13 = vsel %vm952_vm4, %v3718_v45, 0.0  ;;  %v3741_v44 = vsel %vm952_vm4, %v3717_v2, 0.0 }
 0x9cd   : > { %v3662_v50 = vpop.xlane.xlu1 %3661  ;;  %3745 = vadd.xlane.f32.xlu1 %v3744_v13  ;;  %3742 = vadd.xlane.f32.xlu0 %v3741_v44  ;;  %v3659_v57 = vpop.xlane.xlu0 %3658 }
 0x9ce   : > { %v3690_v10 = vmul.f32 0.03125, %v3662_v50  ;;  %v3689_v56 = vmul.f32 0.03125, %v3659_v57  ;;  %v3720_v47 = vmul.f32 %v7963_v9, %v7963_v9  ;;  %v3719_v18 = vmul.f32 %v7966_v63, %v7966_v63 }
 0x9d0   : > { %v7976_v35 = vsub.f32 %v7894_v0, %v3690_v10  ;;  %v7979_v4 = vsub.f32 %v7888_v26, %v3689_v56  ;;  %v3750_v22 = vsel %vm952_vm4, %v3720_v47, 0.0  ;;  %v3747_v48 = vsel %vm952_vm4, %v3719_v18, 0.0  ;;  %v5579_v18 = vld [vmem:[%s6285_s0] sm:$0xff]   ;;  %s8525_s0 = sld [smem:[#allocation58_spill]] (!%p4761_p1) }
 0x9d1   : > { %v3668_v43 = vpop.xlane.xlu1 %3667  ;;  %3751 = vadd.xlane.f32.xlu1 %v3750_v22  ;;  %3748 = vadd.xlane.f32.xlu0 %v3747_v48  ;;  %v3665_v54 = vpop.xlane.xlu0 %3664 }
 0x9d2   : > { %v3692_v14 = vmul.f32 0.03125, %v3668_v43  ;;  %v3691_v31 = vmul.f32 0.03125, %v3665_v54  ;;  %v3722_v11 = vmul.f32 %v7976_v35, %v7976_v35  ;;  %v3721_v23 = vmul.f32 %v7979_v4, %v7979_v4  ;;  %5262 = vmatprep.subr.bf16.mxu0 %v5579_v18 }
 0x9d3   : > { %5263 = vmatpush3.bf16.msra.mxu0 %v5579_v18 }
 0x9d4   : > { %v7988_v12 = vsub.f32 %v7898_v40, %v3692_v14  ;;  %v7991_v60 = vsub.f32 %v7896_v25, %v3691_v31  ;;  %v3756_v15 = vsel %vm952_vm4, %v3722_v11, 0.0  ;;  %v3753_v20 = vsel %vm952_vm4, %v3721_v23, 0.0 }
 0x9d5   : > { %v3674_v21 = vpop.xlane.xlu1 %3673  ;;  %3757 = vadd.xlane.f32.xlu1 %v3756_v15  ;;  %3754 = vadd.xlane.f32.xlu0 %v3753_v20  ;;  %v3671_v34 = vpop.xlane.xlu0 %3670 }
 0x9d6   : > { %v3694_v32 = vmul.f32 0.03125, %v3674_v21  ;;  %v3693_v41 = vmul.f32 0.03125, %v3671_v34  ;;  %v3724_v29 = vmul.f32 %v7988_v12, %v7988_v12  ;;  %v3723_v7 = vmul.f32 %v7991_v60, %v7991_v60 }
 0x9d8   : > { %v8000_v53 = vsub.f32 %v7914_v19, %v3694_v32  ;;  %v8003_v5 = vsub.f32 %v7908_v49, %v3693_v41  ;;  %v3762_v42 = vsel %vm952_vm4, %v3724_v29, 0.0  ;;  %v3759_v55 = vsel %vm952_vm4, %v3723_v7, 0.0 }
 0x9d9   : > { %v3680_v38 = vpop.xlane.xlu1 %3679  ;;  %3763 = vadd.xlane.f32.xlu1 %v3762_v42  ;;  %3760 = vadd.xlane.f32.xlu0 %v3759_v55  ;;  %v3677_v33 = vpop.xlane.xlu0 %3676 }
 0x9da   : > { %v3696_v1 = vmul.f32 0.03125, %v3680_v38  ;;  %v3695_v16 = vmul.f32 0.03125, %v3677_v33  ;;  %v3726_v52 = vmul.f32 %v8000_v53, %v8000_v53  ;;  %v3725_v45 = vmul.f32 %v8003_v5, %v8003_v5 }
 0x9dc   : > { %v8012_v2 = vsub.f32 %v7918_v62, %v3696_v1  ;;  %v8015_v13 = vsub.f32 %v7916_v37, %v3695_v16  ;;  %v3768_v44 = vsel %vm952_vm4, %v3726_v52, 0.0  ;;  %v3765_v50 = vsel %vm952_vm4, %v3725_v45, 0.0 }
 0x9dd   : > { %3769 = vadd.xlane.f32.xlu1 %v3768_v44  ;;  %3766 = vadd.xlane.f32.xlu0 %v3765_v50 }
 0x9de   : > { %v3728_v57 = vmul.f32 %v8012_v2, %v8012_v2  ;;  %v3727_v10 = vmul.f32 %v8015_v13, %v8015_v13 }
 0x9e0   : > { %v3774_v56 = vsel %vm952_vm4, %v3728_v57, 0.0  ;;  %v3771_v47 = vsel %vm952_vm4, %v3727_v10, 0.0  ;;  %v8032_v10 = vld [vmem:[%s797_s20] ss:$0 sm:$0xff] }
 0x9e1   : > { %3775 = vadd.xlane.f32.xlu1 %v3774_v56  ;;  %3772 = vadd.xlane.f32.xlu0 %v3771_v47 }
 0xa4a   : > { %v3731_v58 = vpop.xlane.xlu0 %3730 }
 0xa4b   : > { %v3777_v22 = vmul.f32 0.03125, %v3731_v58 }
 0xa4d   : > { %v3793_v48 = vadd.f32 1e-05, %v3777_v22 }
 0xa4e   : > { %v3734_v43 = vpop.xlane.xlu1 %3733  ;;  %v3737_v54 = vpop.xlane.xlu0 %3736 }
 0xa4f   : > { %5876 = vrsqrt.f32 %v3793_v48  ;;  %v3778_v14 = vmul.f32 0.03125, %v3734_v43  ;;  %v3779_v31 = vmul.f32 0.03125, %v3737_v54 }
 0xa51   : > { %v3794_v11 = vadd.f32 1e-05, %v3778_v14  ;;  %v3795_v23 = vadd.f32 1e-05, %v3779_v31 }
 0xa52   : > { %v3740_v15 = vpop.xlane.xlu1 %3739 }
 0xa53   : > { %5878 = vrsqrt.f32 %v3794_v11  ;;  %v3780_v20 = vmul.f32 0.03125, %v3740_v15  ;;  %v8042_v15 = vld [vmem:[%s8521_s17] ss:$0 sm:$0xff] }
 0xa54   : > { %5880 = vrsqrt.f32 %v3795_v23 }
 0xa55   : > { %v3796_v21 = vadd.f32 1e-05, %v3780_v20 }
 0xa56   : > { %v3746_v34 = vpop.xlane.xlu1 %3745  ;;  %v3743_v32 = vpop.xlane.xlu0 %3742 }
 0xa57   : > { %5882 = vrsqrt.f32 %v3796_v21  ;;  %v3782_v41 = vmul.f32 0.03125, %v3746_v34  ;;  %v3781_v29 = vmul.f32 0.03125, %v3743_v32 }
 0xa59   : > { %v3798_v7 = vadd.f32 1e-05, %v3782_v41  ;;  %v3797_v42 = vadd.f32 1e-05, %v3781_v29 }
 0xa5a   : > { %v3752_v55 = vpop.xlane.xlu1 %3751  ;;  %v3749_v38 = vpop.xlane.xlu0 %3748 }
 0xa5b   : > { %5884 = vrsqrt.f32 %v3798_v7  ;;  %v3784_v33 = vmul.f32 0.03125, %v3752_v55  ;;  %v3783_v1 = vmul.f32 0.03125, %v3749_v38 }
 0xa5c   : > { %v5877_v16 = vpop.eup %5876  ;;  %5886 = vrsqrt.f32 %v3797_v42 }
 0xa5d   : > { %v3800_v52 = vadd.f32 1e-05, %v3784_v33  ;;  %v3799_v45 = vadd.f32 1e-05, %v3783_v1  ;;  %v3825_v57 = vmul.f32 %v5877_v16, %v7929_v24 }
 0xa5e   : > { %v3758_v44 = vpop.xlane.xlu1 %3757  ;;  %v3755_v50 = vpop.xlane.xlu0 %3754 }
 0xa5f   : > { %5888 = vrsqrt.f32 %v3800_v52  ;;  %v3786_v56 = vmul.f32 0.03125, %v3758_v44  ;;  %v3785_v47 = vmul.f32 0.03125, %v3755_v50  ;;  %v3847_v31 = vmul.f32 %v8032_v10, %v3825_v57 }
 0xa60   : > { %v5879_v18 = vpop.eup %5878  ;;  %5890 = vrsqrt.f32 %v3799_v45 }
 0xa61   : > { %v5881_v58 = vpop.eup %5880  ;;  %v3802_v22 = vadd.f32 1e-05, %v3786_v56  ;;  %v3801_v48 = vadd.f32 1e-05, %v3785_v47  ;;  %v3826_v43 = vmul.f32 %v5879_v18, %v7934_v27  ;;  %v3869_v42 = vadd.f32 %v8042_v15, %v3847_v31 }
 0xa62   : > { %v3827_v54 = vmul.f32 %v5881_v58, %v7937_v3  ;;  %v3764_v24 = vpop.xlane.xlu1 %3763  ;;  %v3761_v14 = vpop.xlane.xlu0 %3760 }
 0xa63   : > { %5892 = vrsqrt.f32 %v3802_v22  ;;  %v3788_v11 = vmul.f32 0.03125, %v3764_v24  ;;  %v3787_v23 = vmul.f32 0.03125, %v3761_v14  ;;  %v3848_v20 = vmul.f32 %v8032_v10, %v3826_v43 }
 0xa64   : > { %v5883_v21 = vpop.eup %5882  ;;  %v3849_v27 = vmul.f32 %v8032_v10, %v3827_v54  ;;  %5894 = vrsqrt.f32 %v3801_v48 }
 0xa65   : > { %v3828_v3 = vmul.f32 %v5883_v21, %v7945_v61  ;;  %v3804_v34 = vadd.f32 1e-05, %v3788_v11  ;;  %v3803_v32 = vadd.f32 1e-05, %v3787_v23  ;;  %v3870_v41 = vadd.f32 %v8042_v15, %v3848_v20 }
 0xa66   : > { %v3770_v29 = vpop.xlane.xlu1 %3769  ;;  %v3767_v7 = vpop.xlane.xlu0 %3766  ;;  %v3871_v52 = vadd.f32 %v8042_v15, %v3849_v27 }
 0xa67   : > { %v3850_v55 = vmul.f32 %v8032_v10, %v3828_v3  ;;  %5896 = vrsqrt.f32 %v3804_v34  ;;  %v3790_v38 = vmul.f32 0.03125, %v3770_v29  ;;  %v3789_v33 = vmul.f32 0.03125, %v3767_v7 }
 0xa68   : > { %v5885_v1 = vpop.eup %5884  ;;  %5898 = vrsqrt.f32 %v3803_v32  ;;  %v3885_v16 = vpack.c.bf16 %v3870_v41, %v3869_v42 }
 0xa69   : > { %v5887_v45 = vpop.eup %5886  ;;  %v3806_v61 = vadd.f32 1e-05, %v3790_v38  ;;  %v3805_v44 = vadd.f32 1e-05, %v3789_v33  ;;  %v3872_v50 = vadd.f32 %v8042_v15, %v3850_v55  ;;  %v3830_v57 = vmul.f32 %v5885_v1, %v7952_v8 }
 0xa6a   : > { %5264 = vmatprep.mubr.msk.bf16.mxu0 %vm952_vm4, %v3885_v16  ;;  %v3776_v56 = vpop.xlane.xlu1 %3775  ;;  %v3773_v47 = vpop.xlane.xlu0 %3772  ;;  %v3829_v18 = vmul.f32 %v5887_v45, %v7955_v17 }
 0xa6b   : > { %5900 = vrsqrt.f32 %v3806_v61  ;;  %v3792_v58 = vmul.f32 0.03125, %v3776_v56  ;;  %v3791_v22 = vmul.f32 0.03125, %v3773_v47  ;;  %v3886_v48 = vpack.c.bf16 %v3872_v50, %v3871_v52 }
 0xa6c   : > { %v5889_v43 = vpop.eup %5888  ;;  %5902 = vrsqrt.f32 %v3805_v44  ;;  %v3851_v54 = vmul.f32 %v8032_v10, %v3829_v18  ;;  %v3852_v24 = vmul.f32 %v8032_v10, %v3830_v57 }
 0xa6d   : > { %v5891_v14 = vpop.eup %5890  ;;  %v3808_v31 = vadd.f32 1e-05, %v3792_v58  ;;  %v3807_v11 = vadd.f32 1e-05, %v3791_v22  ;;  %5265 = vmatmul.mubr.msk.bf16.vlgmr.msra.gmra.mxu0 %vm952_vm4, %v3886_v48  ;;  %v3832_v8 = vmul.f32 %v5889_v43, %v7963_v9 }
 0xa6e   : > { %v3873_v23 = vadd.f32 %v8042_v15, %v3851_v54  ;;  %v3874_v17 = vadd.f32 %v8042_v15, %v3852_v24  ;;  %v3831_v20 = vmul.f32 %v5891_v14, %v7966_v63 }
 0xa6f   : > { %5904 = vrsqrt.f32 %v3808_v31  ;;  %v3854_v21 = vmul.f32 %v8032_v10, %v3832_v8 }
 0xa70   : > { %v5893_v27 = vpop.eup %5892  ;;  %5906 = vrsqrt.f32 %v3807_v11  ;;  %v3887_v3 = vpack.c.bf16 %v3874_v17, %v3873_v23  ;;  %v3853_v34 = vmul.f32 %v8032_v10, %v3831_v20  ;;  %v5580_v23 = vld [vmem:[%s6295_s23 + $0x38] sm:$0xff]   ;;  %v5585_v20 = vld [vmem:[%s6295_s23 + $0x10] sm:$0xff]  }
 0xa71   : > { %v5895_v32 = vpop.eup %5894  ;;  %v3876_v41 = vadd.f32 %v8042_v15, %v3854_v21  ;;  %v3834_v29 = vmul.f32 %v5893_v27, %v7976_v35  ;;  %5280 = vmatprep.subr.bf16.mxu0 %v5580_v23  ;;  %5320 = vmatprep.subr.bf16.mxu1 %v5580_v23  ;;  %v5584_v17 = vld [vmem:[%s6295_s23 + $0x18] sm:$0xff]   ;;  %v5586_v21 = vld [vmem:[%s6295_s23 + $0x8] sm:$0xff]   ;;  %v5587_v27 = vld [vmem:[%s6295_s23] sm:$0xff]  }
 0xa72   : > { %5268 = vmatprep.mubr.msk.bf16.mxu0 %vm952_vm4, %v3887_v3  ;;  %v3875_v9 = vadd.f32 %v8042_v15, %v3853_v34  ;;  %v3833_v7 = vmul.f32 %v5895_v32, %v7979_v4  ;;  %5281 = vmatpush3.bf16.msra.mxu0 %v5580_v23  ;;  %v8109_v3 = vld [vmem:[%s808_s7] ss:$0 sm:$0xff] }
 0xa73   : > { %v3856_v63 = vmul.f32 %v8032_v10, %v3834_v29  ;;  %5328 = vmatpush3.bf16.msra.mxu1 %v5580_v23 }
 0xa74   : > { %v5897_v42 = vpop.eup %5896  ;;  %v3888_v55 = vpack.c.bf16 %v3876_v41, %v3875_v9  ;;  %v3855_v38 = vmul.f32 %v8032_v10, %v3833_v7 }
 0xa75   : > { %v5899_v33 = vpop.eup %5898  ;;  %v3878_v1 = vadd.f32 %v8042_v15, %v3856_v63  ;;  %v3836_v16 = vmul.f32 %v5897_v42, %v7988_v12 }
 0xa76   : > { %5269 = vmatmul.mubr.msk.bf16.gmra.mxu0 %vm952_vm4, %v3888_v55  ;;  %v3877_v35 = vadd.f32 %v8042_v15, %v3855_v38  ;;  %v3835_v52 = vmul.f32 %v5899_v33, %v7991_v60 }
 0xa77   : > { %v3858_v45 = vmul.f32 %v8032_v10, %v3836_v16 }
 0xa78   : > { %v5901_v4 = vpop.eup %5900  ;;  %v3889_v61 = vpack.c.bf16 %v3878_v1, %v3877_v35  ;;  %v3857_v44 = vmul.f32 %v8032_v10, %v3835_v52 }
 0xa79   : > { %v5903_v50 = vpop.eup %5902  ;;  %v3880_v57 = vadd.f32 %v8042_v15, %v3858_v45  ;;  %v3838_v56 = vmul.f32 %v5901_v4, %v8000_v53 }
 0xa7a   : > { %5272 = vmatprep.mubr.msk.bf16.mxu0 %vm952_vm4, %v3889_v61  ;;  %v3879_v12 = vadd.f32 %v8042_v15, %v3857_v44  ;;  %v3837_v47 = vmul.f32 %v5903_v50, %v8003_v5 }
 0xa7b   : > { %v3860_v18 = vmul.f32 %v8032_v10, %v3838_v56 }
 0xa7c   : > { %v5905_v60 = vpop.eup %5904  ;;  %v3890_v58 = vpack.c.bf16 %v3880_v57, %v3879_v12  ;;  %v3859_v22 = vmul.f32 %v8032_v10, %v3837_v47 }
 0xa7d   : > { %v5907_v48 = vpop.eup %5906  ;;  %v3882_v43 = vadd.f32 %v8042_v15, %v3860_v18  ;;  %v3840_v54 = vmul.f32 %v5905_v60, %v8012_v2 }
 0xa7e   : > { %5273 = vmatmul.mubr.msk.bf16.gmra.mxu0 %vm952_vm4, %v3890_v58  ;;  %v3881_v53 = vadd.f32 %v8042_v15, %v3859_v22  ;;  %v3839_v24 = vmul.f32 %v5907_v48, %v8015_v13  ;;  %v5581_v13 = vld [vmem:[%s6295_s23 + $0x30] sm:$0xff]  }
 0xa7f   : > { %v3862_v5 = vmul.f32 %v8032_v10, %v3840_v54  ;;  %5282 = vmatprep.subr.bf16.mxu0 %v5581_v13  ;;  %5321 = vmatprep.subr.bf16.mxu1 %v5581_v13 }
 0xa80   : > { %v3891_v14 = vpack.c.bf16 %v3882_v43, %v3881_v53  ;;  %v3861_v31 = vmul.f32 %v8032_v10, %v3839_v24  ;;  %5283 = vmatpush3.bf16.msra.mxu0 %v5581_v13  ;;  %5329 = vmatpush3.bf16.msra.mxu1 %v5581_v13  ;;  %v5582_v10 = vld [vmem:[%s6295_s23 + $0x28] sm:$0xff]  }
 0xa81   : > { %v3884_v11 = vadd.f32 %v8042_v15, %v3862_v5  ;;  %5284 = vmatprep.subr.bf16.mxu0 %v5582_v10  ;;  %5322 = vmatprep.subr.bf16.mxu1 %v5582_v10 }
 0xa82   : > { %5276 = vmatprep.mubr.msk.bf16.mxu0 %vm952_vm4, %v3891_v14  ;;  %v3883_v8 = vadd.f32 %v8042_v15, %v3861_v31  ;;  %v5583_v15 = vld [vmem:[%s6295_s23 + $0x20] sm:$0xff]  }
 0xa84   : > { %v3892_v2 = vpack.c.bf16 %v3884_v11, %v3883_v8  ;;  %5285 = vmatpush3.bf16.msra.mxu0 %v5582_v10  ;;  %5330 = vmatpush3.bf16.msra.mxu1 %v5582_v10 }
 0xa85   : > { %5286 = vmatprep.subr.bf16.mxu0 %v5583_v15  ;;  %5323 = vmatprep.subr.bf16.mxu1 %v5583_v15 }
 0xa86   : > { %5277 = vmatmul.mubr.msk.bf16.gmra.mxu0 %vm952_vm4, %v3892_v2 }
 0xa88   : > { %5287 = vmatpush3.bf16.msra.mxu0 %v5583_v15  ;;  %5331 = vmatpush3.bf16.msra.mxu1 %v5583_v15 }
 0xa89   : > { %5288 = vmatprep.subr.bf16.mxu0 %v5584_v17  ;;  %5324 = vmatprep.subr.bf16.mxu1 %v5584_v17 }
 0xa8c   : > { %5289 = vmatpush3.bf16.msra.mxu0 %v5584_v17  ;;  %5332 = vmatpush3.bf16.msra.mxu1 %v5584_v17 }
 0xa8d   : > { %5290 = vmatprep.subr.bf16.mxu0 %v5585_v20  ;;  %5325 = vmatprep.subr.bf16.mxu1 %v5585_v20 }
 0xa90   : > { %5291 = vmatpush3.bf16.msra.mxu0 %v5585_v20  ;;  %5333 = vmatpush3.bf16.msra.mxu1 %v5585_v20 }
 0xa91   : > { %5292 = vmatprep.subr.bf16.mxu0 %v5586_v21  ;;  %5326 = vmatprep.subr.bf16.mxu1 %v5586_v21 }
 0xa94   : > { %5293 = vmatpush3.bf16.msra.mxu0 %v5586_v21  ;;  %5334 = vmatpush3.bf16.msra.mxu1 %v5586_v21 }
 0xa95   : > { %5294 = vmatprep.subr.bf16.mxu0 %v5587_v27  ;;  %5327 = vmatprep.subr.bf16.mxu1 %v5587_v27 }
 0xa98   : > { %5295 = vmatpush3.bf16.msra.mxu0 %v5587_v27  ;;  %5335 = vmatpush3.bf16.msra.mxu1 %v5587_v27 }
 0xb2d   : > { %v5266_v34 = vpop.f32.mrf.mxu0 }
 0xb2e   : > { %v8112_v32 = vadd.f32 %v5266_v34, %v8109_v3 }
 0xb2f   : > { %v3974_v41 = vpop.f32.mrf.mxu0 }
 0xb30   : > { %v4055_v29 = vmul.f32 0.044715, %v8112_v32  ;;  %v8116_v9 = vadd.f32 %v8109_v3, %v3974_v41 }
 0xb31   : > { %v5267_v7 = vpop.f32.mrf.mxu0 }
 0xb32   : > { %v4071_v63 = vmul.f32 %v4055_v29, %v8112_v32  ;;  %v4053_v42 = vmul.f32 0.044715, %v8116_v9  ;;  %v8121_v55 = vadd.f32 %v5267_v7, %v8109_v3 }
 0xb33   : > { %v3977_v38 = vpop.f32.mrf.mxu0 }
 0xb34   : > { %v4087_v33 = vmul.f32 %v4071_v63, %v8112_v32  ;;  %v4069_v1 = vmul.f32 %v4053_v42, %v8116_v9  ;;  %v4056_v16 = vmul.f32 0.044715, %v8121_v55  ;;  %v8127_v35 = vadd.f32 %v8109_v3, %v3977_v38 }
 0xb36   : > { %v4103_v52 = vadd.f32 %v4087_v33, %v8112_v32  ;;  %v4085_v45 = vmul.f32 %v4069_v1, %v8116_v9  ;;  %v4072_v4 = vmul.f32 %v4056_v16, %v8121_v55  ;;  %v5270_v61 = vpop.f32.mrf.mxu0  ;;  %v4054_v44 = vmul.f32 0.044715, %v8127_v35 }
 0xb37   : > { %v8134_v50 = vadd.f32 %v5270_v61, %v8109_v3 }
 0xb38   : > { %v4119_v57 = vmul.f32 0.7978846, %v4103_v52  ;;  %v4088_v56 = vmul.f32 %v4072_v4, %v8121_v55  ;;  %v3990_v12 = vpop.f32.mrf.mxu0  ;;  %v4101_v47 = vadd.f32 %v4085_v45, %v8116_v9  ;;  %v4070_v18 = vmul.f32 %v4054_v44, %v8127_v35 }
 0xb39   : > { %v4059_v60 = vmul.f32 0.044715, %v8134_v50  ;;  %v8141_v58 = vadd.f32 %v8109_v3, %v3990_v12 }
 0xb3a   : > { %v4104_v22 = vadd.f32 %v4088_v56, %v8121_v55  ;;  %v5271_v48 = vpop.f32.mrf.mxu0  ;;  %v4117_v43 = vmul.f32 0.7978846, %v4101_v47  ;;  %v4086_v54 = vmul.f32 %v4070_v18, %v8127_v35  ;;  %5908 = vtanh.f32 %v4119_v57 }
 0xb3b   : > { %v4075_v53 = vmul.f32 %v4059_v60, %v8134_v50  ;;  %v4057_v24 = vmul.f32 0.044715, %v8141_v58  ;;  %v8148_v5 = vadd.f32 %v5271_v48, %v8109_v3 }
 0xb3c   : > { %v4120_v14 = vmul.f32 0.7978846, %v4104_v22  ;;  %v3993_v31 = vpop.f32.mrf.mxu0  ;;  %5910 = vtanh.f32 %v4117_v43  ;;  %v4102_v10 = vadd.f32 %v4086_v54, %v8127_v35 }
 0xb3d   : > { %v4091_v11 = vmul.f32 %v4075_v53, %v8134_v50  ;;  %v4073_v8 = vmul.f32 %v4057_v24, %v8141_v58  ;;  %v4060_v2 = vmul.f32 0.044715, %v8148_v5  ;;  %v8154_v23 = vadd.f32 %v8109_v3, %v3993_v31 }
 0xb3e   : > { %5912 = vtanh.f32 %v4120_v14  ;;  %v5274_v13 = vpop.f32.mrf.mxu0  ;;  %v4118_v41 = vmul.f32 0.7978846, %v4102_v10  ;;  %v4039_v53 = vmul.f32 0.5, %v8112_v32 }
 0xb3f   : > { %v4107_v15 = vadd.f32 %v4091_v11, %v8134_v50  ;;  %v4089_v17 = vmul.f32 %v4073_v8, %v8141_v58  ;;  %v4076_v20 = vmul.f32 %v4060_v2, %v8148_v5  ;;  %v8161_v21 = vadd.f32 %v5274_v13, %v8109_v3 }
 0xb40   : > { %v4058_v27 = vmul.f32 0.044715, %v8154_v23  ;;  %v4006_v34 = vpop.f32.mrf.mxu0  ;;  %5914 = vtanh.f32 %v4118_v41 }
 0xb41   : > { %v4123_v29 = vmul.f32 0.7978846, %v4107_v15  ;;  %v4092_v7 = vmul.f32 %v4076_v20, %v8148_v5  ;;  %v4063_v63 = vmul.f32 0.044715, %v8161_v21  ;;  %v8167_v42 = vadd.f32 %v8109_v3, %v4006_v34 }
 0xb42   : > { %v4074_v38 = vmul.f32 %v4058_v27, %v8154_v23  ;;  %v5275_v33 = vpop.f32.mrf.mxu0  ;;  %v4105_v1 = vadd.f32 %v4089_v17, %v8141_v58  ;;  %v4040_v20 = vmul.f32 0.5, %v8121_v55  ;;  %v4037_v34 = vmul.f32 0.5, %v8116_v9 }
 0xb43   : > { %v4108_v16 = vadd.f32 %v4092_v7, %v8148_v5  ;;  %v4061_v52 = vmul.f32 0.044715, %v8167_v42  ;;  %v4079_v4 = vmul.f32 %v4063_v63, %v8161_v21  ;;  %v8176_v61 = vadd.f32 %v5275_v33, %v8109_v3 }
 0xb44   : > { %v4090_v45 = vmul.f32 %v4074_v38, %v8154_v23  ;;  %v4009_v44 = vpop.f32.mrf.mxu0  ;;  %v4121_v57 = vmul.f32 0.7978846, %v4105_v1  ;;  %5916 = vtanh.f32 %v4123_v29  ;;  %v4038_v38 = vmul.f32 0.5, %v8127_v35 }
 0xb45   : > { %v4124_v56 = vmul.f32 0.7978846, %v4108_v16  ;;  %v4077_v12 = vmul.f32 %v4061_v52, %v8167_v42  ;;  %v8180_v47 = vadd.f32 %v8109_v3, %v4009_v44  ;;  %v4064_v18 = vmul.f32 0.044715, %v8176_v61 }
 0xb46   : > { %v5278_v60 = vpop.f32.mrf.mxu0  ;;  %v4106_v22 = vadd.f32 %v4090_v45, %v8154_v23  ;;  %5918 = vtanh.f32 %v4121_v57  ;;  %v4095_v24 = vmul.f32 %v4079_v4, %v8161_v21 }
 0xb47   : > { %5920 = vtanh.f32 %v4124_v56  ;;  %v4093_v48 = vmul.f32 %v4077_v12, %v8167_v42  ;;  %v4062_v43 = vmul.f32 0.044715, %v8180_v47  ;;  %v8187_v54 = vadd.f32 %v5278_v60, %v8109_v3  ;;  %v5909_v8 = vpop.eup %5908 }
 0xb48   : > { %v4080_v14 = vmul.f32 %v4064_v18, %v8176_v61  ;;  %v4022_v31 = vpop.f32.mrf.mxu0  ;;  %v4122_v11 = vmul.f32 0.7978846, %v4106_v22  ;;  %v4151_v1 = vadd.f32 1.0, %v5909_v8  ;;  %v4111_v52 = vadd.f32 %v4095_v24, %v8161_v21 }
 0xb49   : > { %v4078_v2 = vmul.f32 %v4062_v43, %v8180_v47  ;;  %v4067_v13 = vmul.f32 0.044715, %v8187_v54  ;;  %v8195_v10 = vadd.f32 %v8109_v3, %v4022_v31  ;;  %v4109_v15 = vadd.f32 %v4093_v48, %v8167_v42  ;;  %v5911_v17 = vpop.eup %5910 }
 0xb4a   : > { %v4096_v32 = vmul.f32 %v4080_v14, %v8176_v61  ;;  %v5279_v27 = vpop.f32.mrf.mxu0  ;;  %5922 = vtanh.f32 %v4122_v11  ;;  %v4149_v57 = vadd.f32 1.0, %v5911_v17  ;;  %v4127_v48 = vmul.f32 0.7978846, %v4111_v52 }
 0xb4b   : > { %v5913_v41 = vpop.eup %5912  ;;  %v4094_v29 = vmul.f32 %v4078_v2, %v8180_v47  ;;  %v4065_v7 = vmul.f32 0.044715, %v8195_v10  ;;  %v8204_v63 = vadd.f32 %v5279_v27, %v8109_v3  ;;  %v4125_v55 = vmul.f32 0.7978846, %v4109_v15 }
 0xb4c   : > { %v4025_v33 = vpop.f32.mrf.mxu0  ;;  %v4152_v16 = vadd.f32 1.0, %v5913_v41  ;;  %v4083_v45 = vmul.f32 %v4067_v13, %v8187_v54  ;;  %v4112_v35 = vadd.f32 %v4096_v32, %v8176_v61  ;;  %v4167_v8 = vmul.f32 %v4151_v1, %v4039_v53 }
 0xb4d   : > { %v4081_v9 = vmul.f32 %v4065_v7, %v8195_v10  ;;  %v4068_v4 = vmul.f32 0.044715, %v8204_v63  ;;  %v8212_v44 = vadd.f32 %v8109_v3, %v4025_v33  ;;  %v4110_v56 = vadd.f32 %v4094_v29, %v8180_v47  ;;  %v5915_v12 = vpop.eup %5914 }
 0xb4e   : > { %5924 = vtanh.f32 %v4125_v55  ;;  %v4150_v43 = vadd.f32 1.0, %v5915_v12  ;;  %v4168_v24 = vmul.f32 %v4152_v16, %v4040_v20  ;;  %v4128_v31 = vmul.f32 0.7978846, %v4112_v35 }
 0xb4f   : > { %v4097_v18 = vmul.f32 %v4081_v9, %v8195_v10  ;;  %v4084_v60 = vmul.f32 %v4068_v4, %v8204_v63  ;;  %v4066_v22 = vmul.f32 0.044715, %v8212_v44  ;;  %v4126_v14 = vmul.f32 0.7978846, %v4110_v56 }
 0xb50   : > { %v4099_v3 = vmul.f32 %v4083_v45, %v8187_v54  ;;  %5926 = vtanh.f32 %v4127_v48  ;;  %v4165_v15 = vmul.f32 %v4149_v57, %v4037_v34  ;;  %v4166_v17 = vmul.f32 %v4150_v43, %v4038_v38 }
 0xb51   : > { %v4082_v11 = vmul.f32 %v4066_v22, %v8212_v44  ;;  %v5917_v2 = vpop.eup %5916  ;;  %v4100_v13 = vmul.f32 %v4084_v60, %v8204_v63  ;;  %5928 = vtanh.f32 %v4126_v14  ;;  %v4113_v20 = vadd.f32 %v4097_v18, %v8195_v10 }
 0xb52   : > { %5930 = vtanh.f32 %v4128_v31  ;;  %v4181_v29 = vpack.c.bf16 %v4166_v17, %v4165_v15  ;;  %v4182_v7 = vpack.c.bf16 %v4168_v24, %v4167_v8  ;;  %v4115_v1 = vadd.f32 %v4099_v3, %v8187_v54 }
 0xb53   : > { %v5919_v32 = vpop.eup %5918  ;;  %v4098_v27 = vmul.f32 %v4082_v11, %v8212_v44  ;;  %v4129_v53 = vmul.f32 0.7978846, %v4113_v20  ;;  %v4044_v55 = vmul.f32 0.5, %v8148_v5  ;;  %v4116_v38 = vadd.f32 %v4100_v13, %v8204_v63 }
 0xb54   : > { %v5921_v41 = vpop.eup %5920  ;;  %5296 = vmatprep.mubr.bf16.mxu0 %v4181_v29  ;;  %v4153_v34 = vadd.f32 1.0, %v5919_v32  ;;  %v4155_v45 = vadd.f32 1.0, %v5917_v2  ;;  %v4131_v4 = vmul.f32 0.7978846, %v4115_v1  ;;  %v4041_v57 = vmul.f32 0.5, %v8141_v58 }
 0xb55   : > { %v4156_v33 = vadd.f32 1.0, %v5921_v41  ;;  %v4114_v16 = vadd.f32 %v4098_v27, %v8212_v44  ;;  %5297 = vmatmul.mubr.bf16.vlgmr.msra.gmra.mxu0 %v4182_v7  ;;  %5932 = vtanh.f32 %v4129_v53  ;;  %v4042_v56 = vmul.f32 0.5, %v8154_v23 }
 0xb56   : > { %v4132_v12 = vmul.f32 0.7978846, %v4116_v38  ;;  %v4043_v18 = vmul.f32 0.5, %v8134_v50  ;;  %v4169_v5 = vmul.f32 %v4153_v34, %v4041_v57  ;;  %v4045_v8 = vmul.f32 0.5, %v8167_v42 }
 0xb57   : > { %v5923_v52 = vpop.eup %5922  ;;  %v4130_v9 = vmul.f32 0.7978846, %v4114_v16  ;;  %v4172_v60 = vmul.f32 %v4156_v33, %v4044_v55  ;;  %v4046_v50 = vmul.f32 0.5, %v8180_v47  ;;  %v4047_v13 = vmul.f32 0.5, %v8161_v21 }
 0xb58   : > { %v4154_v35 = vadd.f32 1.0, %v5923_v52  ;;  %v4171_v43 = vmul.f32 %v4155_v45, %v4043_v18  ;;  %v4048_v15 = vmul.f32 0.5, %v8176_v61  ;;  %v4049_v42 = vmul.f32 0.5, %v8195_v10  ;;  %v4752_v10 = vld [vmem:[%s8522_s8] ss:$0 sm:$0xff] }
 0xb59   : > { %5934 = vtanh.f32 %v4130_v9  ;;  %v4050_v21 = vmul.f32 0.5, %v8212_v44  ;;  %v4051_v55 = vmul.f32 0.5, %v8187_v54  ;;  %v4052_v45 = vmul.f32 0.5, %v8204_v63 }
 0xb5a   : > { %v4170_v22 = vmul.f32 %v4154_v35, %v4042_v56  ;;  %5936 = vtanh.f32 %v4131_v4  ;;  %v4184_v14 = vpack.c.bf16 %v4172_v60, %v4171_v43 }
 0xb5b   : > { %v5925_v48 = vpop.eup %5924  ;;  %5938 = vtanh.f32 %v4132_v12 }
 0xb5c   : > { %v4183_v24 = vpack.c.bf16 %v4170_v22, %v4169_v5  ;;  %v4157_v3 = vadd.f32 1.0, %v5925_v48 }
 0xb5d   : > { %v5927_v31 = vpop.eup %5926 }
 0xb5e   : > { %5300 = vmatprep.mubr.bf16.mxu1 %v4183_v24  ;;  %v5929_v58 = vpop.eup %5928  ;;  %v4159_v23 = vadd.f32 1.0, %v5927_v31  ;;  %v4173_v32 = vmul.f32 %v4157_v3, %v4045_v8 }
 0xb5f   : > { %5301 = vmatmul.mubr.bf16.vlgmr.msra.gmra.mxu1 %v4184_v14  ;;  %v5931_v11 = vpop.eup %5930  ;;  %v4158_v2 = vadd.f32 1.0, %v5929_v58 }
 0xb60   : > { %v4160_v17 = vadd.f32 1.0, %v5931_v11  ;;  %v4175_v20 = vmul.f32 %v4159_v23, %v4047_v13 }
 0xb61   : > { %v4174_v27 = vmul.f32 %v4158_v2, %v4046_v50 }
 0xb62   : > { %v4176_v41 = vmul.f32 %v4160_v17, %v4048_v15  ;;  %v5933_v29 = vpop.eup %5932 }
 0xb63   : > { %v4185_v7 = vpack.c.bf16 %v4174_v27, %v4173_v32  ;;  %v4161_v16 = vadd.f32 1.0, %v5933_v29 }
 0xb64   : > { %v4186_v33 = vpack.c.bf16 %v4176_v41, %v4175_v20 }
 0xb65   : > { %5304 = vmatprep.mubr.bf16.mxu1 %v4185_v7  ;;  %v4177_v38 = vmul.f32 %v4161_v16, %v4049_v42 }
 0xb66   : > { %v5935_v53 = vpop.eup %5934 }
 0xb67   : > { %v5937_v1 = vpop.eup %5936  ;;  %5305 = vmatmul.mubr.bf16.gmra.mxu1 %v4186_v33  ;;  %v4162_v47 = vadd.f32 1.0, %v5935_v53 }
 0xb68   : > { %v5939_v61 = vpop.eup %5938  ;;  %v4163_v34 = vadd.f32 1.0, %v5937_v1 }
 0xb69   : > { %v4178_v52 = vmul.f32 %v4162_v47, %v4050_v21  ;;  %v4164_v9 = vadd.f32 1.0, %v5939_v61 }
 0xb6a   : > { %v4179_v57 = vmul.f32 %v4163_v34, %v4051_v55 }
 0xb6b   : > { %v4187_v4 = vpack.c.bf16 %v4178_v52, %v4177_v38  ;;  %v4180_v56 = vmul.f32 %v4164_v9, %v4052_v45 }
 0xb6d   : > { %5308 = vmatprep.mubr.bf16.mxu1 %v4187_v4  ;;  %v4188_v35 = vpack.c.bf16 %v4180_v56, %v4179_v57 }
 0xb6f   : > { %5309 = vmatmul.mubr.bf16.gmra.mxu1 %v4188_v35 }
 0xc15   : > { %v5298_v44 = vpop.f32.mrf.mxu0 }
 0xc16   : > { %v4303_v12 = vadd.f32 %v5298_v44, %v4752_v10 }
 0xc17   : > { %v4294_v54 = vpop.f32.mrf.mxu0 }
 0xc18   : > { %v4359_v18 = vadd.f32 %v4303_v12, %v7852_v59  ;;  %v4295_v60 = vadd.f32 %v4752_v10, %v4294_v54 }
 0xc19   : > { %v5299_v5 = vpop.f32.mrf.mxu0 }
 0xc1a   : > { %4375 = vst.msk [vmem:[#allocation2 + $0x10] sm:$0xff] %vm952_vm4, %v4359_v18  ;;  %v8247_v63 = vadd.f32 %v4295_v60, %v7850_v46  ;;  %v4306_v22 = vadd.f32 %v5299_v5, %v4752_v10 }
 0xc1b   : > { %v4297_v48 = vpop.f32.mrf.mxu0 }
 0xc1c   : > { %4373 = vst.msk [vmem:[#allocation2] sm:$0xff] %vm952_vm4, %v8247_v63  ;;  %v4360_v43 = vadd.f32 %v4306_v22, %v7860_v36  ;;  %v4298_v24 = vadd.f32 %v4752_v10, %v4297_v48 }
 0xc1e   : > { %4376 = vst.msk [vmem:[#allocation2 + $0x18] sm:$0xff] %vm952_vm4, %v4360_v43  ;;  %v4358_v59 = vadd.f32 %v4298_v24, %v7858_v51 }
 0xc1f   : > { %v5302_v14 = vpop.f32.mrf.mxu1 }
 0xc20   : > { %v4319_v31 = vadd.f32 %v5302_v14, %v4752_v10  ;;  %4374 = vst.msk [vmem:[#allocation2 + $0x8] sm:$0xff] %vm952_vm4, %v4358_v59 }
 0xc21   : > { %v4310_v3 = vpop.f32.mrf.mxu1 }
 0xc22   : > { %v4363_v46 = vadd.f32 %v4319_v31, %v7876_v6  ;;  %v4311_v58 = vadd.f32 %v4752_v10, %v4310_v3 }
 0xc23   : > { %v5303_v23 = vpop.f32.mrf.mxu1 }
 0xc24   : > { %4379 = vst.msk [vmem:[#allocation2 + $0x30] sm:$0xff] %vm952_vm4, %v4363_v46  ;;  %v4361_v11 = vadd.f32 %v4311_v58, %v7868_v39  ;;  %v4322_v8 = vadd.f32 %v5303_v23, %v4752_v10 }
 0xc25   : > { %v4313_v36 = vpop.f32.mrf.mxu1 }
 0xc26   : > { %4377 = vst.msk [vmem:[#allocation2 + $0x20] sm:$0xff] %vm952_vm4, %v4361_v11  ;;  %v4364_v50 = vadd.f32 %v4322_v8, %v7878_v28  ;;  %v4314_v2 = vadd.f32 %v4752_v10, %v4313_v36 }
 0xc27   : > { %v5306_v51 = vpop.f32.mrf.mxu1 }
 0xc28   : > { %4380 = vst.msk [vmem:[#allocation2 + $0x38] sm:$0xff] %vm952_vm4, %v4364_v50  ;;  %v4362_v13 = vadd.f32 %v4314_v2, %v7874_v30  ;;  %v4335_v15 = vadd.f32 %v5306_v51, %v4752_v10 }
 0xc29   : > { %v4326_v6 = vpop.f32.mrf.mxu1 }
 0xc2a   : > { %4378 = vst.msk [vmem:[#allocation2 + $0x28] sm:$0xff] %vm952_vm4, %v4362_v13  ;;  %v4367_v17 = vadd.f32 %v4335_v15, %v7896_v25  ;;  %v4327_v32 = vadd.f32 %v4752_v10, %v4326_v6 }
 0xc2b   : > { %v5307_v39 = vpop.f32.mrf.mxu1 }
 0xc2c   : > { %4383 = vst.msk [vmem:[#allocation2 + $0x50] sm:$0xff] %vm952_vm4, %v4367_v17  ;;  %v4365_v27 = vadd.f32 %v4327_v32, %v7888_v26  ;;  %v4338_v20 = vadd.f32 %v5307_v39, %v4752_v10 }
 0xc2d   : > { %v4329_v28 = vpop.f32.mrf.mxu1 }
 0xc2e   : > { %4381 = vst.msk [vmem:[#allocation2 + $0x40] sm:$0xff] %vm952_vm4, %v4365_v27  ;;  %v4368_v41 = vadd.f32 %v4338_v20, %v7898_v40  ;;  %v4330_v29 = vadd.f32 %v4752_v10, %v4329_v28 }
 0xc2f   : > { %v5310_v30 = vpop.f32.mrf.mxu1 }
 0xc30   : > { %4384 = vst.msk [vmem:[#allocation2 + $0x58] sm:$0xff] %vm952_vm4, %v4368_v41  ;;  %v4366_v7 = vadd.f32 %v4330_v29, %v7894_v0  ;;  %v4351_v33 = vadd.f32 %v5310_v30, %v4752_v10 }
 0xc31   : > { %v4342_v25 = vpop.f32.mrf.mxu1 }
 0xc32   : > { %4382 = vst.msk [vmem:[#allocation2 + $0x48] sm:$0xff] %vm952_vm4, %v4366_v7  ;;  %v4371_v16 = vadd.f32 %v4351_v33, %v7916_v37  ;;  %v4343_v53 = vadd.f32 %v4752_v10, %v4342_v25 }
 0xc33   : > { %v5311_v26 = vpop.f32.mrf.mxu1 }
 0xc34   : > { %4387 = vst.msk [vmem:[#allocation2 + $0x70] sm:$0xff] %vm952_vm4, %v4371_v16  ;;  %v4369_v1 = vadd.f32 %v4343_v53, %v7908_v49  ;;  %v4354_v42 = vadd.f32 %v5311_v26, %v4752_v10 }
 0xc35   : > { %v4345_v40 = vpop.f32.mrf.mxu1 }
 0xc36   : > { %4385 = vst.msk [vmem:[#allocation2 + $0x60] sm:$0xff] %vm952_vm4, %v4369_v1  ;;  %v4372_v21 = vadd.f32 %v4354_v42, %v7918_v62  ;;  %v4346_v47 = vadd.f32 %v4752_v10, %v4345_v40  ;;  %4392 = sbr.rel (%p4761_p1) target bundleno = 3641 (0xe39), region = 108 }
 0xc38   : > { %4388 = vst.msk [vmem:[#allocation2 + $0x78] sm:$0xff] %vm952_vm4, %v4372_v21  ;;  %v4370_v0 = vadd.f32 %v4346_v47, %v7914_v19 }
 0xc3a   : > { %4386 = vst.msk [vmem:[#allocation2 + $0x68] sm:$0xff] %vm952_vm4, %v4370_v0 }
 0xc3b   : > { %vm4395_vm9 = vcmask 253952   ;;  %v5956_v19 = vld [vmem:[%s8524_s16 + $0x8] sm:$0xff]   ;;  %v6064_v38 = vmov 0.0   ;;  %vm6065_vm10 = vmmov 0   ;;  %v5957_v52 = vld [vmem:[%s8524_s16] sm:$0xff]  }
 0xc3c   : > { %v4396_v37 = vsel %vm4395_vm9, %v8247_v63, 0.0  ;;  %5312 = vmatprep.subr.bf16.mxu0 %v6064_v38  ;;  %5316 = vmatprep.mubr.msk.bf16.mxu0 %vm6065_vm10, %v6064_v38  ;;  %v4393_v56 = vld [vmem:[%s8525_s0] sm:$0x1] }
 0xc3d   : > { %4397 = vadd.xlane.f32.xlu0 %v4396_v37  ;;  %5313 = vmatpush3.bf16.msra.mxu0 %v5956_v19  ;;  %v4394_v10 = vld [vmem:[%s8526_s27] sm:$0x1] }
 0xc3e   : > { %5314 = vmatprep.subr.bf16.mxu0 %v6064_v38  ;;  %v4416_v18 = vld [vmem:[%s8527_s25] sm:$0x1] }
 0xc41   : > { %5315 = vmatpush3.bf16.msra.mxu0 %v5957_v52 }
 0xcc6   : > { %v4398_v49 = vpop.xlane.xlu0 %4397 }
 0xcc7   : > { %v4399_v61 = vmul.f32 0.03125, %v4398_v49 }
 0xcc9   : > { %v4400_v55 = vsub.f32 %v8247_v63, %v4399_v61 }
 0xccb   : > { %v4401_v34 = vmul.f32 %v4400_v55, %v4400_v55 }
 0xccd   : > { %v4402_v62 = vsel %vm4395_vm9, %v4401_v34, 0.0 }
 0xcce   : > { %4403 = vadd.xlane.f32.xlu0 %v4402_v62 }
 0xd57   : > { %v4404_v45 = vpop.xlane.xlu0 %4403 }
 0xd58   : > { %v4405_v9 = vmul.f32 0.03125, %v4404_v45 }
 0xd5a   : > { %v4406_v4 = vadd.f32 1e-05, %v4405_v9 }
 0xd5c   : > { %5958 = vrsqrt.f32 %v4406_v4 }
 0xd69   : > { %v5959_v57 = vpop.eup %5958 }
 0xd6a   : > { %v4408_v35 = vmul.f32 %v5959_v57, %v4400_v55 }
 0xd6c   : > { %v4409_v44 = vmul.f32 %v4408_v35, %v4393_v56 }
 0xd6e   : > { %v4410_v12 = vadd.f32 %v4409_v44, %v4394_v10 }
 0xd70   : > { %v4411_v54 = vpack.c.bf16 %v4410_v12, %v4410_v12 }
 0xd72   : > { %5317 = vmatmul.mubr.msk.bf16.vlgmr.msra.gmra.mxu0 %vm952_vm4, %v4411_v54 }
 0xe32   : > { %v4466_v60 = vpop.f32.mrf.mxu0 }
 0xe33   : > { %v4467_v5 = vadd.f32 %v4466_v60, %v4416_v18 }
 0xe34   : > { %v5318_v63 = vpop.f32.mrf.mxu0 }
 0xe35   : > { %4472 = vst [vmem:[%s6303_s30] sm:$0x1] %v4467_v5 }
 0xe36   : > { %v4469_v22 = vpop.f32.mrf.mxu0 }
 0xe38   : > { %v5319_v48 = vpop.f32.mrf.mxu0 }
 0xe39 PF: > { %s8528_s7 = sld [smem:[#allocation9_spill]]  ;;  %s4486_s26 = sshll.u32 %s6303_s30, 4  ;;  %s4487_s26 = int_to_ptr.vmem [resolvable:$true] %s4486_s26 }
 0xe3a   : > { %s8530_s29 = sld [smem:[#allocation62_spill]]  ;;  %s8531_s28 = sand.u32 1, %s6028_s22  }
 0xe3b   : > { %s4474_s4 = scalar_lea.sflag [#allocation4], %s8531_s28  ;;  %s5960_s0 = scalar_lea.vmem %s4487_s26, 16 }
 0xe3c   : > { %p5961_p2 = scmp.ne.s32.totalorder %s4487_s26, %s5960_s0  ;;  %s6066_s21 = smov [#allocation3]  }
 0xe3d   : > { %s5964_s20 = sshll.u32 %s6066_s21, 4  ;;  %s5965_s20 = int_to_ptr.vmem [resolvable:$false] %s5964_s20 }
 0xe3e   : > { %p5962_p4 = pnand %p5961_p2, %p6221_p3  ;;  %s5966_s27 = scalar_lea.vmem %s5965_s20, 32 }
 0xe3f   : > { %s4765_s8 = sshll.u32 %s8528_s7, 4  ;;  %p5967_p6 = scmp.lt.s32.totalorder %s4487_s26, %s5965_s20 }
 0xe40   : > { %s4484_s24 = scalar_lea.hbm %s8530_s29, %s4765_s8  ;;  %p5963_p5 = pneg %p5962_p4 }
 0xe41   : > { %p5968_p7 = scmp.lt.s32.totalorder %s5966_s27, %s5960_s0 }
 0xe43   : > { %p5969_p8 = por %p5968_p7, %p5967_p6 }
 0xe45   : > { %p5970_p10 = pnand %p5969_p8, %p5963_p5 }
 0xe47   : > { %5973 = shalt.err (!%p5970_p10)
}
 0xe48   : > { %s5974_s17 = scalar_lea.hbm %s4484_s24, 16  ;;  %s5978_s25 = scalar_lea.hbm %s8530_s29, 32 }
 0xe49   : > { %p5975_p11 = scmp.ne.s32.totalorder %s4484_s24, %s5974_s17  ;;  %p5979_p0 = scmp.lt.s32.totalorder %s4484_s24, %s8530_s29 }
 0xe4a   : > { %p5980_p1 = scmp.lt.s32.totalorder %s5978_s25, %s5974_s17 }
 0xe4b   : > { %p5976_p12 = pnand %p5975_p11, %p6221_p3 }
 0xe4c   : > { %p5981_p2 = por %p5980_p1, %p5979_p0 }
 0xe4d   : > { %p5977_p13 = pneg %p5976_p12 }
 0xe4f   : > { %p5982_p4 = pnand %p5981_p2, %p5977_p13 }
 0xe51   : > { %5985 = shalt.err (!%p5982_p4)
}
 0xe52   : > { %5368 = dma.vmem_to_hbm [thread:$0]  (%p6221_p3), %s4487_s26, 16, %s4484_s24, %s4474_s4  }
 0xe53 PF: > { %s8532_s1 = sld [smem:[#allocation12_spill]] }
 0xe54   : > { %s8533_s3 = sld [smem:[#allocation6_spill]] }
 0xe59   : > { %p5374_p5 = scmp.ge.s32.totalorder %s8532_s1, 2 }
 0xe5a   : > { %s4498_s0 = sand.u32 1, %s8533_s3  }
 0xe5b   : > { %p5371_p6 = pnand %p5374_p5, %p6231_p9  ;;  %s4499_s21 = scalar_lea.sflag [#allocation4], %s4498_s0 }
 0xe5d   : > { %p5372_p7 = pneg %p5371_p6 }
 0xe5f   : > { %6019 = dma.done.wait (%p5372_p7), %s4499_s21, 16  }
 0xe60   : > { %6021 = vsyncadd (%p5372_p7), %s4499_s21, 4294967280  ;;  %s33_s26 = sadd.s32 1, %s8532_s1   ;;  %s8535_s20 = sld [smem:[#allocation7_spill]] }
 0xe61   : > { %p30_p8 = scmp.ge.s32.totalorder %s33_s26, 6   ;;  %s8536_s23 = sld [smem:[#allocation17_spill]] }
 0xe62   : > { %s8537_s24 = sld [smem:[#allocation10_spill]]  ;;  %s8541_s1 = smov %s6028_s22 }
 0xe63   : > { %s8538_s2 = sld [smem:[#allocation11_spill]]  ;;  %32 = sbr.rel (!%p30_p8) target bundleno = 18 (0x12), region = 176 }
 0xe64   : > { %s8539_s25 = sld [smem:[#allocation13_spill]] }
 0xe65   : > { %s8540_s3 = sld [smem:[#allocation15_spill]] }
 0xe66   : > { %s8542_s22 = smov %s8535_s20 }
 0xe68   :  { %4503 = vsyncpa [#allocation4], 1 }
 0xe69   :  { %4505 = vsyncpa [#allocation4 + $0x1], 1 }

</bundles_post_ra>
